<compile_context>
chip_gen: v5e
topology: v5e:2x2
jax: 0.10.0
libtpu: 0.0.40
codegen_flags: <defaults>
</compile_context>

<pallas_src>
import jax
import jax.numpy as jnp
from jax.experimental import pallas as pl
from jax.experimental.pallas import tpu as pltpu  # available for CompilerParams; not needed at these sizes

# ----------------------------- configuration --------------------------------
INPUT_DIM = 4
NUM_FILTERS = [[32], [32]]      # two stages -> one SpatialTransformer in between
OUTPUT_DIM = 3
BATCH = 2
FIRST_K = 4
NUM_HEADS = 1
CONTEXT_DIM = 32                # GroupNorm(32, C) requires C % 32 == 0 -> C = 32

# ----------------------------- Pallas matmul kernels -------------------------

def _mm_bias_act_kernel(act):
    def kernel(a_ref, w_ref, b_ref, o_ref):
        y = jnp.dot(a_ref[...], w_ref[...], preferred_element_type=jnp.float32)
        y = y + b_ref[...]
        if act == "tanh":
            y = jnp.tanh(y)
        elif act == "relu":
            y = jnp.maximum(y, 0.0)
        o_ref[...] = y.astype(o_ref.dtype)
    return kernel


def pallas_matmul(a, w, bias, act="none"):
    """Single whole-array block (M,K)@(K,N)+bias (+act): bf16 MXU operands, f32 epilogue."""
    M, K = a.shape
    _, N = w.shape
    if bias is None:
        bias = jnp.zeros((N,), jnp.float32)
    return pl.pallas_call(
        _mm_bias_act_kernel(act),
        out_shape=jax.ShapeDtypeStruct((M, N), jnp.float32),
    )(a.astype(jnp.bfloat16), w.astype(jnp.bfloat16),
      bias.reshape(1, N).astype(jnp.float32))


def _mm_bn_relu_kernel(eps):
    def kernel(a_ref, w_ref, b_ref, g_ref, be_ref, o_ref):
        y = jnp.dot(a_ref[...], w_ref[...], preferred_element_type=jnp.float32)
        y = y + b_ref[...]
        mu = jnp.mean(y, axis=0, keepdims=True)                  # per-channel over N*H*W rows
        var = jnp.mean((y - mu) ** 2, axis=0, keepdims=True)     # biased var (PyTorch BN fwd)
        y = (y - mu) * jax.lax.rsqrt(var + eps)
        y = jnp.maximum(y * g_ref[...] + be_ref[...], 0.0)
        o_ref[...] = y.astype(o_ref.dtype)
    return kernel


def pallas_matmul_bn_relu(a, w, bias, gamma, beta, eps=1e-5):
    """Fused conv-matmul -> BatchNorm(batch stats) -> ReLU in one pallas_call."""
    M, K = a.shape
    _, N = w.shape
    return pl.pallas_call(
        _mm_bn_relu_kernel(eps),
        out_shape=jax.ShapeDtypeStruct((M, N), jnp.float32),
    )(a.astype(jnp.bfloat16), w.astype(jnp.bfloat16),
      bias.reshape(1, N).astype(jnp.float32),
      gamma.reshape(1, N).astype(jnp.float32),
      beta.reshape(1, N).astype(jnp.float32))


# --------------------- fused SpatialTransformer kernel -----------------------

def _spatial_transformer_kernel(heads, dh, inner, eps_gn=1e-6, eps_ln=1e-5):
    scale = dh ** -0.5

    def mm(h, w_ref):                                  # (N,T,D)@(D,E) -> (N,T,E); bf16 MXU, f32 acc
        n, t, d = h.shape
        y = jnp.dot(h.reshape(n * t, d).astype(jnp.bfloat16), w_ref[...],
                    preferred_element_type=jnp.float32)
        return y.reshape(n, t, w_ref.shape[-1])

    def layer_norm(h, g_ref, b_ref):
        mu = jnp.mean(h, axis=-1, keepdims=True)
        var = jnp.mean((h - mu) ** 2, axis=-1, keepdims=True)
        return (h - mu) * jax.lax.rsqrt(var + eps_ln) * g_ref[...] + b_ref[...]

    def mha(q, k, v, wo_ref, bo_ref):
        outs = []
        for hd in range(heads):                        # heads is static (=1 here)
            sl = slice(hd * dh, (hd + 1) * dh)
            s = jnp.einsum('nqd,nkd->nqk',
                           q[..., sl].astype(jnp.bfloat16),
                           k[..., sl].astype(jnp.bfloat16),
                           preferred_element_type=jnp.float32) * scale
            s = s - jnp.max(s, axis=-1, keepdims=True)
            e = jnp.exp(s)
            p = e * pl.reciprocal(jnp.sum(e, axis=-1, keepdims=True), approx=True)
            outs.append(jnp.einsum('nqk,nkd->nqd',
                                   p.astype(jnp.bfloat16),
                                   v[..., sl].astype(jnp.bfloat16),
                                   preferred_element_type=jnp.float32))
        o = outs[0] if heads == 1 else jnp.concatenate(outs, axis=-1)
        return mm(o, wo_ref) + bo_ref[...]

    def gelu(x):
        # tanh approximation of GELU (keeps erf out of the Mosaic kernel)
        return 0.5 * x * (1.0 + jnp.tanh(0.7978845608028654 * (x + 0.044715 * x * x * x)))

    def kernel(x_ref, ctx_ref, gn_g, gn_b, pin_w, pin_b,
               ln1_g, ln1_b, wqkv1, wo1, bo1,
               ln2_g, ln2_b, wq2, wkv2, wo2, bo2,
               ln3_g, ln3_b, ffw1, ffb1, ffw2, ffb2,
               pout_w, pout_b, o_ref):
        x = x_ref[...]                                 # (N, T, C)  f32 token view
        ctx = ctx_ref[...]                             # (N, Tc, Dc)

        # GroupNorm(32, C) with C == groups -> per-(n, channel) stats over the T tokens,
        # affine fused in the same kernel.
        mu = jnp.mean(x, axis=1, keepdims=True)
        var = jnp.mean((x - mu) ** 2, axis=1, keepdims=True)
        h = (x - mu) * jax.lax.rsqrt(var + eps_gn) * gn_g[...] + gn_b[...]

        h = mm(h, pin_w) + pin_b[...]                  # proj_in (1x1 conv == per-token linear)

        hn = layer_norm(h, ln1_g, ln1_b)               # self-attention, single fused QKV matmul
        qkv = mm(hn, wqkv1)
        h = h + mha(qkv[..., :inner], qkv[..., inner:2 * inner], qkv[..., 2 * inner:], wo1, bo1)

        hn = layer_norm(h, ln2_g, ln2_b)               # cross-attention, fused KV matmul
        q = mm(hn, wq2)
        kv = mm(ctx, wkv2)
        h = h + mha(q, kv[..., :inner], kv[..., inner:], wo2, bo2)

        hn = layer_norm(h, ln3_g, ln3_b)               # GEGLU feed-forward
        ff = mm(hn, ffw1) + ffb1[...]
        h = h + mm(ff[..., :4 * inner] * gelu(ff[..., 4 * inner:]), ffw2) + ffb2[...]

        o_ref[...] = (mm(h, pout_w) + pout_b[...] + x).astype(o_ref.dtype)   # proj_out + residual

    return kernel


def spatial_transformer(x_nhwc, context, p, heads):
    N, H, W, C = x_nhwc.shape
    # TODO(synk): GroupNorm path assumes 32 groups with one channel per group (C == 32,
    # true for this config); >1 channel per group would need a grouped in-kernel reduce.
    assert C == 32
    dh = C // heads
    inner = heads * dh
    T = H * W
    blk = p['block']
    bf = lambda w: w.astype(jnp.bfloat16)
    row = lambda v: v.reshape(1, -1).astype(jnp.float32)
    w_qkv1 = jnp.concatenate([blk['attn1']['wq'], blk['attn1']['wk'], blk['attn1']['wv']], axis=1)
    w_kv2 = jnp.concatenate([blk['attn2']['wk'], blk['attn2']['wv']], axis=1)
    out = pl.pallas_call(
        _spatial_transformer_kernel(heads, dh, inner),
        out_shape=jax.ShapeDtypeStruct((N, T, C), jnp.float32),
    )(x_nhwc.reshape(N, T, C).astype(jnp.float32), context.astype(jnp.float32),
      row(p['gn_g']), row(p['gn_b']), bf(p['proj_in_w']), row(p['proj_in_b']),
      row(blk['ln1_g']), row(blk['ln1_b']), bf(w_qkv1), bf(blk['attn1']['wo']), row(blk['attn1']['bo']),
      row(blk['ln2_g']), row(blk['ln2_b']), bf(blk['attn2']['wq']), bf(w_kv2),
      bf(blk['attn2']['wo']), row(blk['attn2']['bo']),
      row(blk['ln3_g']), row(blk['ln3_b']), bf(blk['ff']['w1']), row(blk['ff']['b1']),
      bf(blk['ff']['w2']), row(blk['ff']['b2']),
      bf(p['proj_out_w']), row(p['proj_out_b']))
    return out.reshape(N, H, W, C)


# ---------------- conv / conv-transpose via NHWC im2col + fused matmul -------

def _dilate_nhwc(x, stride):
    if stride == 1:
        return x
    N, H, W, C = x.shape
    out = jnp.zeros((N, (H - 1) * stride + 1, (W - 1) * stride + 1, C), x.dtype)
    return out.at[:, ::stride, ::stride, :].set(x)


def _im2col_nhwc(xp, kH, kW):
    N, H, W, C = xp.shape
    Ho, Wo = H - kH + 1, W - kW + 1
    cols = [xp[:, i:i + Ho, j:j + Wo, :] for i in range(kH) for j in range(kW)]
    patches = jnp.concatenate(cols, axis=-1)           # (N, Ho, Wo, kH*kW*C)
    return patches.reshape(N * Ho * Wo, kH * kW * C), Ho, Wo


def _deconv_cols(x_nhwc, w_iohw, stride, padding):
    """ConvTranspose2d == dilate + pad(k-1-p) + conv with spatially flipped, in/out-swapped weight."""
    Ci, Co, kH, kW = w_iohw.shape
    w_conv = jnp.flip(w_iohw, axis=(2, 3)).transpose(1, 0, 2, 3)     # (Co, Ci, kH, kW)
    p = kH - 1 - padding
    xp = jnp.pad(_dilate_nhwc(x_nhwc, stride), ((0, 0), (p, p), (p, p), (0, 0)))
    cols, Ho, Wo = _im2col_nhwc(xp, kH, kW)
    wmat = w_conv.transpose(2, 3, 1, 0).reshape(kH * kW * Ci, Co)
    # TODO(synk): stride-2 dilation leaves ~75% zero taps in `cols`; a 4-phase sub-pixel
    # decomposition would cut K 4x but is omitted at these tiny sizes.
    return cols, wmat, Ho, Wo, Co


def deconv_bn_relu(x_nhwc, blk, stride, padding):
    N = x_nhwc.shape[0]
    cols, wmat, Ho, Wo, Co = _deconv_cols(x_nhwc, blk['w'], stride, padding)
    y = pallas_matmul_bn_relu(cols, wmat, blk['b'], blk['bn_g'], blk['bn_b'])
    return y.reshape(N, Ho, Wo, Co)


def deconv_act(x_nhwc, w, b, stride, padding, act):
    N = x_nhwc.shape[0]
    cols, wmat, Ho, Wo, Co = _deconv_cols(x_nhwc, w, stride, padding)
    y = pallas_matmul(cols, wmat, b, act=act)
    return y.reshape(N, Ho, Wo, Co)


def conv2d_nhwc(x_nhwc, w_oihw, b, padding, act="none"):
    N = x_nhwc.shape[0]
    Co, Ci, kH, kW = w_oihw.shape
    xp = jnp.pad(x_nhwc, ((0, 0), (padding, padding), (padding, padding), (0, 0)))
    cols, Ho, Wo = _im2col_nhwc(xp, kH, kW)
    wmat = w_oihw.transpose(2, 3, 1, 0).reshape(kH * kW * Ci, Co)
    y = pallas_matmul(cols, wmat, b, act=act)
    return y.reshape(N, Ho, Wo, Co)


# ----------------------------- full generator --------------------------------

def generator_forward(params, x, cond):
    x = jnp.transpose(x, (0, 2, 3, 1))                 # NCHW -> NHWC once at the boundary
    text_cond = cond[:, None, :]                       # cond.unsqueeze(1)
    L = len(params['stages'])
    for i, stage in enumerate(params['stages']):
        for j, blk in enumerate(stage):
            stride, pad = (1, 0) if (i == 0 and j == 0) else (2, 1)
            x = deconv_bn_relu(x, blk, stride, pad)    # ConvTranspose + BN + ReLU fused
        if i < L - 1:
            x = spatial_transformer(x, text_cond, params['attn'][i], heads=NUM_HEADS)
    out = deconv_act(x, params['out_w'], params['out_b'], stride=2, padding=1, act="tanh")
    # permute(1,0,2,3) + Conv2d(batch -> 1, k=3, p=1) + permute back, expressed in NHWC:
    res_in = jnp.transpose(out, (3, 1, 2, 0))          # (C_out, H, W, N_batch)
    adv = conv2d_nhwc(res_in, params['res_w'], params['res_b'], padding=1)   # (C_out, H, W, 1)
    return jnp.transpose(adv, (3, 0, 1, 2))            # -> (1, C_out, H, W) NCHW


# ----------------------------- parameter init --------------------------------

class KeyGen:
    def __init__(self, seed):
        self.key = jax.random.PRNGKey(seed)

    def __call__(self):
        self.key, sub = jax.random.split(self.key)
        return sub


def _nrm(kg, shape, std=0.02):
    return std * jax.random.normal(kg(), shape, jnp.float32)


def init_spatial_transformer(kg, C, heads, d_head, context_dim):
    inner = heads * d_head
    # TODO(synk): LDM zero-initializes proj_out (zero_module); small normal used so attention
    # compute visibly contributes to the output.
    return {
        'gn_g': jnp.ones((C,), jnp.float32), 'gn_b': jnp.zeros((C,), jnp.float32),
        'proj_in_w': _nrm(kg, (C, inner)), 'proj_in_b': jnp.zeros((inner,), jnp.float32),
        'proj_out_w': _nrm(kg, (inner, C)), 'proj_out_b': jnp.zeros((C,), jnp.float32),
        'block': {
            'ln1_g': jnp.ones((inner,), jnp.float32), 'ln1_b': jnp.zeros((inner,), jnp.float32),
            'ln2_g': jnp.ones((inner,), jnp.float32), 'ln2_b': jnp.zeros((inner,), jnp.float32),
            'ln3_g': jnp.ones((inner,), jnp.float32), 'ln3_b': jnp.zeros((inner,), jnp.float32),
            'attn1': {'wq': _nrm(kg, (inner, inner)), 'wk': _nrm(kg, (inner, inner)),
                      'wv': _nrm(kg, (inner, inner)), 'wo': _nrm(kg, (inner, inner)),
                      'bo': jnp.zeros((inner,), jnp.float32)},
            'attn2': {'wq': _nrm(kg, (inner, inner)), 'wk': _nrm(kg, (context_dim, inner)),
                      'wv': _nrm(kg, (context_dim, inner)), 'wo': _nrm(kg, (inner, inner)),
                      'bo': jnp.zeros((inner,), jnp.float32)},
            'ff': {'w1': _nrm(kg, (inner, inner * 8)), 'b1': jnp.zeros((inner * 8,), jnp.float32),
                   'w2': _nrm(kg, (inner * 4, inner)), 'b2': jnp.zeros((inner,), jnp.float32)},
        },
    }


def init_params(seed):
    kg = KeyGen(seed)
    stages, attn = [], []
    prev = INPUT_DIM
    for i, filters in enumerate(NUM_FILTERS):
        stage = []
        for j, cout in enumerate(filters):
            k = FIRST_K if (i == 0 and j == 0) else 4
            stage.append({
                'w': _nrm(kg, (prev, cout, k, k)),     # ConvTranspose2d weight (Cin,Cout,kH,kW)
                'b': jnp.zeros((cout,), jnp.float32),
                'bn_g': jnp.ones((cout,), jnp.float32),
                'bn_b': jnp.zeros((cout,), jnp.float32),
            })
            prev = cout
        stages.append(stage)
        if i < len(NUM_FILTERS) - 1:
            C = filters[-1]
            attn.append(init_spatial_transformer(kg, C, NUM_HEADS, C // NUM_HEADS, CONTEXT_DIM))
    return {
        'stages': stages,
        'attn': attn,
        'out_w': _nrm(kg, (prev, OUTPUT_DIM, 4, 4)), 'out_b': jnp.zeros((OUTPUT_DIM,), jnp.float32),
        'res_w': _nrm(kg, (1, BATCH, 3, 3)), 'res_b': jnp.zeros((1,), jnp.float32),
    }


# ------------------------------------ main ------------------------------------

if __name__ == "__main__":
    params = init_params(0)
    kx, kc = jax.random.split(jax.random.PRNGKey(0))
    x = jax.random.normal(kx, (BATCH, INPUT_DIM, 1, 1), jnp.float32)      # latent input
    cond = jax.random.normal(kc, (BATCH, CONTEXT_DIM), jnp.float32)       # text condition

    fwd = jax.jit(generator_forward)
    out = jax.block_until_ready(fwd(params, x, cond))

    # (2,4,1,1) -> 4x4 -> fused transformer -> 8x8 -> 16x16 -> tanh -> permute/res-conv/permute
    assert out.shape == (1, OUTPUT_DIM, 16, 16), out.shape
    assert bool(jnp.all(jnp.isfinite(out)))
    print("KERNEL_OK")
</pallas_src>

<mosaic_0001>
module attributes {stable_mosaic.version = 11 : i64} {
  func.func @kernel(%arg0: memref<32x64xbf16, #tpu.memory_space<vmem>>, %arg1: memref<64x32xbf16, #tpu.memory_space<vmem>>, %arg2: memref<1x32xf32, #tpu.memory_space<vmem>>, %arg3: memref<1x32xf32, #tpu.memory_space<vmem>>, %arg4: memref<1x32xf32, #tpu.memory_space<vmem>>, %arg5: memref<32x32xf32, #tpu.memory_space<vmem>>) attributes {dimension_semantics = [], scalar_prefetch = 0 : i64, scratch_operands = 0 : i64, tpu.core_type = #tpu.core_type<tc>} {
    %c0 = arith.constant 0 : index
    %c0_0 = arith.constant 0 : index
    %0 = vector.load %arg0[%c0, %c0_0] : memref<32x64xbf16, #tpu.memory_space<vmem>>, vector<32x64xbf16>
    %c0_1 = arith.constant 0 : index
    %c0_2 = arith.constant 0 : index
    %1 = vector.load %arg1[%c0_1, %c0_2] : memref<64x32xbf16, #tpu.memory_space<vmem>>, vector<64x32xbf16>
    %cst = arith.constant dense<0.000000e+00> : vector<32x32xf32>
    %2 = tpu.matmul %0, %1, %cst {dimension_numbers = #tpu.dot_dimension_numbers<[1], [0], [0], [1], [0, 0, 1, 1], [], []>} : vector<32x64xbf16>, vector<64x32xbf16>, vector<32x32xf32> -> vector<32x32xf32>
    %c0_3 = arith.constant 0 : index
    %c0_4 = arith.constant 0 : index
    %3 = vector.load %arg2[%c0_3, %c0_4] : memref<1x32xf32, #tpu.memory_space<vmem>>, vector<1x32xf32>
    %4 = vector.broadcast %3 : vector<1x32xf32> to vector<32x32xf32>
    %5 = arith.addf %2, %4 : vector<32x32xf32>
    %cst_5 = arith.constant dense<0.000000e+00> : vector<32xf32>
    %6 = vector.multi_reduction <add>, %5, %cst_5 [0] : vector<32x32xf32> to vector<32xf32>
    %7 = vector.shape_cast %6 : vector<32xf32> to vector<1x32xf32>
    %cst_6 = arith.constant 3.200000e+01 : f32
    %8 = vector.broadcast %cst_6 : f32 to vector<1x32xf32>
    %9 = arith.divf %7, %8 : vector<1x32xf32>
    %10 = vector.broadcast %9 : vector<1x32xf32> to vector<32x32xf32>
    %11 = arith.subf %5, %10 : vector<32x32xf32>
    %12 = arith.mulf %11, %11 : vector<32x32xf32>
    %cst_7 = arith.constant dense<0.000000e+00> : vector<32xf32>
    %13 = vector.multi_reduction <add>, %12, %cst_7 [0] : vector<32x32xf32> to vector<32xf32>
    %14 = vector.shape_cast %13 : vector<32xf32> to vector<1x32xf32>
    %cst_8 = arith.constant 3.200000e+01 : f32
    %15 = vector.broadcast %cst_8 : f32 to vector<1x32xf32>
    %16 = arith.divf %14, %15 : vector<1x32xf32>
    %17 = vector.broadcast %9 : vector<1x32xf32> to vector<32x32xf32>
    %18 = arith.subf %5, %17 : vector<32x32xf32>
    %cst_9 = arith.constant 9.99999974E-6 : f32
    %19 = vector.broadcast %cst_9 : f32 to vector<1x32xf32>
    %20 = arith.addf %16, %19 : vector<1x32xf32>
    %21 = math.rsqrt %20 : vector<1x32xf32>
    %22 = vector.broadcast %21 : vector<1x32xf32> to vector<32x32xf32>
    %23 = arith.mulf %18, %22 : vector<32x32xf32>
    %c0_10 = arith.constant 0 : index
    %c0_11 = arith.constant 0 : index
    %24 = vector.load %arg3[%c0_10, %c0_11] : memref<1x32xf32, #tpu.memory_space<vmem>>, vector<1x32xf32>
    %25 = vector.broadcast %24 : vector<1x32xf32> to vector<32x32xf32>
    %26 = arith.mulf %23, %25 : vector<32x32xf32>
    %c0_12 = arith.constant 0 : index
    %c0_13 = arith.constant 0 : index
    %27 = vector.load %arg4[%c0_12, %c0_13] : memref<1x32xf32, #tpu.memory_space<vmem>>, vector<1x32xf32>
    %28 = vector.broadcast %27 : vector<1x32xf32> to vector<32x32xf32>
    %29 = arith.addf %26, %28 : vector<32x32xf32>
    %cst_14 = arith.constant 0.000000e+00 : f32
    %30 = vector.broadcast %cst_14 : f32 to vector<32x32xf32>
    %31 = arith.maximumf %29, %30 : vector<32x32xf32>
    %c0_15 = arith.constant 0 : index
    %c0_16 = arith.constant 0 : index
    %32 = vector.load %arg5[%c0_15, %c0_16] : memref<32x32xf32, #tpu.memory_space<vmem>>, vector<32x32xf32>
    tpu.vector_store %arg5[%c0_15, %c0_16], %31 {strides = array<i32>} : memref<32x32xf32, #tpu.memory_space<vmem>>, vector<32x32xf32>,
    return
  }
}

module attributes {stable_mosaic.version = 11 : i64} {
  func.func @kernel(%arg0: memref<2x16x32xf32, #tpu.memory_space<vmem>>, %arg1: memref<2x1x32xf32, #tpu.memory_space<vmem>>, %arg2: memref<1x32xf32, #tpu.memory_space<vmem>>, %arg3: memref<1x32xf32, #tpu.memory_space<vmem>>, %arg4: memref<32x32xbf16, #tpu.memory_space<vmem>>, %arg5: memref<1x32xf32, #tpu.memory_space<vmem>>, %arg6: memref<1x32xf32, #tpu.memory_space<vmem>>, %arg7: memref<1x32xf32, #tpu.memory_space<vmem>>, %arg8: memref<32x96xbf16, #tpu.memory_space<vmem>>, %arg9: memref<32x32xbf16, #tpu.memory_space<vmem>>, %arg10: memref<1x32xf32, #tpu.memory_space<vmem>>, %arg11: memref<1x32xf32, #tpu.memory_space<vmem>>, %arg12: memref<1x32xf32, #tpu.memory_space<vmem>>, %arg13: memref<32x32xbf16, #tpu.memory_space<vmem>>, %arg14: memref<32x64xbf16, #tpu.memory_space<vmem>>, %arg15: memref<32x32xbf16, #tpu.memory_space<vmem>>, %arg16: memref<1x32xf32, #tpu.memory_space<vmem>>, %arg17: memref<1x32xf32, #tpu.memory_space<vmem>>, %arg18: memref<1x32xf32, #tpu.memory_space<vmem>>, %arg19: memref<32x256xbf16, #tpu.memory_space<vmem>>, %arg20: memref<1x256xf32, #tpu.memory_space<vmem>>, %arg21: memref<128x32xbf16, #tpu.memory_space<vmem>>, %arg22: memref<1x32xf32, #tpu.memory_space<vmem>>, %arg23: memref<32x32xbf16, #tpu.memory_space<vmem>>, %arg24: memref<1x32xf32, #tpu.memory_space<vmem>>, %arg25: memref<2x16x32xf32, #tpu.memory_space<vmem>>) attributes {dimension_semantics = [], scalar_prefetch = 0 : i64, scratch_operands = 0 : i64, tpu.core_type = #tpu.core_type<tc>} {
    %c0 = arith.constant 0 : index
    %c0_0 = arith.constant 0 : index
    %c0_1 = arith.constant 0 : index
    %0 = vector.load %arg0[%c0, %c0_0, %c0_1] : memref<2x16x32xf32, #tpu.memory_space<vmem>>, vector<2x16x32xf32>
    %c0_2 = arith.constant 0 : index
    %c0_3 = arith.constant 0 : index
    %c0_4 = arith.constant 0 : index
    %1 = vector.load %arg1[%c0_2, %c0_3, %c0_4] : memref<2x1x32xf32, #tpu.memory_space<vmem>>, vector<2x1x32xf32>
    %cst = arith.constant dense<0.000000e+00> : vector<2x32xf32>
    %2 = vector.multi_reduction <add>, %0, %cst [1] : vector<2x16x32xf32> to vector<2x32xf32>
    %3 = vector.shape_cast %2 : vector<2x32xf32> to vector<2x1x32xf32>
    %cst_5 = arith.constant 1.600000e+01 : f32
    %4 = vector.broadcast %cst_5 : f32 to vector<2x1x32xf32>
    %5 = arith.divf %3, %4 : vector<2x1x32xf32>
    %6 = vector.broadcast %5 : vector<2x1x32xf32> to vector<2x16x32xf32>
    %7 = arith.subf %0, %6 : vector<2x16x32xf32>
    %8 = arith.mulf %7, %7 : vector<2x16x32xf32>
    %cst_6 = arith.constant dense<0.000000e+00> : vector<2x32xf32>
    %9 = vector.multi_reduction <add>, %8, %cst_6 [1] : vector<2x16x32xf32> to vector<2x32xf32>
    %10 = vector.shape_cast %9 : vector<2x32xf32> to vector<2x1x32xf32>
    %cst_7 = arith.constant 1.600000e+01 : f32
    %11 = vector.broadcast %cst_7 : f32 to vector<2x1x32xf32>
    %12 = arith.divf %10, %11 : vector<2x1x32xf32>
    %13 = vector.broadcast %5 : vector<2x1x32xf32> to vector<2x16x32xf32>
    %14 = arith.subf %0, %13 : vector<2x16x32xf32>
    %cst_8 = arith.constant 9.99999997E-7 : f32
    %15 = vector.broadcast %cst_8 : f32 to vector<2x1x32xf32>
    %16 = arith.addf %12, %15 : vector<2x1x32xf32>
    %17 = math.rsqrt %16 : vector<2x1x32xf32>
    %18 = vector.broadcast %17 : vector<2x1x32xf32> to vector<2x16x32xf32>
    %19 = arith.mulf %14, %18 : vector<2x16x32xf32>
    %c0_9 = arith.constant 0 : index
    %c0_10 = arith.constant 0 : index
    %20 = vector.load %arg2[%c0_9, %c0_10] : memref<1x32xf32, #tpu.memory_space<vmem>>, vector<1x32xf32>
    %21 = vector.shape_cast %20 : vector<1x32xf32> to vector<1x1x32xf32>
    %22 = vector.broadcast %21 : vector<1x1x32xf32> to vector<2x16x32xf32>
    %23 = arith.mulf %19, %22 : vector<2x16x32xf32>
    %c0_11 = arith.constant 0 : index
    %c0_12 = arith.constant 0 : index
    %24 = vector.load %arg3[%c0_11, %c0_12] : memref<1x32xf32, #tpu.memory_space<vmem>>, vector<1x32xf32>
    %25 = vector.shape_cast %24 : vector<1x32xf32> to vector<1x1x32xf32>
    %26 = vector.broadcast %25 : vector<1x1x32xf32> to vector<2x16x32xf32>
    %27 = arith.addf %23, %26 : vector<2x16x32xf32>
    %28 = vector.shape_cast %27 : vector<2x16x32xf32> to vector<32x32xf32>
    %29 = arith.truncf %28 : vector<32x32xf32> to vector<32x32xbf16>
    %c0_13 = arith.constant 0 : index
    %c0_14 = arith.constant 0 : index
    %30 = vector.load %arg4[%c0_13, %c0_14] : memref<32x32xbf16, #tpu.memory_space<vmem>>, vector<32x32xbf16>
    %cst_15 = arith.constant dense<0.000000e+00> : vector<32x32xf32>
    %31 = tpu.matmul %29, %30, %cst_15 {dimension_numbers = #tpu.dot_dimension_numbers<[1], [0], [0], [1], [0, 0, 1, 1], [], []>} : vector<32x32xbf16>, vector<32x32xbf16>, vector<32x32xf32> -> vector<32x32xf32>
    %32 = vector.shape_cast %31 : vector<32x32xf32> to vector<2x16x32xf32>
    %c0_16 = arith.constant 0 : index
    %c0_17 = arith.constant 0 : index
    %33 = vector.load %arg5[%c0_16, %c0_17] : memref<1x32xf32, #tpu.memory_space<vmem>>, vector<1x32xf32>
    %34 = vector.shape_cast %33 : vector<1x32xf32> to vector<1x1x32xf32>
    %35 = vector.broadcast %34 : vector<1x1x32xf32> to vector<2x16x32xf32>
    %36 = arith.addf %32, %35 : vector<2x16x32xf32>
    %cst_18 = arith.constant dense<0.000000e+00> : vector<2x16xf32>
    %37 = vector.multi_reduction <add>, %36, %cst_18 [2] : vector<2x16x32xf32> to vector<2x16xf32>
    %38 = vector.shape_cast %37 : vector<2x16xf32> to vector<2x16x1xf32>
    %cst_19 = arith.constant 3.200000e+01 : f32
    %39 = vector.broadcast %cst_19 : f32 to vector<2x16x1xf32>
    %40 = arith.divf %38, %39 : vector<2x16x1xf32>
    %41 = vector.broadcast %40 : vector<2x16x1xf32> to vector<2x16x32xf32>
    %42 = arith.subf %36, %41 : vector<2x16x32xf32>
    %43 = arith.mulf %42, %42 : vector<2x16x32xf32>
    %cst_20 = arith.constant dense<0.000000e+00> : vector<2x16xf32>
    %44 = vector.multi_reduction <add>, %43, %cst_20 [2] : vector<2x16x32xf32> to vector<2x16xf32>
    %45 = vector.shape_cast %44 : vector<2x16xf32> to vector<2x16x1xf32>
    %cst_21 = arith.constant 3.200000e+01 : f32
    %46 = vector.broadcast %cst_21 : f32 to vector<2x16x1xf32>
    %47 = arith.divf %45, %46 : vector<2x16x1xf32>
    %48 = vector.broadcast %40 : vector<2x16x1xf32> to vector<2x16x32xf32>
    %49 = arith.subf %36, %48 : vector<2x16x32xf32>
    %cst_22 = arith.constant 9.99999974E-6 : f32
    %50 = vector.broadcast %cst_22 : f32 to vector<2x16x1xf32>
    %51 = arith.addf %47, %50 : vector<2x16x1xf32>
    %52 = math.rsqrt %51 : vector<2x16x1xf32>
    %53 = vector.broadcast %52 : vector<2x16x1xf32> to vector<2x16x32xf32>
    %54 = arith.mulf %49, %53 : vector<2x16x32xf32>
    %c0_23 = arith.constant 0 : index
    %c0_24 = arith.constant 0 : index
    %55 = vector.load %arg6[%c0_23, %c0_24] : memref<1x32xf32, #tpu.memory_space<vmem>>, vector<1x32xf32>
    %56 = vector.shape_cast %55 : vector<1x32xf32> to vector<1x1x32xf32>
    %57 = vector.broadcast %56 : vector<1x1x32xf32> to vector<2x16x32xf32>
    %58 = arith.mulf %54, %57 : vector<2x16x32xf32>
    %c0_25 = arith.constant 0 : index
    %c0_26 = arith.constant 0 : index
    %59 = vector.load %arg7[%c0_25, %c0_26] : memref<1x32xf32, #tpu.memory_space<vmem>>, vector<1x32xf32>
    %60 = vector.shape_cast %59 : vector<1x32xf32> to vector<1x1x32xf32>
    %61 = vector.broadcast %60 : vector<1x1x32xf32> to vector<2x16x32xf32>
    %62 = arith.addf %58, %61 : vector<2x16x32xf32>
    %63 = vector.shape_cast %62 : vector<2x16x32xf32> to vector<32x32xf32>
    %64 = arith.truncf %63 : vector<32x32xf32> to vector<32x32xbf16>
    %c0_27 = arith.constant 0 : index
    %c0_28 = arith.constant 0 : index
    %65 = vector.load %arg8[%c0_27, %c0_28] : memref<32x96xbf16, #tpu.memory_space<vmem>>, vector<32x96xbf16>
    %cst_29 = arith.constant dense<0.000000e+00> : vector<32x96xf32>
    %66 = tpu.matmul %64, %65, %cst_29 {dimension_numbers = #tpu.dot_dimension_numbers<[1], [0], [0], [1], [0, 0, 1, 1], [], []>} : vector<32x32xbf16>, vector<32x96xbf16>, vector<32x96xf32> -> vector<32x96xf32>
    %67 = vector.shape_cast %66 : vector<32x96xf32> to vector<2x16x96xf32>
    %68 = vector.extract_strided_slice %67 {offsets = [0, 0, 0], sizes = [2, 16, 32], strides = [1, 1, 1]} : vector<2x16x96xf32> to vector<2x16x32xf32>
    %69 = vector.extract_strided_slice %67 {offsets = [0, 0, 32], sizes = [2, 16, 32], strides = [1, 1, 1]} : vector<2x16x96xf32> to vector<2x16x32xf32>
    %70 = vector.extract_strided_slice %67 {offsets = [0, 0, 64], sizes = [2, 16, 32], strides = [1, 1, 1]} : vector<2x16x96xf32> to vector<2x16x32xf32>
    %71 = arith.truncf %68 : vector<2x16x32xf32> to vector<2x16x32xbf16>
    %72 = arith.truncf %69 : vector<2x16x32xf32> to vector<2x16x32xbf16>
    "tpu.trace_start"() <{level = 10 : i32, message = "nqd,nkd->nqk"}> : () -> ()
    %cst_30 = arith.constant dense<0.000000e+00> : vector<2x16x16xf32>
    %73 = tpu.matmul %71, %72, %cst_30 {dimension_numbers = #tpu.dot_dimension_numbers<[2], [2], [1], [1], [0, 0, 0, 1, 1, 1], [0], [0]>} : vector<2x16x32xbf16>, vector<2x16x32xbf16>, vector<2x16x16xf32> -> vector<2x16x16xf32>
    "tpu.trace_stop"() : () -> ()
    %cst_31 = arith.constant 0.176776692 : f32
    %74 = vector.broadcast %cst_31 : f32 to vector<2x16x16xf32>
    %75 = arith.mulf %73, %74 : vector<2x16x16xf32>
    %cst_32 = arith.constant dense<0xFF800000> : vector<2x16xf32>
    %76 = vector.multi_reduction <maximumf>, %75, %cst_32 [2] : vector<2x16x16xf32> to vector<2x16xf32>
    %77 = vector.shape_cast %76 : vector<2x16xf32> to vector<2x16x1xf32>
    %78 = vector.broadcast %77 : vector<2x16x1xf32> to vector<2x16x16xf32>
    %79 = arith.subf %75, %78 : vector<2x16x16xf32>
    %80 = math.exp %79 : vector<2x16x16xf32>
    %cst_33 = arith.constant dense<0.000000e+00> : vector<2x16xf32>
    %81 = vector.multi_reduction <add>, %80, %cst_33 [2] : vector<2x16x16xf32> to vector<2x16xf32>
    %82 = vector.shape_cast %81 : vector<2x16xf32> to vector<2x16x1xf32>
    %83 = tpu.reciprocal %82 {approx = true} : vector<2x16x1xf32> -> vector<2x16x1xf32>
    %84 = vector.broadcast %83 : vector<2x16x1xf32> to vector<2x16x16xf32>
    %85 = arith.mulf %80, %84 : vector<2x16x16xf32>
    %86 = arith.truncf %85 : vector<2x16x16xf32> to vector<2x16x16xbf16>
    %87 = arith.truncf %70 : vector<2x16x32xf32> to vector<2x16x32xbf16>
    "tpu.trace_start"() <{level = 10 : i32, message = "nqk,nkd->nqd"}> : () -> ()
    %cst_34 = arith.constant dense<0.000000e+00> : vector<2x16x32xf32>
    %88 = tpu.matmul %86, %87, %cst_34 {dimension_numbers = #tpu.dot_dimension_numbers<[2], [1], [1], [2], [0, 0, 0, 1, 1, 2], [0], [0]>} : vector<2x16x16xbf16>, vector<2x16x32xbf16>, vector<2x16x32xf32> -> vector<2x16x32xf32>
    "tpu.trace_stop"() : () -> ()
    %89 = vector.shape_cast %88 : vector<2x16x32xf32> to vector<32x32xf32>
    %90 = arith.truncf %89 : vector<32x32xf32> to vector<32x32xbf16>
    %c0_35 = arith.constant 0 : index
    %c0_36 = arith.constant 0 : index
    %91 = vector.load %arg9[%c0_35, %c0_36] : memref<32x32xbf16, #tpu.memory_space<vmem>>, vector<32x32xbf16>
    %cst_37 = arith.constant dense<0.000000e+00> : vector<32x32xf32>
    %92 = tpu.matmul %90, %91, %cst_37 {dimension_numbers = #tpu.dot_dimension_numbers<[1], [0], [0], [1], [0, 0, 1, 1], [], []>} : vector<32x32xbf16>, vector<32x32xbf16>, vector<32x32xf32> -> vector<32x32xf32>
    %93 = vector.shape_cast %92 : vector<32x32xf32> to vector<2x16x32xf32>
    %c0_38 = arith.constant 0 : index
    %c0_39 = arith.constant 0 : index
    %94 = vector.load %arg10[%c0_38, %c0_39] : memref<1x32xf32, #tpu.memory_space<vmem>>, vector<1x32xf32>
    %95 = vector.shape_cast %94 : vector<1x32xf32> to vector<1x1x32xf32>
    %96 = vector.broadcast %95 : vector<1x1x32xf32> to vector<2x16x32xf32>
    %97 = arith.addf %93, %96 : vector<2x16x32xf32>
    %98 = arith.addf %36, %97 : vector<2x16x32xf32>
    %cst_40 = arith.constant dense<0.000000e+00> : vector<2x16xf32>
    %99 = vector.multi_reduction <add>, %98, %cst_40 [2] : vector<2x16x32xf32> to vector<2x16xf32>
    %100 = vector.shape_cast %99 : vector<2x16xf32> to vector<2x16x1xf32>
    %cst_41 = arith.constant 3.200000e+01 : f32
    %101 = vector.broadcast %cst_41 : f32 to vector<2x16x1xf32>
    %102 = arith.divf %100, %101 : vector<2x16x1xf32>
    %103 = vector.broadcast %102 : vector<2x16x1xf32> to vector<2x16x32xf32>
    %104 = arith.subf %98, %103 : vector<2x16x32xf32>
    %105 = arith.mulf %104, %104 : vector<2x16x32xf32>
    %cst_42 = arith.constant dense<0.000000e+00> : vector<2x16xf32>
    %106 = vector.multi_reduction <add>, %105, %cst_42 [2] : vector<2x16x32xf32> to vector<2x16xf32>
    %107 = vector.shape_cast %106 : vector<2x16xf32> to vector<2x16x1xf32>
    %cst_43 = arith.constant 3.200000e+01 : f32
    %108 = vector.broadcast %cst_43 : f32 to vector<2x16x1xf32>
    %109 = arith.divf %107, %108 : vector<2x16x1xf32>
    %110 = vector.broadcast %102 : vector<2x16x1xf32> to vector<2x16x32xf32>
    %111 = arith.subf %98, %110 : vector<2x16x32xf32>
    %cst_44 = arith.constant 9.99999974E-6 : f32
    %112 = vector.broadcast %cst_44 : f32 to vector<2x16x1xf32>
    %113 = arith.addf %109, %112 : vector<2x16x1xf32>
    %114 = math.rsqrt %113 : vector<2x16x1xf32>
    %115 = vector.broadcast %114 : vector<2x16x1xf32> to vector<2x16x32xf32>
    %116 = arith.mulf %111, %115 : vector<2x16x32xf32>
    %c0_45 = arith.constant 0 : index
    %c0_46 = arith.constant 0 : index
    %117 = vector.load %arg11[%c0_45, %c0_46] : memref<1x32xf32, #tpu.memory_space<vmem>>, vector<1x32xf32>
    %118 = vector.shape_cast %117 : vector<1x32xf32> to vector<1x1x32xf32>
    %119 = vector.broadcast %118 : vector<1x1x32xf32> to vector<2x16x32xf32>
    %120 = arith.mulf %116, %119 : vector<2x16x32xf32>
    %c0_47 = arith.constant 0 : index
    %c0_48 = arith.constant 0 : index
    %121 = vector.load %arg12[%c0_47, %c0_48] : memref<1x32xf32, #tpu.memory_space<vmem>>, vector<1x32xf32>
    %122 = vector.shape_cast %121 : vector<1x32xf32> to vector<1x1x32xf32>
    %123 = vector.broadcast %122 : vector<1x1x32xf32> to vector<2x16x32xf32>
    %124 = arith.addf %120, %123 : vector<2x16x32xf32>
    %125 = vector.shape_cast %124 : vector<2x16x32xf32> to vector<32x32xf32>
    %126 = arith.truncf %125 : vector<32x32xf32> to vector<32x32xbf16>
    %c0_49 = arith.constant 0 : index
    %c0_50 = arith.constant 0 : index
    %127 = vector.load %arg13[%c0_49, %c0_50] : memref<32x32xbf16, #tpu.memory_space<vmem>>, vector<32x32xbf16>
    %cst_51 = arith.constant dense<0.000000e+00> : vector<32x32xf32>
    %128 = tpu.matmul %126, %127, %cst_51 {dimension_numbers = #tpu.dot_dimension_numbers<[1], [0], [0], [1], [0, 0, 1, 1], [], []>} : vector<32x32xbf16>, vector<32x32xbf16>, vector<32x32xf32> -> vector<32x32xf32>
    %129 = vector.shape_cast %128 : vector<32x32xf32> to vector<2x16x32xf32>
    %130 = vector.shape_cast %1 : vector<2x1x32xf32> to vector<2x32xf32>
    %131 = arith.truncf %130 : vector<2x32xf32> to vector<2x32xbf16>
    %c0_52 = arith.constant 0 : index
    %c0_53 = arith.constant 0 : index
    %132 = vector.load %arg14[%c0_52, %c0_53] : memref<32x64xbf16, #tpu.memory_space<vmem>>, vector<32x64xbf16>
    %cst_54 = arith.constant dense<0.000000e+00> : vector<2x64xf32>
    %133 = tpu.matmul %131, %132, %cst_54 {dimension_numbers = #tpu.dot_dimension_numbers<[1], [0], [0], [1], [0, 0, 1, 1], [], []>} : vector<2x32xbf16>, vector<32x64xbf16>, vector<2x64xf32> -> vector<2x64xf32>
    %134 = vector.shape_cast %133 : vector<2x64xf32> to vector<2x1x64xf32>
    %135 = vector.extract_strided_slice %134 {offsets = [0, 0, 0], sizes = [2, 1, 32], strides = [1, 1, 1]} : vector<2x1x64xf32> to vector<2x1x32xf32>
    %136 = vector.extract_strided_slice %134 {offsets = [0, 0, 32], sizes = [2, 1, 32], strides = [1, 1, 1]} : vector<2x1x64xf32> to vector<2x1x32xf32>
    %137 = arith.truncf %129 : vector<2x16x32xf32> to vector<2x16x32xbf16>
    %138 = arith.truncf %135 : vector<2x1x32xf32> to vector<2x1x32xbf16>
    "tpu.trace_start"() <{level = 10 : i32, message = "nqd,nkd->nqk"}> : () -> ()
    %cst_55 = arith.constant dense<0.000000e+00> : vector<2x16x1xf32>
    %139 = tpu.matmul %137, %138, %cst_55 {dimension_numbers = #tpu.dot_dimension_numbers<[2], [2], [1], [1], [0, 0, 0, 1, 1, 1], [0], [0]>} : vector<2x16x32xbf16>, vector<2x1x32xbf16>, vector<2x16x1xf32> -> vector<2x16x1xf32>
    "tpu.trace_stop"() : () -> ()
    %cst_56 = arith.constant 0.176776692 : f32
    %140 = vector.broadcast %cst_56 : f32 to vector<2x16x1xf32>
    %141 = arith.mulf %139, %140 : vector<2x16x1xf32>
    %cst_57 = arith.constant dense<0xFF800000> : vector<2x16xf32>
    %142 = vector.multi_reduction <maximumf>, %141, %cst_57 [2] : vector<2x16x1xf32> to vector<2x16xf32>
    %143 = vector.shape_cast %142 : vector<2x16xf32> to vector<2x16x1xf32>
    %144 = arith.subf %141, %143 : vector<2x16x1xf32>
    %145 = math.exp %144 : vector<2x16x1xf32>
    %cst_58 = arith.constant dense<0.000000e+00> : vector<2x16xf32>
    %146 = vector.multi_reduction <add>, %145, %cst_58 [2] : vector<2x16x1xf32> to vector<2x16xf32>
    %147 = vector.shape_cast %146 : vector<2x16xf32> to vector<2x16x1xf32>
    %148 = tpu.reciprocal %147 {approx = true} : vector<2x16x1xf32> -> vector<2x16x1xf32>
    %149 = arith.mulf %145, %148 : vector<2x16x1xf32>
    %150 = arith.truncf %149 : vector<2x16x1xf32> to vector<2x16x1xbf16>
    %151 = arith.truncf %136 : vector<2x1x32xf32> to vector<2x1x32xbf16>
    "tpu.trace_start"() <{level = 10 : i32, message = "nqk,nkd->nqd"}> : () -> ()
    %cst_59 = arith.constant dense<0.000000e+00> : vector<2x16x32xf32>
    %152 = tpu.matmul %150, %151, %cst_59 {dimension_numbers = #tpu.dot_dimension_numbers<[2], [1], [1], [2], [0, 0, 0, 1, 1, 2], [0], [0]>} : vector<2x16x1xbf16>, vector<2x1x32xbf16>, vector<2x16x32xf32> -> vector<2x16x32xf32>
    "tpu.trace_stop"() : () -> ()
    %153 = vector.shape_cast %152 : vector<2x16x32xf32> to vector<32x32xf32>
    %154 = arith.truncf %153 : vector<32x32xf32> to vector<32x32xbf16>
    %c0_60 = arith.constant 0 : index
    %c0_61 = arith.constant 0 : index
    %155 = vector.load %arg15[%c0_60, %c0_61] : memref<32x32xbf16, #tpu.memory_space<vmem>>, vector<32x32xbf16>
    %cst_62 = arith.constant dense<0.000000e+00> : vector<32x32xf32>
    %156 = tpu.matmul %154, %155, %cst_62 {dimension_numbers = #tpu.dot_dimension_numbers<[1], [0], [0], [1], [0, 0, 1, 1], [], []>} : vector<32x32xbf16>, vector<32x32xbf16>, vector<32x32xf32> -> vector<32x32xf32>
    %157 = vector.shape_cast %156 : vector<32x32xf32> to vector<2x16x32xf32>
    %c0_63 = arith.constant 0 : index
    %c0_64 = arith.constant 0 : index
    %158 = vector.load %arg16[%c0_63, %c0_64] : memref<1x32xf32, #tpu.memory_space<vmem>>, vector<1x32xf32>
    %159 = vector.shape_cast %158 : vector<1x32xf32> to vector<1x1x32xf32>
    %160 = vector.broadcast %159 : vector<1x1x32xf32> to vector<2x16x32xf32>
    %161 = arith.addf %157, %160 : vector<2x16x32xf32>
    %162 = arith.addf %98, %161 : vector<2x16x32xf32>
    %cst_65 = arith.constant dense<0.000000e+00> : vector<2x16xf32>
    %163 = vector.multi_reduction <add>, %162, %cst_65 [2] : vector<2x16x32xf32> to vector<2x16xf32>
    %164 = vector.shape_cast %163 : vector<2x16xf32> to vector<2x16x1xf32>
    %cst_66 = arith.constant 3.200000e+01 : f32
    %165 = vector.broadcast %cst_66 : f32 to vector<2x16x1xf32>
    %166 = arith.divf %164, %165 : vector<2x16x1xf32>
    %167 = vector.broadcast %166 : vector<2x16x1xf32> to vector<2x16x32xf32>
    %168 = arith.subf %162, %167 : vector<2x16x32xf32>
    %169 = arith.mulf %168, %168 : vector<2x16x32xf32>
    %cst_67 = arith.constant dense<0.000000e+00> : vector<2x16xf32>
    %170 = vector.multi_reduction <add>, %169, %cst_67 [2] : vector<2x16x32xf32> to vector<2x16xf32>
    %171 = vector.shape_cast %170 : vector<2x16xf32> to vector<2x16x1xf32>
    %cst_68 = arith.constant 3.200000e+01 : f32
    %172 = vector.broadcast %cst_68 : f32 to vector<2x16x1xf32>
    %173 = arith.divf %171, %172 : vector<2x16x1xf32>
    %174 = vector.broadcast %166 : vector<2x16x1xf32> to vector<2x16x32xf32>
    %175 = arith.subf %162, %174 : vector<2x16x32xf32>
    %cst_69 = arith.constant 9.99999974E-6 : f32
    %176 = vector.broadcast %cst_69 : f32 to vector<2x16x1xf32>
    %177 = arith.addf %173, %176 : vector<2x16x1xf32>
    %178 = math.rsqrt %177 : vector<2x16x1xf32>
    %179 = vector.broadcast %178 : vector<2x16x1xf32> to vector<2x16x32xf32>
    %180 = arith.mulf %175, %179 : vector<2x16x32xf32>
    %c0_70 = arith.constant 0 : index
    %c0_71 = arith.constant 0 : index
    %181 = vector.load %arg17[%c0_70, %c0_71] : memref<1x32xf32, #tpu.memory_space<vmem>>, vector<1x32xf32>
    %182 = vector.shape_cast %181 : vector<1x32xf32> to vector<1x1x32xf32>
    %183 = vector.broadcast %182 : vector<1x1x32xf32> to vector<2x16x32xf32>
    %184 = arith.mulf %180, %183 : vector<2x16x32xf32>
    %c0_72 = arith.constant 0 : index
    %c0_73 = arith.constant 0 : index
    %185 = vector.load %arg18[%c0_72, %c0_73] : memref<1x32xf32, #tpu.memory_space<vmem>>, vector<1x32xf32>
    %186 = vector.shape_cast %185 : vector<1x32xf32> to vector<1x1x32xf32>
    %187 = vector.broadcast %186 : vector<1x1x32xf32> to vector<2x16x32xf32>
    %188 = arith.addf %184, %187 : vector<2x16x32xf32>
    %189 = vector.shape_cast %188 : vector<2x16x32xf32> to vector<32x32xf32>
    %190 = arith.truncf %189 : vector<32x32xf32> to vector<32x32xbf16>
    %c0_74 = arith.constant 0 : index
    %c0_75 = arith.constant 0 : index
    %191 = vector.load %arg19[%c0_74, %c0_75] : memref<32x256xbf16, #tpu.memory_space<vmem>>, vector<32x256xbf16>
    %cst_76 = arith.constant dense<0.000000e+00> : vector<32x256xf32>
    %192 = tpu.matmul %190, %191, %cst_76 {dimension_numbers = #tpu.dot_dimension_numbers<[1], [0], [0], [1], [0, 0, 1, 1], [], []>} : vector<32x32xbf16>, vector<32x256xbf16>, vector<32x256xf32> -> vector<32x256xf32>
    %193 = vector.shape_cast %192 : vector<32x256xf32> to vector<2x16x256xf32>
    %c0_77 = arith.constant 0 : index
    %c0_78 = arith.constant 0 : index
    %194 = vector.load %arg20[%c0_77, %c0_78] : memref<1x256xf32, #tpu.memory_space<vmem>>, vector<1x256xf32>
    %195 = vector.shape_cast %194 : vector<1x256xf32> to vector<1x1x256xf32>
    %196 = vector.broadcast %195 : vector<1x1x256xf32> to vector<2x16x256xf32>
    %197 = arith.addf %193, %196 : vector<2x16x256xf32>
    %198 = vector.extract_strided_slice %197 {offsets = [0, 0, 0], sizes = [2, 16, 128], strides = [1, 1, 1]} : vector<2x16x256xf32> to vector<2x16x128xf32>
    %199 = vector.extract_strided_slice %197 {offsets = [0, 0, 128], sizes = [2, 16, 128], strides = [1, 1, 1]} : vector<2x16x256xf32> to vector<2x16x128xf32>
    %cst_79 = arith.constant 5.000000e-01 : f32
    %200 = vector.broadcast %cst_79 : f32 to vector<2x16x128xf32>
    %201 = arith.mulf %200, %199 : vector<2x16x128xf32>
    %cst_80 = arith.constant 4.471500e-02 : f32
    %202 = vector.broadcast %cst_80 : f32 to vector<2x16x128xf32>
    %203 = arith.mulf %202, %199 : vector<2x16x128xf32>
    %204 = arith.mulf %203, %199 : vector<2x16x128xf32>
    %205 = arith.mulf %204, %199 : vector<2x16x128xf32>
    %206 = arith.addf %199, %205 : vector<2x16x128xf32>
    %cst_81 = arith.constant 0.797884583 : f32
    %207 = vector.broadcast %cst_81 : f32 to vector<2x16x128xf32>
    %208 = arith.mulf %207, %206 : vector<2x16x128xf32>
    %209 = math.tanh %208 : vector<2x16x128xf32>
    %cst_82 = arith.constant 1.000000e+00 : f32
    %210 = vector.broadcast %cst_82 : f32 to vector<2x16x128xf32>
    %211 = arith.addf %210, %209 : vector<2x16x128xf32>
    %212 = arith.mulf %201, %211 : vector<2x16x128xf32>
    %213 = arith.mulf %198, %212 : vector<2x16x128xf32>
    %214 = vector.shape_cast %213 : vector<2x16x128xf32> to vector<32x128xf32>
    %215 = arith.truncf %214 : vector<32x128xf32> to vector<32x128xbf16>
    %c0_83 = arith.constant 0 : index
    %c0_84 = arith.constant 0 : index
    %216 = vector.load %arg21[%c0_83, %c0_84] : memref<128x32xbf16, #tpu.memory_space<vmem>>, vector<128x32xbf16>
    %cst_85 = arith.constant dense<0.000000e+00> : vector<32x32xf32>
    %217 = tpu.matmul %215, %216, %cst_85 {dimension_numbers = #tpu.dot_dimension_numbers<[1], [0], [0], [1], [0, 0, 1, 1], [], []>} : vector<32x128xbf16>, vector<128x32xbf16>, vector<32x32xf32> -> vector<32x32xf32>
    %218 = vector.shape_cast %217 : vector<32x32xf32> to vector<2x16x32xf32>
    %219 = arith.addf %162, %218 : vector<2x16x32xf32>
    %c0_86 = arith.constant 0 : index
    %c0_87 = arith.constant 0 : index
    %220 = vector.load %arg22[%c0_86, %c0_87] : memref<1x32xf32, #tpu.memory_space<vmem>>, vector<1x32xf32>
    %221 = vector.shape_cast %220 : vector<1x32xf32> to vector<1x1x32xf32>
    %222 = vector.broadcast %221 : vector<1x1x32xf32> to vector<2x16x32xf32>
    %223 = arith.addf %219, %222 : vector<2x16x32xf32>
    %224 = vector.shape_cast %223 : vector<2x16x32xf32> to vector<32x32xf32>
    %225 = arith.truncf %224 : vector<32x32xf32> to vector<32x32xbf16>
    %c0_88 = arith.constant 0 : index
    %c0_89 = arith.constant 0 : index
    %226 = vector.load %arg23[%c0_88, %c0_89] : memref<32x32xbf16, #tpu.memory_space<vmem>>, vector<32x32xbf16>
    %cst_90 = arith.constant dense<0.000000e+00> : vector<32x32xf32>
    %227 = tpu.matmul %225, %226, %cst_90 {dimension_numbers = #tpu.dot_dimension_numbers<[1], [0], [0], [1], [0, 0, 1, 1], [], []>} : vector<32x32xbf16>, vector<32x32xbf16>, vector<32x32xf32> -> vector<32x32xf32>
    %228 = vector.shape_cast %227 : vector<32x32xf32> to vector<2x16x32xf32>
    %c0_91 = arith.constant 0 : index
    %c0_92 = arith.constant 0 : index
    %229 = vector.load %arg24[%c0_91, %c0_92] : memref<1x32xf32, #tpu.memory_space<vmem>>, vector<1x32xf32>
    %230 = vector.shape_cast %229 : vector<1x32xf32> to vector<1x1x32xf32>
    %231 = vector.broadcast %230 : vector<1x1x32xf32> to vector<2x16x32xf32>
    %232 = arith.addf %228, %231 : vector<2x16x32xf32>
    %233 = arith.addf %232, %0 : vector<2x16x32xf32>
    %c0_93 = arith.constant 0 : index
    %c0_94 = arith.constant 0 : index
    %c0_95 = arith.constant 0 : index
    %234 = vector.load %arg25[%c0_93, %c0_94, %c0_95] : memref<2x16x32xf32, #tpu.memory_space<vmem>>, vector<2x16x32xf32>
    tpu.vector_store %arg25[%c0_93, %c0_94, %c0_95], %233 {strides = array<i32>} : memref<2x16x32xf32, #tpu.memory_space<vmem>>, vector<2x16x32xf32>,
    return
  }
}

module attributes {stable_mosaic.version = 11 : i64} {
  func.func @kernel(%arg0: memref<128x512xbf16, #tpu.memory_space<vmem>>, %arg1: memref<512x32xbf16, #tpu.memory_space<vmem>>, %arg2: memref<1x32xf32, #tpu.memory_space<vmem>>, %arg3: memref<1x32xf32, #tpu.memory_space<vmem>>, %arg4: memref<1x32xf32, #tpu.memory_space<vmem>>, %arg5: memref<128x32xf32, #tpu.memory_space<vmem>>) attributes {dimension_semantics = [], scalar_prefetch = 0 : i64, scratch_operands = 0 : i64, tpu.core_type = #tpu.core_type<tc>} {
    %c0 = arith.constant 0 : index
    %c0_0 = arith.constant 0 : index
    %0 = vector.load %arg0[%c0, %c0_0] : memref<128x512xbf16, #tpu.memory_space<vmem>>, vector<128x512xbf16>
    %c0_1 = arith.constant 0 : index
    %c0_2 = arith.constant 0 : index
    %1 = vector.load %arg1[%c0_1, %c0_2] : memref<512x32xbf16, #tpu.memory_space<vmem>>, vector<512x32xbf16>
    %cst = arith.constant dense<0.000000e+00> : vector<128x32xf32>
    %2 = tpu.matmul %0, %1, %cst {dimension_numbers = #tpu.dot_dimension_numbers<[1], [0], [0], [1], [0, 0, 1, 1], [], []>} : vector<128x512xbf16>, vector<512x32xbf16>, vector<128x32xf32> -> vector<128x32xf32>
    %c0_3 = arith.constant 0 : index
    %c0_4 = arith.constant 0 : index
    %3 = vector.load %arg2[%c0_3, %c0_4] : memref<1x32xf32, #tpu.memory_space<vmem>>, vector<1x32xf32>
    %4 = vector.broadcast %3 : vector<1x32xf32> to vector<128x32xf32>
    %5 = arith.addf %2, %4 : vector<128x32xf32>
    %cst_5 = arith.constant dense<0.000000e+00> : vector<32xf32>
    %6 = vector.multi_reduction <add>, %5, %cst_5 [0] : vector<128x32xf32> to vector<32xf32>
    %7 = vector.shape_cast %6 : vector<32xf32> to vector<1x32xf32>
    %cst_6 = arith.constant 1.280000e+02 : f32
    %8 = vector.broadcast %cst_6 : f32 to vector<1x32xf32>
    %9 = arith.divf %7, %8 : vector<1x32xf32>
    %10 = vector.broadcast %9 : vector<1x32xf32> to vector<128x32xf32>
    %11 = arith.subf %5, %10 : vector<128x32xf32>
    %12 = arith.mulf %11, %11 : vector<128x32xf32>
    %cst_7 = arith.constant dense<0.000000e+00> : vector<32xf32>
    %13 = vector.multi_reduction <add>, %12, %cst_7 [0] : vector<128x32xf32> to vector<32xf32>
    %14 = vector.shape_cast %13 : vector<32xf32> to vector<1x32xf32>
    %cst_8 = arith.constant 1.280000e+02 : f32
    %15 = vector.broadcast %cst_8 : f32 to vector<1x32xf32>
    %16 = arith.divf %14, %15 : vector<1x32xf32>
    %17 = vector.broadcast %9 : vector<1x32xf32> to vector<128x32xf32>
    %18 = arith.subf %5, %17 : vector<128x32xf32>
    %cst_9 = arith.constant 9.99999974E-6 : f32
    %19 = vector.broadcast %cst_9 : f32 to vector<1x32xf32>
    %20 = arith.addf %16, %19 : vector<1x32xf32>
    %21 = math.rsqrt %20 : vector<1x32xf32>
    %22 = vector.broadcast %21 : vector<1x32xf32> to vector<128x32xf32>
    %23 = arith.mulf %18, %22 : vector<128x32xf32>
    %c0_10 = arith.constant 0 : index
    %c0_11 = arith.constant 0 : index
    %24 = vector.load %arg3[%c0_10, %c0_11] : memref<1x32xf32, #tpu.memory_space<vmem>>, vector<1x32xf32>
    %25 = vector.broadcast %24 : vector<1x32xf32> to vector<128x32xf32>
    %26 = arith.mulf %23, %25 : vector<128x32xf32>
    %c0_12 = arith.constant 0 : index
    %c0_13 = arith.constant 0 : index
    %27 = vector.load %arg4[%c0_12, %c0_13] : memref<1x32xf32, #tpu.memory_space<vmem>>, vector<1x32xf32>
    %28 = vector.broadcast %27 : vector<1x32xf32> to vector<128x32xf32>
    %29 = arith.addf %26, %28 : vector<128x32xf32>
    %cst_14 = arith.constant 0.000000e+00 : f32
    %30 = vector.broadcast %cst_14 : f32 to vector<128x32xf32>
    %31 = arith.maximumf %29, %30 : vector<128x32xf32>
    %c0_15 = arith.constant 0 : index
    %c0_16 = arith.constant 0 : index
    %32 = vector.load %arg5[%c0_15, %c0_16] : memref<128x32xf32, #tpu.memory_space<vmem>>, vector<128x32xf32>
    tpu.vector_store %arg5[%c0_15, %c0_16], %31 {strides = array<i32>} : memref<128x32xf32, #tpu.memory_space<vmem>>, vector<128x32xf32>,
    return
  }
}

module attributes {stable_mosaic.version = 11 : i64} {
  func.func @kernel(%arg0: memref<512x512xbf16, #tpu.memory_space<vmem>>, %arg1: memref<512x3xbf16, #tpu.memory_space<vmem>>, %arg2: memref<1x3xf32, #tpu.memory_space<vmem>>, %arg3: memref<512x3xf32, #tpu.memory_space<vmem>>) attributes {dimension_semantics = [], scalar_prefetch = 0 : i64, scratch_operands = 0 : i64, tpu.core_type = #tpu.core_type<tc>} {
    %c0 = arith.constant 0 : index
    %c0_0 = arith.constant 0 : index
    %0 = vector.load %arg0[%c0, %c0_0] : memref<512x512xbf16, #tpu.memory_space<vmem>>, vector<512x512xbf16>
    %c0_1 = arith.constant 0 : index
    %c0_2 = arith.constant 0 : index
    %1 = vector.load %arg1[%c0_1, %c0_2] : memref<512x3xbf16, #tpu.memory_space<vmem>>, vector<512x3xbf16>
    %cst = arith.constant dense<0.000000e+00> : vector<512x3xf32>
    %2 = tpu.matmul %0, %1, %cst {dimension_numbers = #tpu.dot_dimension_numbers<[1], [0], [0], [1], [0, 0, 1, 1], [], []>} : vector<512x512xbf16>, vector<512x3xbf16>, vector<512x3xf32> -> vector<512x3xf32>
    %c0_3 = arith.constant 0 : index
    %c0_4 = arith.constant 0 : index
    %3 = vector.load %arg2[%c0_3, %c0_4] : memref<1x3xf32, #tpu.memory_space<vmem>>, vector<1x3xf32>
    %4 = vector.broadcast %3 : vector<1x3xf32> to vector<512x3xf32>
    %5 = arith.addf %2, %4 : vector<512x3xf32>
    %6 = math.tanh %5 : vector<512x3xf32>
    %c0_5 = arith.constant 0 : index
    %c0_6 = arith.constant 0 : index
    %7 = vector.load %arg3[%c0_5, %c0_6] : memref<512x3xf32, #tpu.memory_space<vmem>>, vector<512x3xf32>
    tpu.vector_store %arg3[%c0_5, %c0_6], %6 {strides = array<i32>} : memref<512x3xf32, #tpu.memory_space<vmem>>, vector<512x3xf32>,
    return
  }
}

module attributes {stable_mosaic.version = 11 : i64} {
  func.func @kernel(%arg0: memref<768x18xbf16, #tpu.memory_space<vmem>>, %arg1: memref<18x1xbf16, #tpu.memory_space<vmem>>, %arg2: memref<1x1xf32, #tpu.memory_space<vmem>>, %arg3: memref<768x1xf32, #tpu.memory_space<vmem>>) attributes {dimension_semantics = [], scalar_prefetch = 0 : i64, scratch_operands = 0 : i64, tpu.core_type = #tpu.core_type<tc>} {
    %c0 = arith.constant 0 : index
    %c0_0 = arith.constant 0 : index
    %0 = vector.load %arg0[%c0, %c0_0] : memref<768x18xbf16, #tpu.memory_space<vmem>>, vector<768x18xbf16>
    %c0_1 = arith.constant 0 : index
    %c0_2 = arith.constant 0 : index
    %1 = vector.load %arg1[%c0_1, %c0_2] : memref<18x1xbf16, #tpu.memory_space<vmem>>, vector<18x1xbf16>
    %cst = arith.constant dense<0.000000e+00> : vector<768x1xf32>
    %2 = tpu.matmul %0, %1, %cst {dimension_numbers = #tpu.dot_dimension_numbers<[1], [0], [0], [1], [0, 0, 1, 1], [], []>} : vector<768x18xbf16>, vector<18x1xbf16>, vector<768x1xf32> -> vector<768x1xf32>
    %c0_3 = arith.constant 0 : index
    %c0_4 = arith.constant 0 : index
    %3 = vector.load %arg2[%c0_3, %c0_4] : memref<1x1xf32, #tpu.memory_space<vmem>>, vector<1x1xf32>
    %4 = vector.broadcast %3 : vector<1x1xf32> to vector<768x1xf32>
    %5 = arith.addf %2, %4 : vector<768x1xf32>
    %c0_5 = arith.constant 0 : index
    %c0_6 = arith.constant 0 : index
    %6 = vector.load %arg3[%c0_5, %c0_6] : memref<768x1xf32, #tpu.memory_space<vmem>>, vector<768x1xf32>
    tpu.vector_store %arg3[%c0_5, %c0_6], %5 {strides = array<i32>} : memref<768x1xf32, #tpu.memory_space<vmem>>, vector<768x1xf32>,
    return
  }
}

</mosaic_0001>

<bundles_post_ra>
// kernel: generator_forward.5
= control target key start
LH: loop header
LB: loop body
LE: loop exit
PB: predicated region body
PF: predicated region fallthrough
CT: control target
= control target key end

     0   :  { %vm71_vm0 = vcmask 523264   ;;  %v228_v8 = vmov 32.0   ;;  %vm97_vm1 = vcmask 261120   ;;  %s310_s1 = inlined_call_operand.vmem [shape: bf16[64,32], index: 1, kind: input, shape index: {}]   ;;  %s311_s2 = inlined_call_operand.vmem [shape: f32[1,32], index: 2, kind: input, shape index: {}]   ;;  %s312_s0 = inlined_call_operand.vmem [shape: bf16[32,64], index: 0, kind: input, shape index: {}]   ;;  %s313_s3 = inlined_call_operand.vmem [shape: f32[1,32], index: 3, kind: input, shape index: {}]   ;;  %s314_s4 = inlined_call_operand.vmem [shape: f32[1,32], index: 4, kind: input, shape index: {}]   ;;  %s315_s5 = inlined_call_operand.vmem [shape: f32[32,32], index: 5, kind: output, shape index: {}]  }
   0x1   :  { %v215_v0 = vld [vmem:[%s310_s1 + $0x18] sm:$0xff]  ;;  %v214_v1 = vld [vmem:[%s310_s1 + $0x10] sm:$0xff]  ;;  %v213_v2 = vld [vmem:[%s310_s1 + $0x8] sm:$0xff]  ;;  %224 = vrcp.f32 %v228_v8 }
   0x2   :  { %82 = vmatpush.bf16.msra.mxu0 %v215_v0  ;;  %216 = vmatpush.bf16.msra.mxu1 %v215_v0  ;;  %v212_v3 = vld [vmem:[%s310_s1] sm:$0xff]  ;;  %v211_v5 = vld [vmem:[%s312_s0 + $0x8] sm:$0xff] }
   0x3   :  { %v210_v4 = vld [vmem:[%s312_s0] sm:$0xff] }
   0x4   :  { %v221_v9 = vld [vmem:[%s311_s2] ss:$0 sm:$0xff] }
   0x6   :  { %83 = vmatpush.bf16.msra.mxu0 %v214_v1  ;;  %217 = vmatpush.bf16.msra.mxu1 %v214_v1  ;;  %v222_v1 = vld [vmem:[%s313_s3] ss:$0 sm:$0xff] }
   0x7   :  { %v225_v11 = vpop.eup %224 }
   0x8   :  { %v112_v19 = vmul.f32 32.0, %v225_v11  ;;  %vm116_vm2 = vweird.f32 %v225_v11 }
   0xa   :  { %84 = vmatpush.bf16.msra.mxu0 %v213_v2  ;;  %218 = vmatpush.bf16.msra.mxu1 %v213_v2  ;;  %v113_v24 = vsub.f32 1.0, %v112_v19 }
   0xc   :  { %v114_v27 = vmul.f32 %v225_v11, %v113_v24 }
   0xe   :  { %85 = vmatpush.bf16.msra.mxu0 %v212_v3  ;;  %219 = vmatpush.bf16.msra.mxu1 %v212_v3  ;;  %v115_v30 = vadd.f32 %v225_v11, %v114_v27 }
  0x10   :  { %v117_v33 = vsel %vm116_vm2, %v225_v11, %v115_v30 }
  0x11   :  { %208 = vmatmul.msk.bf16.vlgmr.msra.gmra.mxu0 %vm71_vm0, %v210_v4  ;;  %209 = vmatmul.msk.bf16.vlgmr.msra.gmra.mxu1 %vm71_vm0, %v211_v5 }
  0x8e   :  { %v87_v6 = vpop.f32.mrf.mxu0  ;;  %v92_v7 = vpop.f32.mrf.mxu1 }
  0x8f   :  { %v88_v10 = vadd.f32 %v221_v9, %v87_v6  ;;  %v93_v14 = vadd.f32 %v221_v9, %v92_v7  ;;  %v223_v7 = vld [vmem:[%s314_s4] ss:$0 sm:$0xff] }
  0x91   :  { %v98_v16 = vsel %vm97_vm1, %v88_v10, 0.0  ;;  %v101_v21 = vsel %vm97_vm1, %v93_v14, 0.0 }
  0x96   :  { %v89_v12 = vpop.f32.mrf.mxu0  ;;  %v94_v13 = vpop.f32.mrf.mxu1 }
  0x97   :  { %v90_v15 = vadd.f32 %v221_v9, %v89_v12  ;;  %v95_v18 = vadd.f32 %v221_v9, %v94_v13 }
  0x99   :  { %v99_v17 = vsel %vm97_vm1, %v90_v15, 0.0  ;;  %v103_v23 = vsel %vm97_vm1, %v95_v18, 0.0 }
  0x9a   :  { %v100_v20 = vadd.f32 %v99_v17, %v98_v16 }
  0x9c   :  { %v102_v22 = vadd.f32 %v101_v21, %v100_v20 }
  0x9e   :  { %v104_v25 = vadd.f32 %v103_v23, %v102_v22 }
  0xa0   :  { %v105_v26 = vrot.slane %v104_v25, 4 }
  0xa2   :  { %v106_v28 = vadd.f32 %v105_v26, %v104_v25 }
  0xa4   :  { %v107_v29 = vrot.slane %v106_v28, 2 }
  0xa6   :  { %v108_v31 = vadd.f32 %v107_v29, %v106_v28 }
  0xa8   :  { %v109_v32 = vrot.slane %v108_v31, 1 }
  0xaa   :  { %v110_v34 = vadd.f32 %v109_v32, %v108_v31 }
  0xac   :  { %v118_v35 = vmul.f32 %v117_v33, %v110_v34 }
  0xae   :  { %v119_v36 = vsub.f32 %v88_v10, %v118_v35  ;;  %v120_v37 = vsub.f32 %v90_v15, %v118_v35  ;;  %v121_v38 = vsub.f32 %v93_v14, %v118_v35  ;;  %v122_v39 = vsub.f32 %v95_v18, %v118_v35 }
  0xb0   :  { %v123_v40 = vmul.f32 %v119_v36, %v119_v36  ;;  %v124_v41 = vmul.f32 %v120_v37, %v120_v37  ;;  %v125_v42 = vmul.f32 %v121_v38, %v121_v38  ;;  %v126_v43 = vmul.f32 %v122_v39, %v122_v39 }
  0xb2   :  { %v127_v44 = vsel %vm97_vm1, %v123_v40, 0.0  ;;  %v128_v45 = vsel %vm97_vm1, %v124_v41, 0.0  ;;  %v130_v47 = vsel %vm97_vm1, %v125_v42, 0.0  ;;  %v132_v49 = vsel %vm97_vm1, %v126_v43, 0.0 }
  0xb3   :  { %v129_v46 = vadd.f32 %v128_v45, %v127_v44 }
  0xb5   :  { %v131_v48 = vadd.f32 %v130_v47, %v129_v46 }
  0xb7   :  { %v133_v50 = vadd.f32 %v132_v49, %v131_v48 }
  0xb9   :  { %v134_v51 = vrot.slane %v133_v50, 4 }
  0xbb   :  { %v135_v52 = vadd.f32 %v134_v51, %v133_v50 }
  0xbd   :  { %v136_v53 = vrot.slane %v135_v52, 2 }
  0xbf   :  { %v137_v54 = vadd.f32 %v136_v53, %v135_v52 }
  0xc1   :  { %v138_v55 = vrot.slane %v137_v54, 1 }
  0xc3   :  { %v139_v56 = vadd.f32 %v138_v55, %v137_v54 }
  0xc5   :  { %v140_v57 = vmul.f32 %v139_v56, %v117_v33 }
  0xc7   :  { %v141_v58 = vadd.f32 1e-05, %v140_v57 }
  0xc9   :  { %226 = vrsqrt.f32 %v141_v58  ;;  %vm148_vm4 = vweird.f32 %v141_v58 }
  0xcf   :  { %v227_v59 = vpop.eup %226 }
  0xd0   :  { %v143_v60 = vmul.f32 %v227_v59, %v141_v58  ;;  %vm149_vm3 = vweird.f32 %v227_v59 }
  0xd1   :  { %vm150_vm5 = vmor %vm148_vm4, %vm149_vm3 }
  0xd2   :  { %v144_v61 = vmul.f32 %v227_v59, %v143_v60 }
  0xd4   :  { %v145_v62 = vmul.f32 0.5, %v144_v61 }
  0xd6   :  { %v146_v63 = vsub.f32 1.5, %v145_v62 }
  0xd8   :  { %v147_v0 = vmul.f32 %v227_v59, %v146_v63 }
  0xda   :  { %v151_v2 = vsel %vm150_vm5, %v227_v59, %v147_v0 }
  0xdb   :  { %v152_v3 = vmul.f32 %v151_v2, %v119_v36  ;;  %v153_v4 = vmul.f32 %v151_v2, %v120_v37  ;;  %v154_v5 = vmul.f32 %v151_v2, %v121_v38  ;;  %v155_v6 = vmul.f32 %v151_v2, %v122_v39 }
  0xdd   :  { %v160_v8 = vmul.f32 %v222_v1, %v152_v3  ;;  %v161_v9 = vmul.f32 %v222_v1, %v153_v4  ;;  %v162_v10 = vmul.f32 %v222_v1, %v154_v5  ;;  %v163_v11 = vmul.f32 %v222_v1, %v155_v6 }
  0xdf   :  { %v168_v12 = vadd.f32 %v223_v7, %v160_v8  ;;  %v169_v13 = vadd.f32 %v223_v7, %v161_v9  ;;  %v170_v14 = vadd.f32 %v223_v7, %v162_v10  ;;  %v171_v15 = vadd.f32 %v223_v7, %v163_v11 }
  0xe1   :  { %v172_v16 = vmax.f32 %v168_v12, 0.0  ;;  %v173_v17 = vmax.f32 %v169_v13, 0.0  ;;  %v174_v18 = vmax.f32 %v170_v14, 0.0  ;;  %v175_v19 = vmax.f32 %v171_v15, 0.0 }
  0xe3   :  { %176 = vst.msk [vmem:[%s315_s5] sm:$0xff] %vm97_vm1, %v172_v16 }
  0xe4   :  { %177 = vst.msk [vmem:[%s315_s5 + $0x8] sm:$0xff] %vm97_vm1, %v173_v17 }
  0xe5   :  { %178 = vst.msk [vmem:[%s315_s5 + $0x10] sm:$0xff] %vm97_vm1, %v174_v18 }
  0xe6   :  { %179 = vst.msk [vmem:[%s315_s5 + $0x18] sm:$0xff] %vm97_vm1, %v175_v19 }

// kernel: generator_forward.6
= control target key start
LH: loop header
LB: loop body
LE: loop exit
PB: predicated region body
PF: predicated region fallthrough
CT: control target
= control target key end

     0   :  { %vm87_vm0 = vcmask 261120   ;;  %v1646_v3 = vmov 16.0   ;;  %s1649_s26 = smov 64   ;;  %s2178_s4 = inlined_call_operand.vmem [shape: bf16[32,32], index: 4, kind: input, shape index: {}]   ;;  %s2179_s0 = inlined_call_operand.vmem [shape: f32[2,16,32], index: 0, kind: input, shape index: {}]   ;;  %s2180_s2 = inlined_call_operand.vmem [shape: f32[1,32], index: 2, kind: input, shape index: {}]   ;;  %s2181_s3 = inlined_call_operand.vmem [shape: f32[1,32], index: 3, kind: input, shape index: {}]   ;;  %s2182_s5 = inlined_call_operand.vmem [shape: f32[1,32], index: 5, kind: input, shape index: {}]   ;;  %s2183_s6 = inlined_call_operand.vmem [shape: f32[1,32], index: 6, kind: input, shape index: {}]   ;;  %s2184_s7 = inlined_call_operand.vmem [shape: f32[1,32], index: 7, kind: input, shape index: {}]   ;;  %s2185_s8 = inlined_call_operand.vmem [shape: bf16[32,96], index: 8, kind: input, shape index: {}]   ;;  %s2186_s10 = inlined_call_operand.vmem [shape: f32[1,32], index: 10, kind: input, shape index: {}]   ;;  %s2187_s9 = inlined_call_operand.vmem [shape: bf16[32,32], index: 9, kind: input, shape index: {}]   ;;  %s2188_s11 = inlined_call_operand.vmem [shape: f32[1,32], index: 11, kind: input, shape index: {}]   ;;  %s2189_s12 = inlined_call_operand.vmem [shape: f32[1,32], index: 12, kind: input, shape index: {}]   ;;  %s2190_s1 = inlined_call_operand.vmem [shape: f32[2,1,32], index: 1, kind: input, shape index: {}]   ;;  %s2191_s14 = inlined_call_operand.vmem [shape: bf16[32,64], index: 14, kind: input, shape index: {}]   ;;  %s2192_s13 = inlined_call_operand.vmem [shape: bf16[32,32], index: 13, kind: input, shape index: {}]   ;;  %s2193_s16 = inlined_call_operand.vmem [shape: f32[1,32], index: 16, kind: input, shape index: {}]   ;;  %s2194_s15 = inlined_call_operand.vmem [shape: bf16[32,32], index: 15, kind: input, shape index: {}]   ;;  %s2195_s17 = inlined_call_operand.vmem [shape: f32[1,32], index: 17, kind: input, shape index: {}]   ;;  %s2196_s18 = inlined_call_operand.vmem [shape: f32[1,32], index: 18, kind: input, shape index: {}]   ;;  %s2197_s19 = inlined_call_operand.vmem [shape: bf16[32,256], index: 19, kind: input, shape index: {}]   ;;  %s2198_s22 = inlined_call_operand.vmem [shape: f32[1,32], index: 22, kind: input, shape index: {}]   ;;  %s2199_s21 = inlined_call_operand.vmem [shape: bf16[128,32], index: 21, kind: input, shape index: {}]   ;;  %s2200_s20 = inlined_call_operand.vmem [shape: f32[1,256], index: 20, kind: input, shape index: {}]   ;;  %s2201_s24 = inlined_call_operand.vmem [shape: f32[1,32], index: 24, kind: input, shape index: {}]   ;;  %s2202_s23 = inlined_call_operand.vmem [shape: bf16[32,32], index: 23, kind: input, shape index: {}]   ;;  %s2203_s25 = inlined_call_operand.vmem [shape: f32[2,16,32], index: 25, kind: output, shape index: {}]  }
   0x1   :  { %2208 = sst [smem:[#allocation2_spill]] %s2178_s4  ;;  %1570 = vrcp.f32 %v1646_v3 }
   0x2   :  { %2209 = sst [smem:[#allocation3_spill]] %s2179_s0 }
   0x3   :  { %2210 = sst [smem:[#allocation4_spill]] %s2180_s2 }
   0x4   :  { %2211 = sst [smem:[#allocation5_spill]] %s2181_s3  ;;  %s1648_s3 = smov 96  }
   0x5   :  { %2212 = sst [smem:[#allocation6_spill]] %s2182_s5 }
   0x6   :  { %2213 = sst [smem:[#allocation7_spill]] %s2183_s6 }
   0x7   :  { %2214 = sst [smem:[#allocation8_spill]] %s2184_s7  ;;  %v1571_v14 = vpop.eup %1570 }
   0x8   :  { %2215 = sst [smem:[#allocation9_spill]] %s2185_s8  ;;  %v107_v17 = vmul.f32 16.0, %v1571_v14  ;;  %vm111_vm1 = vweird.f32 %v1571_v14 }
   0x9   :  { %2216 = sst [smem:[#allocation10_spill]] %s2186_s10 }
   0xa   :  { %2217 = sst [smem:[#allocation11_spill]] %s2187_s9  ;;  %v108_v20 = vsub.f32 1.0, %v107_v17 }
   0xb   :  { %s2218_s7 = sld [smem:[#allocation2_spill]] }
   0xc   :  { %s2219_s0 = sld [smem:[#allocation3_spill]]  ;;  %v109_v23 = vmul.f32 %v1571_v14, %v108_v20 }
   0xd   :  { %s2220_s4 = sld [smem:[#allocation4_spill]] }
   0xe   :  { %v110_v26 = vadd.f32 %v1571_v14, %v109_v23  ;;  %s2221_s8 = sld [smem:[#allocation5_spill]] }
   0xf   :  { %s2222_s10 = sld [smem:[#allocation6_spill]] }
  0x10   :  { %v112_v29 = vsel %vm111_vm1, %v1571_v14, %v110_v26  ;;  %s2223_s28 = sld [smem:[#allocation9_spill]] }
  0x11   :  { %v1523_v0 = vld [vmem:[%s2218_s7 + $0x8] sm:$0xff]  ;;  %v1522_v1 = vld [vmem:[%s2218_s7] sm:$0xff]  ;;  %s2226_s5 = sld [smem:[#allocation11_spill]] }
  0x12   :  { %v81_v2 = vld [vmem:[%s2219_s0] sm:$0xff]  ;;  %v82_v4 = vld [vmem:[%s2219_s0 + $0x8] sm:$0xff]  ;;  %215 = vmatpush.bf16.msra.mxu0 %v1523_v0  ;;  %1548 = vmatpush.bf16.msra.mxu2 %v1523_v0  ;;  %v83_v7 = vld [vmem:[%s2219_s0 + $0x10] sm:$0xff]  ;;  %s2227_s29 = sld [smem:[#allocation10_spill]] }
  0x13   :  { %v88_v5 = vsel %vm87_vm0, %v81_v2, 0.0  ;;  %v89_v6 = vsel %vm87_vm0, %v82_v4, 0.0  ;;  %v84_v8 = vld [vmem:[%s2219_s0 + $0x18] sm:$0xff]  ;;  %v97_v10 = vsel %vm87_vm0, %v83_v7, 0.0 }
  0x14   :  { %v90_v9 = vadd.f32 %v89_v6, %v88_v5  ;;  %v98_v11 = vsel %vm87_vm0, %v84_v8, 0.0 }
  0x15   :  { %v99_v12 = vadd.f32 %v98_v11, %v97_v10  ;;  %v1557_v10 = vld [vmem:[%s2220_s4] ss:$0 sm:$0xff]  ;;  %s2224_s4 = sld [smem:[#allocation7_spill]] }
  0x16   :  { %v91_v13 = vrot.slane %v90_v9, 4  ;;  %216 = vmatpush.bf16.msra.mxu0 %v1522_v1  ;;  %1549 = vmatpush.bf16.msra.mxu2 %v1522_v1 }
  0x17   :  { %v100_v15 = vrot.slane %v99_v12, 4 }
  0x18   :  { %v92_v16 = vadd.f32 %v91_v13, %v90_v9 }
  0x19   :  { %v101_v18 = vadd.f32 %v100_v15, %v99_v12  ;;  %v1558_v15 = vld [vmem:[%s2221_s8] ss:$0 sm:$0xff]  ;;  %s2225_s8 = sld [smem:[#allocation8_spill]] }
  0x1a   :  { %v93_v19 = vrot.slane %v92_v16, 2 }
  0x1b   :  { %v102_v21 = vrot.slane %v101_v18, 2 }
  0x1c   :  { %v94_v22 = vadd.f32 %v93_v19, %v92_v16 }
  0x1d   :  { %v103_v24 = vadd.f32 %v102_v21, %v101_v18 }
  0x1e   :  { %v95_v25 = vrot.slane %v94_v22, 1 }
  0x1f   :  { %v104_v27 = vrot.slane %v103_v24, 1 }
  0x20   :  { %v96_v28 = vadd.f32 %v95_v25, %v94_v22 }
  0x21   :  { %v105_v30 = vadd.f32 %v104_v27, %v103_v24 }
  0x22   :  { %v113_v31 = vmul.f32 %v112_v29, %v96_v28 }
  0x23   :  { %v114_v32 = vmul.f32 %v112_v29, %v105_v30 }
  0x24   :  { %v115_v33 = vsub.f32 %v81_v2, %v113_v31  ;;  %v116_v34 = vsub.f32 %v82_v4, %v113_v31 }
  0x25   :  { %v117_v35 = vsub.f32 %v83_v7, %v114_v32  ;;  %v118_v36 = vsub.f32 %v84_v8, %v114_v32 }
  0x26   :  { %v119_v37 = vmul.f32 %v115_v33, %v115_v33  ;;  %v120_v38 = vmul.f32 %v116_v34, %v116_v34 }
  0x27   :  { %v121_v39 = vmul.f32 %v117_v35, %v117_v35  ;;  %v122_v40 = vmul.f32 %v118_v36, %v118_v36 }
  0x28   :  { %v123_v41 = vsel %vm87_vm0, %v119_v37, 0.0  ;;  %v124_v42 = vsel %vm87_vm0, %v120_v38, 0.0 }
  0x29   :  { %v125_v43 = vadd.f32 %v124_v42, %v123_v41  ;;  %v132_v44 = vsel %vm87_vm0, %v121_v39, 0.0  ;;  %v133_v45 = vsel %vm87_vm0, %v122_v40, 0.0  ;;  %v1647_v42 = vmov 32.0  }
  0x2a   :  { %v134_v46 = vadd.f32 %v133_v45, %v132_v44 }
  0x2b   :  { %v126_v47 = vrot.slane %v125_v43, 4 }
  0x2c   :  { %v135_v48 = vrot.slane %v134_v46, 4 }
  0x2d   :  { %v127_v49 = vadd.f32 %v126_v47, %v125_v43 }
  0x2e   :  { %v136_v50 = vadd.f32 %v135_v48, %v134_v46 }
  0x2f   :  { %v128_v51 = vrot.slane %v127_v49, 2 }
  0x30   :  { %v137_v52 = vrot.slane %v136_v50, 2 }
  0x31   :  { %v129_v53 = vadd.f32 %v128_v51, %v127_v49 }
  0x32   :  { %v138_v54 = vadd.f32 %v137_v52, %v136_v50 }
  0x33   :  { %v130_v55 = vrot.slane %v129_v53, 1 }
  0x34   :  { %v139_v56 = vrot.slane %v138_v54, 1 }
  0x35   :  { %v131_v57 = vadd.f32 %v130_v55, %v129_v53 }
  0x36   :  { %v140_v58 = vadd.f32 %v139_v56, %v138_v54 }
  0x37   :  { %v141_v59 = vmul.f32 %v131_v57, %v112_v29 }
  0x38   :  { %v142_v60 = vmul.f32 %v140_v58, %v112_v29  ;;  %v1559_v29 = vld [vmem:[%s2222_s10] ss:$0 sm:$0xff] }
  0x39   :  { %v143_v61 = vadd.f32 1e-06, %v141_v59 }
  0x3a   :  { %v144_v62 = vadd.f32 1e-06, %v142_v60 }
  0x3b   :  { %1572 = vrsqrt.f32 %v143_v61  ;;  %vm151_vm2 = vweird.f32 %v143_v61 }
  0x3c   :  { %1574 = vrsqrt.f32 %v144_v62  ;;  %vm161_vm4 = vweird.f32 %v144_v62 }
  0x3d   :  { %1576 = vrcp.f32 %v1647_v42 }
  0x41   :  { %v1573_v63 = vpop.eup %1572 }
  0x42   :  { %v1575_v0 = vpop.eup %1574  ;;  %v146_v1 = vmul.f32 %v1573_v63, %v143_v61  ;;  %vm152_vm3 = vweird.f32 %v1573_v63 }
  0x43   :  { %v156_v2 = vmul.f32 %v1575_v0, %v144_v62  ;;  %vm162_vm5 = vweird.f32 %v1575_v0  ;;  %vm153_vm6 = vmor %vm151_vm2, %vm152_vm3  ;;  %v1577_v43 = vpop.eup %1576 }
  0x44   :  { %v147_v3 = vmul.f32 %v1573_v63, %v146_v1  ;;  %vm163_vm7 = vmor %vm161_vm4, %vm162_vm5  ;;  %v249_v44 = vmul.f32 32.0, %v1577_v43  ;;  %vm253_vm8 = vweird.f32 %v1577_v43 }
  0x45   :  { %v157_v4 = vmul.f32 %v1575_v0, %v156_v2 }
  0x46   :  { %v148_v5 = vmul.f32 0.5, %v147_v3  ;;  %v250_v45 = vsub.f32 1.0, %v249_v44  ;;  %v1560_v44 = vld [vmem:[%s2224_s4] ss:$0 sm:$0xff] }
  0x47   :  { %v158_v6 = vmul.f32 0.5, %v157_v4 }
  0x48   :  { %v149_v7 = vsub.f32 1.5, %v148_v5  ;;  %v251_v46 = vmul.f32 %v1577_v43, %v250_v45 }
  0x49   :  { %v159_v8 = vsub.f32 1.5, %v158_v6  ;;  %v1525_v6 = vld [vmem:[%s2223_s28 + $0x8] sm:$0xff] }
  0x4a   :  { %v150_v9 = vmul.f32 %v1573_v63, %v149_v7  ;;  %v252_v47 = vadd.f32 %v1577_v43, %v251_v46  ;;  %377 = vmatpush.bf16.msra.mxu1 %v1525_v6  ;;  %1550 = vmatpush.bf16.msra.mxu3 %v1525_v6 }
  0x4b   :  { %v160_v11 = vmul.f32 %v1575_v0, %v159_v8 }
  0x4c   :  { %v154_v12 = vsel %vm153_vm6, %v1573_v63, %v150_v9  ;;  %v1834_v48 = vsel %vm253_vm8, %v1577_v43, %v252_v47  ;;  %v1524_v9 = vld [vmem:[%s2223_s28] sm:$0xff]  ;;  %vm452_vm6 = vcmask 130048  }
  0x4d   :  { %v165_v13 = vmul.f32 %v154_v12, %v115_v33  ;;  %v166_v14 = vmul.f32 %v154_v12, %v116_v34  ;;  %v164_v16 = vsel %vm163_vm7, %v1575_v0, %v160_v11  ;;  %vm764_vm7 = vcmask 1041409  }
  0x4e   :  { %v167_v17 = vmul.f32 %v164_v16, %v117_v35  ;;  %v168_v18 = vmul.f32 %v164_v16, %v118_v36  ;;  %378 = vmatpush.bf16.msra.mxu1 %v1524_v9  ;;  %1551 = vmatpush.bf16.msra.mxu3 %v1524_v9 }
  0x4f   :  { %v173_v19 = vmul.f32 %v1557_v10, %v165_v13  ;;  %v174_v20 = vmul.f32 %v1557_v10, %v166_v14 }
  0x50   :  { %v175_v21 = vmul.f32 %v1557_v10, %v167_v17  ;;  %v176_v22 = vmul.f32 %v1557_v10, %v168_v18 }
  0x51   :  { %v181_v23 = vadd.f32 %v1558_v15, %v173_v19  ;;  %v182_v24 = vadd.f32 %v1558_v15, %v174_v20 }
  0x52   :  { %v183_v25 = vadd.f32 %v1558_v15, %v175_v21  ;;  %v184_v26 = vadd.f32 %v1558_v15, %v176_v22 }
  0x53   :  { %v185_v27 = vpack.c.bf16 %v182_v24, %v181_v23 }
  0x54   :  { %v186_v28 = vpack.c.bf16 %v184_v26, %v183_v25 }
  0x55   :  { %1401 = vmatmul.msk.bf16.vlgmr.msra.gmra.mxu0 %vm87_vm0, %v185_v27 }
  0x56   :  { %1402 = vmatmul.msk.bf16.vlgmr.msra.gmra.mxu2 %vm87_vm0, %v186_v28 }
  0xd2   :  { %v218_v30 = vpop.f32.mrf.mxu0 }
  0xd3   :  { %v1818_v31 = vadd.f32 %v1559_v29, %v218_v30 }
  0xd5   :  { %v236_v32 = vsel %vm87_vm0, %v1818_v31, 0.0 }
  0xd6   :  { %237 = vadd.xlane.f32.xlu0 %v236_v32 }
  0xd9   :  { %v223_v33 = vpop.f32.mrf.mxu2 }
  0xda   :  { %v1822_v34 = vadd.f32 %v1559_v29, %v223_v33  ;;  %v220_v35 = vpop.f32.mrf.mxu0 }
  0xdb   :  { %v1824_v36 = vadd.f32 %v1559_v29, %v220_v35 }
  0xdc   :  { %v242_v37 = vsel %vm87_vm0, %v1822_v34, 0.0 }
  0xdd   :  { %243 = vadd.xlane.f32.xlu1 %v242_v37  ;;  %v239_v38 = vsel %vm87_vm0, %v1824_v36, 0.0 }
  0xde   :  { %240 = vadd.xlane.f32.xlu0 %v239_v38 }
  0xe1   :  { %v225_v39 = vpop.f32.mrf.mxu2 }
  0xe2   :  { %v1830_v40 = vadd.f32 %v1559_v29, %v225_v39 }
  0xe4   :  { %v245_v41 = vsel %vm87_vm0, %v1830_v40, 0.0 }
  0xe5   :  { %246 = vadd.xlane.f32.xlu1 %v245_v41 }
 0x149   :  { %v238_v49 = vpop.xlane.xlu0 %237 }
 0x14a   :  { %v255_v50 = vmul.f32 %v1834_v48, %v238_v49 }
 0x14c   :  { %v1838_v51 = vsub.f32 %v1818_v31, %v255_v50 }
 0x14e   :  { %v263_v52 = vmul.f32 %v1838_v51, %v1838_v51 }
 0x150   :  { %v244_v53 = vpop.xlane.xlu1 %243  ;;  %v267_v54 = vsel %vm87_vm0, %v263_v52, 0.0 }
 0x151   :  { %v257_v55 = vmul.f32 %v1834_v48, %v244_v53  ;;  %268 = vadd.xlane.f32.xlu2 %v267_v54  ;;  %v241_v56 = vpop.xlane.xlu0 %240 }
 0x152   :  { %v256_v57 = vmul.f32 %v1834_v48, %v241_v56 }
 0x153   :  { %v1846_v58 = vsub.f32 %v1822_v34, %v257_v55 }
 0x154   :  { %v1849_v59 = vsub.f32 %v1824_v36, %v256_v57 }
 0x155   :  { %v265_v60 = vmul.f32 %v1846_v58, %v1846_v58 }
 0x156   :  { %v264_v61 = vmul.f32 %v1849_v59, %v1849_v59 }
 0x157   :  { %v273_v62 = vsel %vm87_vm0, %v265_v60, 0.0 }
 0x158   :  { %v247_v63 = vpop.xlane.xlu1 %246  ;;  %274 = vadd.xlane.f32.xlu0 %v273_v62  ;;  %v270_v0 = vsel %vm87_vm0, %v264_v61, 0.0 }
 0x159   :  { %v258_v1 = vmul.f32 %v1834_v48, %v247_v63  ;;  %271 = vadd.xlane.f32.xlu2 %v270_v0 }
 0x15b   :  { %v1859_v2 = vsub.f32 %v1830_v40, %v258_v1 }
 0x15d   :  { %v266_v3 = vmul.f32 %v1859_v2, %v1859_v2 }
 0x15f   :  { %v276_v4 = vsel %vm87_vm0, %v266_v3, 0.0 }
 0x160   :  { %277 = vadd.xlane.f32.xlu1 %v276_v4 }
 0x1c4   :  { %v269_v5 = vpop.xlane.xlu2 %268 }
 0x1c5   :  { %v279_v7 = vmul.f32 %v269_v5, %v1834_v48 }
 0x1c7   :  { %v283_v8 = vadd.f32 1e-05, %v279_v7 }
 0x1c9   :  { %1578 = vrsqrt.f32 %v283_v8  ;;  %vm293_vm10 = vweird.f32 %v283_v8 }
 0x1cb   :  { %v275_v10 = vpop.xlane.xlu0 %274 }
 0x1cc   :  { %v281_v11 = vmul.f32 %v275_v10, %v1834_v48  ;;  %v272_v12 = vpop.xlane.xlu2 %271 }
 0x1cd   :  { %v280_v13 = vmul.f32 %v272_v12, %v1834_v48 }
 0x1ce   :  { %v285_v14 = vadd.f32 1e-05, %v281_v11 }
 0x1cf   :  { %v1579_v15 = vpop.eup %1578  ;;  %v284_v16 = vadd.f32 1e-05, %v280_v13 }
 0x1d0   :  { %v288_v17 = vmul.f32 %v1579_v15, %v283_v8  ;;  %1580 = vrsqrt.f32 %v285_v14  ;;  %vm294_vm9 = vweird.f32 %v1579_v15  ;;  %vm313_vm15 = vweird.f32 %v285_v14 }
 0x1d1   :  { %1582 = vrsqrt.f32 %v284_v16  ;;  %vm295_vm11 = vmor %vm293_vm10, %vm294_vm9  ;;  %vm303_vm14 = vweird.f32 %v284_v16 }
 0x1d2   :  { %v289_v18 = vmul.f32 %v1579_v15, %v288_v17 }
 0x1d3   :  { %v278_v19 = vpop.xlane.xlu1 %277 }
 0x1d4   :  { %v290_v20 = vmul.f32 0.5, %v289_v18  ;;  %v282_v21 = vmul.f32 %v278_v19, %v1834_v48 }
 0x1d6   :  { %v1581_v22 = vpop.eup %1580  ;;  %v291_v23 = vsub.f32 1.5, %v290_v20  ;;  %v286_v24 = vadd.f32 1e-05, %v282_v21 }
 0x1d7   :  { %v1583_v25 = vpop.eup %1582  ;;  %v308_v26 = vmul.f32 %v1581_v22, %v285_v14  ;;  %vm314_vm13 = vweird.f32 %v1581_v22 }
 0x1d8   :  { %v292_v27 = vmul.f32 %v1579_v15, %v291_v23  ;;  %v298_v28 = vmul.f32 %v1583_v25, %v284_v16  ;;  %1584 = vrsqrt.f32 %v286_v24  ;;  %vm304_vm12 = vweird.f32 %v1583_v25  ;;  %vm315_vm2 = vmor %vm313_vm15, %vm314_vm13 }
 0x1d9   :  { %v309_v29 = vmul.f32 %v1581_v22, %v308_v26  ;;  %vm305_vm1 = vmor %vm303_vm14, %vm304_vm12  ;;  %vm323_vm4 = vweird.f32 %v286_v24 }
 0x1da   :  { %v299_v30 = vmul.f32 %v1583_v25, %v298_v28  ;;  %v296_v33 = vsel %vm295_vm11, %v1579_v15, %v292_v27 }
 0x1db   :  { %v310_v32 = vmul.f32 0.5, %v309_v29  ;;  %v327_v41 = vmul.f32 %v296_v33, %v1838_v51  ;;  %v1561_v51 = vld [vmem:[%s2225_s8] ss:$0 sm:$0xff] }
 0x1dc   :  { %v300_v35 = vmul.f32 0.5, %v299_v30 }
 0x1dd   :  { %v311_v37 = vsub.f32 1.5, %v310_v32  ;;  %v335_v53 = vmul.f32 %v1560_v44, %v327_v41 }
 0x1de   :  { %v1585_v38 = vpop.eup %1584  ;;  %v301_v39 = vsub.f32 1.5, %v300_v35 }
 0x1df   :  { %v312_v42 = vmul.f32 %v1581_v22, %v311_v37  ;;  %v318_v43 = vmul.f32 %v1585_v38, %v286_v24  ;;  %vm324_vm3 = vweird.f32 %v1585_v38  ;;  %v343_v60 = vadd.f32 %v1561_v51, %v335_v53 }
 0x1e0   :  { %v302_v45 = vmul.f32 %v1583_v25, %v301_v39  ;;  %vm325_vm5 = vmor %vm323_vm4, %vm324_vm3 }
 0x1e1   :  { %v319_v46 = vmul.f32 %v1585_v38, %v318_v43  ;;  %v316_v49 = vsel %vm315_vm2, %v1581_v22, %v312_v42 }
 0x1e2   :  { %v306_v47 = vsel %vm305_vm1, %v1583_v25, %v302_v45  ;;  %v329_v56 = vmul.f32 %v316_v49, %v1846_v58 }
 0x1e3   :  { %v328_v50 = vmul.f32 %v306_v47, %v1849_v59  ;;  %v320_v52 = vmul.f32 0.5, %v319_v46 }
 0x1e4   :  { %v337_v0 = vmul.f32 %v1560_v44, %v329_v56 }
 0x1e5   :  { %v321_v54 = vsub.f32 1.5, %v320_v52  ;;  %v336_v55 = vmul.f32 %v1560_v44, %v328_v50 }
 0x1e6   :  { %v345_v3 = vadd.f32 %v1561_v51, %v337_v0 }
 0x1e7   :  { %v322_v57 = vmul.f32 %v1585_v38, %v321_v54  ;;  %v344_v61 = vadd.f32 %v1561_v51, %v336_v55 }
 0x1e9   :  { %v326_v62 = vsel %vm325_vm5, %v1585_v38, %v322_v57  ;;  %v347_v63 = vpack.c.bf16 %v344_v61, %v343_v60  ;;  %vm900_vm5 = vcmask 1040384  }
 0x1ea   :  { %v330_v59 = vmul.f32 %v326_v62, %v1859_v2 }
 0x1eb   :  { %1411 = vmatmul.msk.bf16.vlgmr.msra.gmra.mxu1 %vm87_vm0, %v347_v63 }
 0x1ec   :  { %v338_v1 = vmul.f32 %v1560_v44, %v330_v59 }
 0x1ee   :  { %v346_v4 = vadd.f32 %v1561_v51, %v338_v1 }
 0x1f0   :  { %v348_v5 = vpack.c.bf16 %v346_v4, %v345_v3 }
 0x1f2   :  { %1412 = vmatmul.msk.bf16.vlgmr.msra.gmra.mxu3 %vm87_vm0, %v348_v5 }
 0x268   :  { %v380_v6 = vpop.f32.mrf.mxu1 }
 0x269   :  { %v390_v58 = vpack.c.bf16 %v380_v6, %v380_v6 }
 0x26b   :  { %v396_v9 = vunpack.c.l.b16 %v390_v58 }
 0x270   :  { %v382_v7 = vpop.f32.mrf.mxu1 }
 0x271   :  { %v391_v8 = vpack.c.bf16 %v382_v7, %v382_v7 }
 0x273   :  { %v397_v10 = vunpack.c.l.b16 %v391_v8 }
 0x275   :  { %v398_v11 = vpack.c.b16 %v397_v10, %v396_v9  ;;  %v385_v12 = vpop.f32.mrf.mxu3 }
 0x276   :  { %v392_v2 = vpack.c.bf16 %v385_v12, %v385_v12 }
 0x277   :  { %399 = vrot.lane.b32.xlu2 %v398_v11, %s1648_s3 }
 0x278   :  { %v423_v15 = vunpack.c.l.b16 %v392_v2 }
 0x27d   :  { %v387_v13 = vpop.f32.mrf.mxu3 }
 0x27e   :  { %v393_v14 = vpack.c.bf16 %v387_v13, %v387_v13 }
 0x280   :  { %v424_v16 = vunpack.c.l.b16 %v393_v14 }
 0x282   :  { %v425_v17 = vpack.c.b16 %v424_v16, %v423_v15 }
 0x284   :  { %426 = vrot.lane.b32.xlu0 %v425_v17, %s1648_s3 }
 0x2d1   :  { %v400_v18 = vpop.permute.xlu2 %399 }
 0x2d2   :  { %v405_v19 = vsel %vm87_vm0, %v400_v18, 0 }
 0x2d3   :  { %414 = vmatpush.bf16.xpose.msrb.mxu2 %v405_v19  ;;  %v1527_v19 = vld [vmem:[%s2226_s5 + $0x8] sm:$0xff] }
 0x2d4   :  { %581 = vmatpush.bf16.msrb.mxu0 %v1527_v19 }
 0x2da   :  { %1413 = vmatmul.msk.bf16.vlgmr.msrb.gmra.mxu2 %vm87_vm0, %v398_v11 }
 0x2f6   :  { %v427_v20 = vpop.permute.xlu0 %426 }
 0x2f7   :  { %v432_v21 = vsel %vm87_vm0, %v427_v20, 0  ;;  %v1526_v20 = vld [vmem:[%s2226_s5] sm:$0xff] }
 0x2f8   :  { %441 = vmatpush.bf16.xpose.msrb.mxu3 %v432_v21  ;;  %582 = vmatpush.bf16.msrb.mxu0 %v1526_v20 }
 0x2ff   :  { %1414 = vmatmul.msk.bf16.vlgmr.msrb.gmra.mxu3 %vm87_vm0, %v425_v17 }
 0x35d   :  { %v416_v22 = vpop.f32.mrf.mxu2 }
 0x35e   :  { %v448_v23 = vmul.f32 0.17677669, %v416_v22 }
 0x360   :  { %v453_v24 = vsel %vm452_vm6, %v448_v23, -inf }
 0x361   :  { %454 = vmax.xlane.f32.xlu1 %v453_v24 }
 0x365   :  { %v418_v25 = vpop.f32.mrf.mxu2 }
 0x366   :  { %v449_v26 = vmul.f32 0.17677669, %v418_v25 }
 0x368   :  { %v456_v27 = vsel %vm452_vm6, %v449_v26, -inf }
 0x369   :  { %457 = vmax.xlane.f32.xlu1 %v456_v27  ;;  %v1562_v27 = vld [vmem:[%s2227_s29] ss:$0 sm:$0xff] }
 0x382   :  { %v443_v28 = vpop.f32.mrf.mxu3 }
 0x383   :  { %v450_v29 = vmul.f32 0.17677669, %v443_v28 }
 0x385   :  { %v459_v30 = vsel %vm452_vm6, %v450_v29, -inf }
 0x386   :  { %460 = vmax.xlane.f32.xlu1 %v459_v30 }
 0x38a   :  { %v445_v32 = vpop.f32.mrf.mxu3 }
 0x38b   :  { %v451_v33 = vmul.f32 0.17677669, %v445_v32 }
 0x38d   :  { %v462_v35 = vsel %vm452_vm6, %v451_v33, -inf }
 0x38e   :  { %463 = vmax.xlane.f32.xlu2 %v462_v35 }
 0x3d4   :  { %v455_v37 = vpop.xlane.xlu1 %454 }
 0x3d5   :  { %v465_v38 = vsub.f32 %v448_v23, %v455_v37 }
 0x3d7   :  { %v469_v39 = vmul.f32 1.442695, %v465_v38 }
 0x3d9   :  { %1586 = vpow2.f32 %v469_v39 }
 0x3dc   :  { %v458_v41 = vpop.xlane.xlu1 %457 }
 0x3dd   :  { %v466_v42 = vsub.f32 %v449_v26, %v458_v41 }
 0x3df   :  { %v1587_v43 = vpop.eup %1586  ;;  %v471_v44 = vmul.f32 1.442695, %v466_v42 }
 0x3e0   :  { %v477_v45 = vsel %vm452_vm6, %v1587_v43, 0.0 }
 0x3e1   :  { %1588 = vpow2.f32 %v471_v44  ;;  %478 = vadd.xlane.f32.xlu0 %v477_v45 }
 0x3e7   :  { %v1589_v46 = vpop.eup %1588 }
 0x3e8   :  { %v480_v47 = vsel %vm452_vm6, %v1589_v46, 0.0 }
 0x3e9   :  { %481 = vadd.xlane.f32.xlu1 %v480_v47 }
 0x3f5   :  { %531 = vrot.lane.b32.xlu0 %v425_v17, %s1649_s26 }
 0x3f9   :  { %v461_v54 = vpop.xlane.xlu1 %460 }
 0x3fa   :  { %v467_v55 = vsub.f32 %v450_v29, %v461_v54 }
 0x3fc   :  { %v473_v56 = vmul.f32 1.442695, %v467_v55 }
 0x401   :  { %v464_v49 = vpop.xlane.xlu2 %463 }
 0x402   :  { %v468_v50 = vsub.f32 %v451_v33, %v464_v49  ;;  %506 = vrot.lane.b32.xlu1 %v398_v11, %s1649_s26 }
 0x404   :  { %v475_v52 = vmul.f32 1.442695, %v468_v50 }
 0x406   :  { %1590 = vpow2.f32 %v475_v52 }
 0x407   :  { %1592 = vpow2.f32 %v473_v56 }
 0x40c   :  { %v1591_v53 = vpop.eup %1590 }
 0x40d   :  { %v486_v51 = vsel %vm452_vm6, %v1591_v53, 0.0  ;;  %v1593_v57 = vpop.eup %1592 }
 0x40e   :  { %487 = vadd.xlane.f32.xlu2 %v486_v51  ;;  %v483_v60 = vsel %vm452_vm6, %v1593_v57, 0.0 }
 0x42c   :  { %484 = vadd.xlane.f32.xlu1 %v483_v60 }
 0x454   :  { %v479_v62 = vpop.xlane.xlu0 %478 }
 0x45c   :  { %v482_v61 = vpop.xlane.xlu1 %481 }
 0x45d   :  { %1594 = vrcp.f32 %v482_v61 }
 0x45e   :  { %1596 = vrcp.f32 %v479_v62 }
 0x463   :  { %v1595_v63 = vpop.eup %1594 }
 0x464   :  { %v1597_v0 = vpop.eup %1596  ;;  %v494_v1 = vmul.f32 %v1595_v63, %v1589_v46 }
 0x465   :  { %v493_v3 = vmul.f32 %v1597_v0, %v1587_v43 }
 0x466   :  { %v498_v4 = vpack.c.bf16 %v494_v1, %v494_v1 }
 0x467   :  { %v532_v59 = vpop.permute.xlu0 %531  ;;  %v497_v5 = vpack.c.bf16 %v493_v3, %v493_v3  ;;  %v86_v3 = vld [vmem:[%s2190_s1 + $0x1] sm:$0x1] }
 0x468   :  { %544 = vmatpush.bf16.msra.mxu3 %v532_v59  ;;  %v504_v6 = vunpack.c.l.b16 %v498_v4  ;;  %v1531_v4 = vld [vmem:[%s2191_s14 + $0x8] sm:$0xff] }
 0x469   :  { %v503_v58 = vunpack.c.l.b16 %v497_v5  ;;  %v754_v5 = vpack.c.bf16 %v86_v3, %v86_v3 }
 0x46b   :  { %v505_v8 = vpack.c.b16 %v504_v6, %v503_v58  ;;  %v1529_v6 = vld [vmem:[%s2192_s13 + $0x8] sm:$0xff] }
 0x46c   :  { %740 = vmatpush.bf16.msrb.mxu1 %v1529_v6 }
 0x474   :  { %v507_v7 = vpop.permute.xlu1 %506 }
 0x475   :  { %519 = vmatpush.bf16.msra.mxu2 %v507_v7  ;;  %v1530_v7 = vld [vmem:[%s2191_s14] sm:$0xff] }
 0x478   :  { %1415 = vmatmul.msk.bf16.vlgmr.msra.gmra.mxu2 %vm452_vm6, %v505_v8  ;;  %v85_v8 = vld [vmem:[%s2190_s1] sm:$0x1] }
 0x479   :  { %788 = vmatpush.bf16.msrb.mxu2 %v1531_v4 }
 0x47d   :  { %789 = vmatpush.bf16.msrb.mxu2 %v1530_v7 }
 0x481   :  { %v488_v9 = vpop.xlane.xlu2 %487 }
 0x482   :  { %1598 = vrcp.f32 %v488_v9  ;;  %v762_v9 = vunpack.c.l.b16 %v754_v5 }
 0x488   :  { %v1599_v11 = vpop.eup %1598 }
 0x489   :  { %v496_v12 = vmul.f32 %v1599_v11, %v1591_v53  ;;  %v1528_v11 = vld [vmem:[%s2192_s13] sm:$0xff] }
 0x48a   :  { %741 = vmatpush.bf16.msrb.mxu1 %v1528_v11 }
 0x48b   :  { %v500_v13 = vpack.c.bf16 %v496_v12, %v496_v12  ;;  %v753_v12 = vpack.c.bf16 %v85_v8, %v85_v8 }
 0x48d   :  { %v529_v16 = vunpack.c.l.b16 %v500_v13 }
 0x49f   :  { %v485_v10 = vpop.xlane.xlu1 %484 }
 0x4a0   :  { %1600 = vrcp.f32 %v485_v10 }
 0x4a6   :  { %v1601_v2 = vpop.eup %1600 }
 0x4a7   :  { %v495_v14 = vmul.f32 %v1601_v2, %v1593_v57  ;;  %v763_v2 = vrot.slane %v762_v9, 7 }
 0x4a9   :  { %v499_v15 = vpack.c.bf16 %v495_v14, %v495_v14  ;;  %v761_v14 = vunpack.c.l.b16 %v753_v12 }
 0x4ab   :  { %v528_v17 = vunpack.c.l.b16 %v499_v15  ;;  %v765_v15 = vsel %vm764_vm7, %v763_v2, %v761_v14 }
 0x4ad   :  { %v530_v18 = vpack.c.b16 %v529_v16, %v528_v17  ;;  %v766_v16 = vpack.c.b16 %v765_v15, %v765_v15 }
 0x4af   :  { %1416 = vmatmul.msk.bf16.vlgmr.msra.gmra.mxu3 %vm452_vm6, %v530_v18  ;;  %1445 = vmatmul.msk.bf16.vlgmr.msrb.gmra.mxu2 %vm87_vm0, %v766_v16  ;;  %vm896_vm6 = vcmask 7168  }
 0x4fb   :  { %v521_v21 = vpop.f32.mrf.mxu2 }
 0x503   :  { %v523_v22 = vpop.f32.mrf.mxu2 }
 0x504   :  { %v551_v23 = vpack.c.bf16 %v523_v22, %v521_v21 }
 0x506   :  { %1425 = vmatmul.msk.bf16.vlgmr.msrb.gmra.mxu0 %vm87_vm0, %v551_v23 }
 0x532   :  { %v546_v24 = vpop.f32.mrf.mxu3 }
 0x53a   :  { %v548_v25 = vpop.f32.mrf.mxu3 }
 0x53b   :  { %v552_v26 = vpack.c.bf16 %v548_v25, %v546_v24 }
 0x53d   :  { %1426 = vmatmul.msk.bf16.gmra.mxu0 %vm87_vm0, %v552_v26 }
 0x583   :  { %v584_v28 = vpop.f32.mrf.mxu0 }
 0x584   :  { %v598_v29 = vadd.f32 %v1562_v27, %v584_v28 }
 0x586   :  { %v1914_v30 = vadd.f32 %v598_v29, %v1818_v31 }
 0x588   :  { %v606_v32 = vsel %vm87_vm0, %v1914_v30, 0.0 }
 0x589   :  { %607 = vadd.xlane.f32.xlu2 %v606_v32 }
 0x58b   :  { %v586_v33 = vpop.f32.mrf.mxu0 }
 0x58c   :  { %v599_v35 = vadd.f32 %v1562_v27, %v586_v33 }
 0x58e   :  { %v1919_v37 = vadd.f32 %v599_v35, %v1824_v36 }
 0x590   :  { %v609_v38 = vsel %vm87_vm0, %v1919_v37, 0.0 }
 0x591   :  { %610 = vadd.xlane.f32.xlu2 %v609_v38  ;;  %v1563_v38 = vld [vmem:[%s2188_s11] ss:$0 sm:$0xff] }
 0x5ba   :  { %v589_v39 = vpop.f32.mrf.mxu0 }
 0x5bb   :  { %v600_v41 = vadd.f32 %v1562_v27, %v589_v39 }
 0x5bd   :  { %v1924_v42 = vadd.f32 %v600_v41, %v1822_v34 }
 0x5bf   :  { %v612_v31 = vsel %vm87_vm0, %v1924_v42, 0.0 }
 0x5c0   :  { %613 = vadd.xlane.f32.xlu2 %v612_v31 }
 0x5c2   :  { %v591_v43 = vpop.f32.mrf.mxu0 }
 0x5c3   :  { %v601_v44 = vadd.f32 %v1562_v27, %v591_v43 }
 0x5c5   :  { %v1929_v45 = vadd.f32 %v601_v44, %v1830_v40  ;;  %v1564_v44 = vld [vmem:[%s2189_s12] ss:$0 sm:$0xff] }
 0x5c7   :  { %v615_v36 = vsel %vm87_vm0, %v1929_v45, 0.0 }
 0x5c8   :  { %616 = vadd.xlane.f32.xlu0 %v615_v36 }
 0x5fc   :  { %v608_v46 = vpop.xlane.xlu2 %607 }
 0x5fd   :  { %v618_v47 = vmul.f32 %v608_v46, %v1834_v48 }
 0x5ff   :  { %v1935_v49 = vsub.f32 %v1914_v30, %v618_v47 }
 0x601   :  { %v626_v34 = vmul.f32 %v1935_v49, %v1935_v49 }
 0x603   :  { %v630_v50 = vsel %vm87_vm0, %v626_v34, 0.0 }
 0x604   :  { %v611_v52 = vpop.xlane.xlu2 %610  ;;  %631 = vadd.xlane.f32.xlu2 %v630_v50 }
 0x605   :  { %v619_v40 = vmul.f32 %v611_v52, %v1834_v48 }
 0x607   :  { %v1942_v53 = vsub.f32 %v1919_v37, %v619_v40 }
 0x609   :  { %v627_v51 = vmul.f32 %v1942_v53, %v1942_v53 }
 0x60b   :  { %v633_v54 = vsel %vm87_vm0, %v627_v51, 0.0 }
 0x60c   :  { %634 = vadd.xlane.f32.xlu2 %v633_v54 }
 0x633   :  { %v614_v55 = vpop.xlane.xlu2 %613 }
 0x634   :  { %v620_v56 = vmul.f32 %v614_v55, %v1834_v48 }
 0x636   :  { %v1949_v57 = vsub.f32 %v1924_v42, %v620_v56 }
 0x638   :  { %v628_v60 = vmul.f32 %v1949_v57, %v1949_v57 }
 0x63a   :  { %v636_v61 = vsel %vm87_vm0, %v628_v60, 0.0 }
 0x63b   :  { %637 = vadd.xlane.f32.xlu1 %v636_v61  ;;  %v617_v62 = vpop.xlane.xlu0 %616 }
 0x63c   :  { %v621_v63 = vmul.f32 %v617_v62, %v1834_v48 }
 0x63e   :  { %v1956_v59 = vsub.f32 %v1929_v45, %v621_v63 }
 0x640   :  { %v629_v0 = vmul.f32 %v1956_v59, %v1956_v59 }
 0x642   :  { %v639_v1 = vsel %vm87_vm0, %v629_v0, 0.0 }
 0x643   :  { %640 = vadd.xlane.f32.xlu2 %v639_v1 }
 0x677   :  { %v632_v58 = vpop.xlane.xlu2 %631 }
 0x678   :  { %v642_v10 = vmul.f32 %v632_v58, %v1834_v48 }
 0x67a   :  { %v646_v13 = vadd.f32 1e-05, %v642_v10 }
 0x67c   :  { %1602 = vrsqrt.f32 %v646_v13  ;;  %vm656_vm9 = vweird.f32 %v646_v13 }
 0x67f   :  { %v635_v17 = vpop.xlane.xlu2 %634 }
 0x680   :  { %v643_v18 = vmul.f32 %v635_v17, %v1834_v48 }
 0x682   :  { %v1603_v19 = vpop.eup %1602  ;;  %v647_v20 = vadd.f32 1e-05, %v643_v18 }
 0x683   :  { %v651_v21 = vmul.f32 %v1603_v19, %v646_v13  ;;  %vm657_vm8 = vweird.f32 %v1603_v19  ;;  %v791_v13 = vpop.f32.mrf.mxu2 }
 0x684   :  { %1604 = vrsqrt.f32 %v647_v20  ;;  %vm658_vm10 = vmor %vm656_vm9, %vm657_vm8  ;;  %vm666_vm12 = vweird.f32 %v647_v20  ;;  %v796_v14 = vrot.slane %v791_v13, 1  ;;  %v802_v15 = vpack.c.bf16 %v791_v13, %v791_v13 }
 0x685   :  { %v652_v22 = vmul.f32 %v1603_v19, %v651_v21 }
 0x686   :  { %v803_v16 = vpack.c.bf16 %v796_v14, %v796_v14  ;;  %v813_v17 = vsel %vm87_vm0, %v802_v15, 0 }
 0x687   :  { %v653_v23 = vmul.f32 0.5, %v652_v22  ;;  %822 = vmatpush.bf16.xpose.msrb.mxu3 %v813_v17 }
 0x688   :  { %v926_v18 = vunpack.c.l.b16 %v803_v16 }
 0x689   :  { %v654_v24 = vsub.f32 1.5, %v653_v23 }
 0x68a   :  { %v1605_v25 = vpop.eup %1604  ;;  %v927_v21 = vpack.c.b16 %v926_v18, %v926_v18 }
 0x68b   :  { %v655_v26 = vmul.f32 %v1603_v19, %v654_v24  ;;  %v661_v27 = vmul.f32 %v1605_v25, %v647_v20  ;;  %vm667_vm11 = vweird.f32 %v1605_v25  ;;  %v838_v20 = vsel %vm87_vm0, %v803_v16, 0 }
 0x68c   :  { %vm668_vm13 = vmor %vm666_vm12, %vm667_vm11  ;;  %847 = vmatpush.bf16.xpose.msra.mxu2 %v838_v20  ;;  %928 = vrot.lane.b32.xlu2 %v927_v21, %s1648_s3  ;;  %v1533_v21 = vld [vmem:[%s2194_s15 + $0x8] sm:$0xff] }
 0x68d   :  { %v662_v28 = vmul.f32 %v1605_v25, %v661_v27  ;;  %v659_v29 = vsel %vm658_vm10, %v1603_v19, %v655_v26  ;;  %v793_v19 = vpop.f32.mrf.mxu2  ;;  %980 = vmatpush.bf16.msra.mxu1 %v1533_v21 }
 0x68e   :  { %v690_v35 = vmul.f32 %v659_v29, %v1935_v49 }
 0x68f   :  { %v663_v32 = vmul.f32 0.5, %v662_v28 }
 0x690   :  { %v698_v43 = vmul.f32 %v1563_v38, %v690_v35 }
 0x691   :  { %v664_v33 = vsub.f32 1.5, %v663_v32 }
 0x692   :  { %v706_v46 = vadd.f32 %v1564_v44, %v698_v43 }
 0x693   :  { %v665_v39 = vmul.f32 %v1605_v25, %v664_v33 }
 0x695   :  { %v669_v41 = vsel %vm668_vm13, %v1605_v25, %v665_v39 }
 0x696   :  { %v691_v31 = vmul.f32 %v669_v41, %v1942_v53 }
 0x698   :  { %v699_v36 = vmul.f32 %v1563_v38, %v691_v31  ;;  %v1650_v31 = vmov 0  }
 0x699   :  { %v902_v43 = vsel %vm900_vm5, 65535, %v1650_v31 }
 0x69a   :  { %v707_v47 = vadd.f32 %v1564_v44, %v699_v36 }
 0x69c   :  { %v710_v34 = vpack.c.bf16 %v707_v47, %v706_v46 }
 0x69e   :  { %1435 = vmatmul.msk.bf16.vlgmr.msrb.gmra.mxu1 %vm87_vm0, %v710_v34 }
 0x6ae   :  { %v638_v49 = vpop.xlane.xlu1 %637 }
 0x6af   :  { %v644_v50 = vmul.f32 %v638_v49, %v1834_v48 }
 0x6b1   :  { %v648_v52 = vadd.f32 1e-05, %v644_v50 }
 0x6b3   :  { %1606 = vrsqrt.f32 %v648_v52  ;;  %vm676_vm15 = vweird.f32 %v648_v52 }
 0x6b6   :  { %v641_v40 = vpop.xlane.xlu2 %640 }
 0x6b7   :  { %v645_v51 = vmul.f32 %v641_v40, %v1834_v48 }
 0x6b9   :  { %v1607_v53 = vpop.eup %1606  ;;  %v649_v54 = vadd.f32 1e-05, %v645_v51 }
 0x6ba   :  { %v671_v55 = vmul.f32 %v1607_v53, %v648_v52  ;;  %vm677_vm14 = vweird.f32 %v1607_v53 }
 0x6bb   :  { %1608 = vrsqrt.f32 %v649_v54  ;;  %vm678_vm1 = vmor %vm676_vm15, %vm677_vm14  ;;  %vm686_vm3 = vweird.f32 %v649_v54 }
 0x6bc   :  { %v672_v56 = vmul.f32 %v1607_v53, %v671_v55 }
 0x6be   :  { %v673_v60 = vmul.f32 0.5, %v672_v56 }
 0x6c0   :  { %v674_v61 = vsub.f32 1.5, %v673_v60 }
 0x6c1   :  { %v1609_v62 = vpop.eup %1608 }
 0x6c2   :  { %v675_v63 = vmul.f32 %v1607_v53, %v674_v61  ;;  %v681_v0 = vmul.f32 %v1609_v62, %v649_v54  ;;  %vm687_vm2 = vweird.f32 %v1609_v62 }
 0x6c3   :  { %vm688_vm4 = vmor %vm686_vm3, %vm687_vm2 }
 0x6c4   :  { %v682_v1 = vmul.f32 %v1609_v62, %v681_v0  ;;  %v679_v3 = vsel %vm678_vm1, %v1607_v53, %v675_v63 }
 0x6c5   :  { %v692_v6 = vmul.f32 %v679_v3, %v1949_v57  ;;  %v892_v57 = vunpack.c.l.b16 %v802_v15 }
 0x6c6   :  { %v683_v4 = vmul.f32 0.5, %v682_v1 }
 0x6c7   :  { %v700_v9 = vmul.f32 %v1563_v38, %v692_v6 }
 0x6c8   :  { %v684_v5 = vsub.f32 1.5, %v683_v4 }
 0x6c9   :  { %v708_v11 = vadd.f32 %v1564_v44, %v700_v9 }
 0x6ca   :  { %v685_v58 = vmul.f32 %v1609_v62, %v684_v5 }
 0x6cc   :  { %v689_v7 = vsel %vm688_vm4, %v1609_v62, %v685_v58 }
 0x6cd   :  { %v693_v8 = vmul.f32 %v689_v7, %v1956_v59  ;;  %v893_v59 = vpack.c.b16 %v892_v57, %v892_v57 }
 0x6cf   :  { %v701_v10 = vmul.f32 %v1563_v38, %v693_v8  ;;  %894 = vrot.lane.b32.xlu1 %v893_v59, %s1648_s3 }
 0x6d1   :  { %v709_v12 = vadd.f32 %v1564_v44, %v701_v10 }
 0x6d3   :  { %v711_v2 = vpack.c.bf16 %v709_v12, %v708_v11 }
 0x6d5   :  { %1436 = vmatmul.msk.bf16.gmra.mxu1 %vm87_vm0, %v711_v2 }
 0x6e6   :  { %v929_v44 = vpop.permute.xlu2 %928 }
 0x6e7   :  { %v934_v36 = vand.u32 %v929_v44, %v902_v43 }
 0x6e9   :  { %943 = vmatpush.bf16.msra.mxu0 %v934_v36 }
 0x71b   :  { %v743_v22 = vpop.f32.mrf.mxu1 }
 0x71c   :  { %v798_v23 = vpack.c.bf16 %v743_v22, %v743_v22  ;;  %v1532_v22 = vld [vmem:[%s2194_s15] sm:$0xff] }
 0x71d   :  { %981 = vmatpush.bf16.msra.mxu1 %v1532_v22 }
 0x71e   :  { %v806_v26 = vunpack.c.l.b16 %v798_v23 }
 0x723   :  { %v745_v24 = vpop.f32.mrf.mxu1 }
 0x724   :  { %v799_v25 = vpack.c.bf16 %v745_v24, %v745_v24 }
 0x726   :  { %v807_v27 = vunpack.c.l.b16 %v799_v25 }
 0x728   :  { %v808_v28 = vpack.c.b16 %v807_v27, %v806_v26 }
 0x72a   :  { %1446 = vmatmul.msk.bf16.vlgmr.msrb.gmra.mxu3 %vm87_vm0, %v808_v28 }
 0x741   :  { %v895_v46 = vpop.permute.xlu1 %894 }
 0x742   :  { %v904_v47 = vand.u32 %v902_v43, %v895_v46 }
 0x744   :  { %913 = vmatpush.bf16.msra.mxu3 %v904_v47 }
 0x752   :  { %v748_v29 = vpop.f32.mrf.mxu1 }
 0x753   :  { %v800_v32 = vpack.c.bf16 %v748_v29, %v748_v29  ;;  %v1565_v29 = vld [vmem:[%s2193_s16] ss:$0 sm:$0xff] }
 0x755   :  { %v831_v38 = vunpack.c.l.b16 %v800_v32 }
 0x75a   :  { %v750_v33 = vpop.f32.mrf.mxu1 }
 0x75b   :  { %v801_v35 = vpack.c.bf16 %v750_v33, %v750_v33 }
 0x75d   :  { %v832_v39 = vunpack.c.l.b16 %v801_v35 }
 0x75f   :  { %v833_v41 = vpack.c.b16 %v832_v39, %v831_v38 }
 0x761   :  { %1447 = vmatmul.msk.bf16.vlgmr.msra.gmra.mxu2 %vm87_vm0, %v833_v41 }
 0x7ad   :  { %v824_v34 = vpop.f32.mrf.mxu3 }
 0x7ae   :  { %v854_v49 = vmul.f32 0.17677669, %v824_v34 }
 0x7b0   :  { %v858_v50 = vsub.f32 %v854_v49, %v854_v49 }
 0x7b2   :  { %v862_v52 = vmul.f32 1.442695, %v858_v50 }
 0x7b4   :  { %1610 = vpow2.f32 %v862_v52 }
 0x7b5   :  { %v826_v40 = vpop.f32.mrf.mxu3 }
 0x7b6   :  { %v855_v51 = vmul.f32 0.17677669, %v826_v40 }
 0x7b8   :  { %v859_v53 = vsub.f32 %v855_v51, %v855_v51 }
 0x7ba   :  { %v1611_v54 = vpop.eup %1610  ;;  %v864_v55 = vmul.f32 1.442695, %v859_v53 }
 0x7bc   :  { %1612 = vpow2.f32 %v864_v55 }
 0x7bd   :  { %1614 = vrcp.f32 %v1611_v54 }
 0x7c2   :  { %v1613_v56 = vpop.eup %1612 }
 0x7c3   :  { %v1615_v60 = vpop.eup %1614  ;;  %1616 = vrcp.f32 %v1613_v56 }
 0x7c4   :  { %v878_v61 = vmul.f32 %v1615_v60, %v1611_v54 }
 0x7c6   :  { %v882_v63 = vpack.c.bf16 %v878_v61, %v878_v61 }
 0x7c8   :  { %v888_v3 = vunpack.c.l.b16 %v882_v63 }
 0x7c9   :  { %v1617_v62 = vpop.eup %1616 }
 0x7ca   :  { %v879_v0 = vmul.f32 %v1617_v62, %v1613_v56 }
 0x7cc   :  { %v883_v1 = vpack.c.bf16 %v879_v0, %v879_v0 }
 0x7ce   :  { %v889_v4 = vunpack.c.l.b16 %v883_v1 }
 0x7d0   :  { %v890_v5 = vpack.c.b16 %v889_v4, %v888_v3 }
 0x7d2   :  { %1448 = vmatmul.msk.bf16.vlgmr.msra.gmra.mxu3 %vm896_vm6, %v890_v5 }
 0x7e4   :  { %v849_v6 = vpop.f32.mrf.mxu2 }
 0x7e5   :  { %v856_v58 = vmul.f32 0.17677669, %v849_v6 }
 0x7e7   :  { %v860_v7 = vsub.f32 %v856_v58, %v856_v58  ;;  %v1470_v58 = vld [vmem:[%s2197_s19 + $0x10] sm:$0xf] }
 0x7e9   :  { %v866_v8 = vmul.f32 1.442695, %v860_v7  ;;  %v1537_v7 = vld [vmem:[%s2197_s19 + $0x14] sm:$0xf0] }
 0x7eb   :  { %1618 = vpow2.f32 %v866_v8  ;;  %v1536_v8 = vld [vmem:[%s2197_s19 + $0x14] sm:$0xf] }
 0x7ec   :  { %v851_v9 = vpop.f32.mrf.mxu2 }
 0x7ed   :  { %v857_v10 = vmul.f32 0.17677669, %v851_v9 }
 0x7ef   :  { %v861_v11 = vsub.f32 %v857_v10, %v857_v10  ;;  %v1471_v10 = vor.u32 %v1537_v7, %v1470_v58 }
 0x7f1   :  { %v1619_v12 = vpop.eup %1618  ;;  %v868_v2 = vmul.f32 1.442695, %v861_v11  ;;  %v1472_v11 = vld [vmem:[%s2197_s19 + $0x18] sm:$0xf0]  ;;  %1147 = vmatpush.bf16.msrb.mxu2 %v1471_v10 }
 0x7f3   :  { %1620 = vpow2.f32 %v868_v2  ;;  %v1475_v2 = vor.u32 %v1536_v8, %v1472_v11 }
 0x7f4   :  { %1622 = vrcp.f32 %v1619_v12 }
 0x7f5   :  { %1166 = vmatpush.bf16.msrb.mxu3 %v1475_v2 }
 0x7f9   :  { %v1621_v13 = vpop.eup %1620 }
 0x7fa   :  { %v1623_v14 = vpop.eup %1622  ;;  %1624 = vrcp.f32 %v1621_v13 }
 0x7fb   :  { %v880_v15 = vmul.f32 %v1623_v14, %v1619_v12  ;;  %v1462_v14 = vld [vmem:[%s2197_s19] sm:$0xf] }
 0x7fd   :  { %v884_v17 = vpack.c.bf16 %v880_v15, %v880_v15  ;;  %v1535_v15 = vld [vmem:[%s2197_s19 + $0x4] sm:$0xf0] }
 0x7ff   :  { %v922_v19 = vunpack.c.l.b16 %v884_v17  ;;  %v1534_v17 = vld [vmem:[%s2197_s19 + $0x4] sm:$0xf] }
 0x800   :  { %v1625_v16 = vpop.eup %1624 }
 0x801   :  { %v881_v57 = vmul.f32 %v1625_v16, %v1621_v13  ;;  %v1463_v16 = vor.u32 %v1535_v15, %v1462_v14  ;;  %v1545_v15 = vld [vmem:[%s2199_s21 + $0x38] sm:$0xff] }
 0x802   :  { %1299 = vmatpush.bf16.msrb.mxu0 %v1545_v15 }
 0x803   :  { %v885_v18 = vpack.c.bf16 %v881_v57, %v881_v57  ;;  %v1464_v57 = vld [vmem:[%s2197_s19 + $0x8] sm:$0xf0]  ;;  %1148 = vmatpush.bf16.msrb.mxu2 %v1463_v16  ;;  %v1542_v16 = vld [vmem:[%s2199_s21 + $0x20] sm:$0xff] }
 0x805   :  { %v923_v20 = vunpack.c.l.b16 %v885_v18  ;;  %v1467_v18 = vor.u32 %v1534_v17, %v1464_v57  ;;  %v1541_v17 = vld [vmem:[%s2199_s21 + $0x18] sm:$0xff]  ;;  %v1540_v57 = vld [vmem:[%s2199_s21 + $0x10] sm:$0xff] }
 0x807   :  { %v924_v59 = vpack.c.b16 %v923_v20, %v922_v19  ;;  %1167 = vmatpush.bf16.msrb.mxu3 %v1467_v18  ;;  %v1179_v18 = vld [vmem:[%s2200_s20] sm:$0x3] }
 0x809   :  { %1449 = vmatmul.msk.bf16.vlgmr.msra.gmra.mxu0 %vm896_vm6, %v924_v59 }
 0x855   :  { %v915_v23 = vpop.f32.mrf.mxu3 }
 0x85d   :  { %v917_v24 = vpop.f32.mrf.mxu3 }
 0x85e   :  { %v950_v25 = vpack.c.bf16 %v917_v24, %v915_v23 }
 0x860   :  { %1458 = vmatmul.msk.bf16.vlgmr.msra.gmra.mxu1 %vm87_vm0, %v950_v25 }
 0x886   :  { %v945_v26 = vpop.f32.mrf.mxu0 }
 0x88e   :  { %v947_v27 = vpop.f32.mrf.mxu0 }
 0x88f   :  { %v951_v28 = vpack.c.bf16 %v947_v27, %v945_v26 }
 0x891   :  { %1459 = vmatmul.msk.bf16.gmra.mxu1 %vm87_vm0, %v951_v28 }
 0x8dd   :  { %v983_v32 = vpop.f32.mrf.mxu1 }
 0x8de   :  { %v997_v33 = vadd.f32 %v1565_v29, %v983_v32 }
 0x8e0   :  { %v2016_v35 = vadd.f32 %v997_v33, %v1914_v30 }
 0x8e2   :  { %v1005_v38 = vsel %vm87_vm0, %v2016_v35, 0.0 }
 0x8e3   :  { %1006 = vadd.xlane.f32.xlu0 %v1005_v38 }
 0x8e5   :  { %v985_v39 = vpop.f32.mrf.mxu1 }
 0x8e6   :  { %v998_v41 = vadd.f32 %v1565_v29, %v985_v39  ;;  %v1566_v39 = vld [vmem:[%s2195_s17] ss:$0 sm:$0xff] }
 0x8e8   :  { %v2021_v31 = vadd.f32 %v998_v41, %v1919_v37 }
 0x8ea   :  { %v1008_v43 = vsel %vm87_vm0, %v2021_v31, 0.0 }
 0x8eb   :  { %1009 = vadd.xlane.f32.xlu0 %v1008_v43 }
 0x90e   :  { %v988_v44 = vpop.f32.mrf.mxu1 }
 0x90f   :  { %v999_v36 = vadd.f32 %v1565_v29, %v988_v44 }
 0x911   :  { %v2026_v46 = vadd.f32 %v999_v36, %v1924_v42  ;;  %v1567_v36 = vld [vmem:[%s2196_s18] ss:$0 sm:$0xff] }
 0x913   :  { %v1011_v30 = vsel %vm87_vm0, %v2026_v46, 0.0 }
 0x914   :  { %1012 = vadd.xlane.f32.xlu1 %v1011_v30 }
 0x916   :  { %v990_v47 = vpop.f32.mrf.mxu1 }
 0x917   :  { %v1000_v34 = vadd.f32 %v1565_v29, %v990_v47 }
 0x919   :  { %v2031_v49 = vadd.f32 %v1000_v34, %v1929_v45 }
 0x91b   :  { %v1014_v37 = vsel %vm87_vm0, %v2031_v49, 0.0 }
 0x91c   :  { %1015 = vadd.xlane.f32.xlu2 %v1014_v37 }
 0x956   :  { %v1007_v50 = vpop.xlane.xlu0 %1006 }
 0x957   :  { %v1017_v52 = vmul.f32 %v1007_v50, %v1834_v48 }
 0x959   :  { %v2037_v40 = vsub.f32 %v2016_v35, %v1017_v52 }
 0x95b   :  { %v1025_v42 = vmul.f32 %v2037_v40, %v2037_v40 }
 0x95d   :  { %v1029_v51 = vsel %vm87_vm0, %v1025_v42, 0.0 }
 0x95e   :  { %1030 = vadd.xlane.f32.xlu0 %v1029_v51  ;;  %v1010_v53 = vpop.xlane.xlu0 %1009 }
 0x95f   :  { %v1018_v45 = vmul.f32 %v1010_v53, %v1834_v48 }
 0x961   :  { %v2044_v54 = vsub.f32 %v2021_v31, %v1018_v45 }
 0x963   :  { %v1026_v55 = vmul.f32 %v2044_v54, %v2044_v54 }
 0x965   :  { %v1032_v56 = vsel %vm87_vm0, %v1026_v55, 0.0 }
 0x966   :  { %1033 = vadd.xlane.f32.xlu0 %v1032_v56 }
 0x987   :  { %v1013_v60 = vpop.xlane.xlu1 %1012 }
 0x988   :  { %v1019_v61 = vmul.f32 %v1013_v60, %v1834_v48 }
 0x98a   :  { %v2051_v62 = vsub.f32 %v2026_v46, %v1019_v61 }
 0x98c   :  { %v1027_v63 = vmul.f32 %v2051_v62, %v2051_v62 }
 0x98e   :  { %v1035_v0 = vsel %vm87_vm0, %v1027_v63, 0.0 }
 0x98f   :  { %1036 = vadd.xlane.f32.xlu0 %v1035_v0  ;;  %v1016_v1 = vpop.xlane.xlu2 %1015 }
 0x990   :  { %v1020_v3 = vmul.f32 %v1016_v1, %v1834_v48 }
 0x992   :  { %v2058_v4 = vsub.f32 %v2031_v49, %v1020_v3 }
 0x994   :  { %v1028_v5 = vmul.f32 %v2058_v4, %v2058_v4 }
 0x996   :  { %v1038_v6 = vsel %vm87_vm0, %v1028_v5, 0.0 }
 0x997   :  { %1039 = vadd.xlane.f32.xlu0 %v1038_v6 }
 0x9d1   :  { %v1031_v9 = vpop.xlane.xlu0 %1030 }
 0x9d2   :  { %v1041_v12 = vmul.f32 %v1031_v9, %v1834_v48 }
 0x9d4   :  { %v1045_v13 = vadd.f32 1e-05, %v1041_v12 }
 0x9d6   :  { %1626 = vrsqrt.f32 %v1045_v13  ;;  %vm1055_vm8 = vweird.f32 %v1045_v13 }
 0x9d9   :  { %v1034_v19 = vpop.xlane.xlu0 %1033 }
 0x9da   :  { %v1042_v20 = vmul.f32 %v1034_v19, %v1834_v48  ;;  %v1539_v19 = vld [vmem:[%s2199_s21 + $0x8] sm:$0xff] }
 0x9dc   :  { %v1627_v59 = vpop.eup %1626  ;;  %v1046_v21 = vadd.f32 1e-05, %v1042_v20  ;;  %v1182_v20 = vperm.slane %v1179_v18, 1 }
 0x9dd   :  { %v1050_v22 = vmul.f32 %v1627_v59, %v1045_v13  ;;  %vm1056_vm7 = vweird.f32 %v1627_v59 }
 0x9de   :  { %1628 = vrsqrt.f32 %v1046_v21  ;;  %vm1057_vm9 = vmor %vm1055_vm8, %vm1056_vm7  ;;  %vm1065_vm11 = vweird.f32 %v1046_v21 }
 0x9df   :  { %v1051_v23 = vmul.f32 %v1627_v59, %v1050_v22 }
 0x9e1   :  { %v1052_v24 = vmul.f32 0.5, %v1051_v23 }
 0x9e3   :  { %v1053_v25 = vsub.f32 1.5, %v1052_v24 }
 0x9e4   :  { %v1629_v26 = vpop.eup %1628 }
 0x9e5   :  { %v1054_v27 = vmul.f32 %v1627_v59, %v1053_v25  ;;  %v1060_v28 = vmul.f32 %v1629_v26, %v1046_v21  ;;  %vm1066_vm10 = vweird.f32 %v1629_v26 }
 0x9e6   :  { %vm1067_vm12 = vmor %vm1065_vm11, %vm1066_vm10 }
 0x9e7   :  { %v1061_v29 = vmul.f32 %v1629_v26, %v1060_v28  ;;  %v1058_v32 = vsel %vm1057_vm9, %v1627_v59, %v1054_v27  ;;  %v1538_v59 = vld [vmem:[%s2199_s21] sm:$0xff] }
 0x9e8   :  { %v1089_v41 = vmul.f32 %v1058_v32, %v2037_v40 }
 0x9e9   :  { %v1062_v33 = vmul.f32 0.5, %v1061_v29 }
 0x9ea   :  { %v1097_v30 = vmul.f32 %v1566_v39, %v1089_v41 }
 0x9eb   :  { %v1063_v38 = vsub.f32 1.5, %v1062_v33 }
 0x9ec   :  { %v1105_v37 = vadd.f32 %v1567_v36, %v1097_v30  ;;  %v1181_v30 = vperm.slane %v1179_v18, 0 }
 0x9ed   :  { %v1064_v43 = vmul.f32 %v1629_v26, %v1063_v38 }
 0x9ef   :  { %v1068_v44 = vsel %vm1067_vm12, %v1629_v26, %v1064_v43 }
 0x9f0   :  { %v1090_v47 = vmul.f32 %v1068_v44, %v2044_v54 }
 0x9f2   :  { %v1098_v34 = vmul.f32 %v1566_v39, %v1090_v47 }
 0x9f4   :  { %v1106_v50 = vadd.f32 %v1567_v36, %v1098_v34 }
 0x9f6   :  { %v1109_v52 = vpack.c.bf16 %v1106_v50, %v1105_v37 }
 0x9f8   :  { %1476 = vmatmul.msk.bf16.vlgmr.msrb.gmra.mxu2 %vm87_vm0, %v1109_v52  ;;  %1478 = vmatmul.msk.bf16.vlgmr.msrb.gmra.mxu3 %vm87_vm0, %v1109_v52 }
 0xa02   :  { %v1037_v40 = vpop.xlane.xlu0 %1036 }
 0xa03   :  { %v1043_v42 = vmul.f32 %v1037_v40, %v1834_v48 }
 0xa05   :  { %v1047_v51 = vadd.f32 1e-05, %v1043_v42 }
 0xa07   :  { %1630 = vrsqrt.f32 %v1047_v51  ;;  %vm1075_vm14 = vweird.f32 %v1047_v51 }
 0xa0a   :  { %v1040_v53 = vpop.xlane.xlu0 %1039 }
 0xa0b   :  { %v1044_v45 = vmul.f32 %v1040_v53, %v1834_v48 }
 0xa0d   :  { %v1631_v55 = vpop.eup %1630  ;;  %v1048_v56 = vadd.f32 1e-05, %v1044_v45 }
 0xa0e   :  { %v1070_v60 = vmul.f32 %v1631_v55, %v1047_v51  ;;  %vm1076_vm13 = vweird.f32 %v1631_v55 }
 0xa0f   :  { %1632 = vrsqrt.f32 %v1048_v56  ;;  %vm1077_vm15 = vmor %vm1075_vm14, %vm1076_vm13  ;;  %vm1085_vm2 = vweird.f32 %v1048_v56 }
 0xa10   :  { %v1071_v54 = vmul.f32 %v1631_v55, %v1070_v60 }
 0xa12   :  { %v1072_v61 = vmul.f32 0.5, %v1071_v54 }
 0xa14   :  { %v1073_v63 = vsub.f32 1.5, %v1072_v61 }
 0xa15   :  { %v1633_v0 = vpop.eup %1632 }
 0xa16   :  { %v1074_v1 = vmul.f32 %v1631_v55, %v1073_v63  ;;  %v1080_v3 = vmul.f32 %v1633_v0, %v1048_v56  ;;  %vm1086_vm1 = vweird.f32 %v1633_v0 }
 0xa17   :  { %vm1087_vm3 = vmor %vm1085_vm2, %vm1086_vm1 }
 0xa18   :  { %v1081_v5 = vmul.f32 %v1633_v0, %v1080_v3  ;;  %v1078_v6 = vsel %vm1077_vm15, %v1631_v55, %v1074_v1 }
 0xa19   :  { %v1091_v48 = vmul.f32 %v1078_v6, %v2051_v62  ;;  %v1544_v62 = vld [vmem:[%s2199_s21 + $0x30] sm:$0xff] }
 0xa1a   :  { %v1082_v58 = vmul.f32 0.5, %v1081_v5  ;;  %1300 = vmatpush.bf16.msrb.mxu0 %v1544_v62 }
 0xa1b   :  { %v1099_v11 = vmul.f32 %v1566_v39, %v1091_v48 }
 0xa1c   :  { %v1083_v7 = vsub.f32 1.5, %v1082_v58 }
 0xa1d   :  { %v1107_v2 = vadd.f32 %v1567_v36, %v1099_v11 }
 0xa1e   :  { %v1084_v8 = vmul.f32 %v1633_v0, %v1083_v7 }
 0xa20   :  { %v1088_v9 = vsel %vm1087_vm3, %v1633_v0, %v1084_v8 }
 0xa21   :  { %v1092_v10 = vmul.f32 %v1088_v9, %v2058_v4  ;;  %v1543_v4 = vld [vmem:[%s2199_s21 + $0x28] sm:$0xff] }
 0xa22   :  { %1301 = vmatpush.bf16.msrb.mxu0 %v1543_v4 }
 0xa23   :  { %v1100_v12 = vmul.f32 %v1566_v39, %v1092_v10 }
 0xa25   :  { %v1108_v13 = vadd.f32 %v1567_v36, %v1100_v12 }
 0xa26   :  { %1302 = vmatpush.bf16.msrb.mxu0 %v1542_v16 }
 0xa27   :  { %v1110_v14 = vpack.c.bf16 %v1108_v13, %v1107_v2 }
 0xa29   :  { %1477 = vmatmul.msk.bf16.gmra.mxu2 %vm87_vm0, %v1110_v14  ;;  %1479 = vmatmul.msk.bf16.gmra.mxu3 %vm87_vm0, %v1110_v14 }
 0xa2a   :  { %1303 = vmatpush.bf16.msrb.mxu0 %v1541_v17 }
 0xa2e   :  { %1304 = vmatpush.bf16.msrb.mxu0 %v1540_v57 }
 0xa32   :  { %1305 = vmatpush.bf16.msrb.mxu0 %v1539_v19 }
 0xa36   :  { %1306 = vmatpush.bf16.msrb.mxu0 %v1538_v59  ;;  %v1547_v59 = vld [vmem:[%s2202_s23 + $0x8] sm:$0xff] }
 0xa37   :  { %1360 = vmatpush.bf16.msrb.mxu1 %v1547_v59 }
 0xa7b   :  { %v1169_v21 = vpop.f32.mrf.mxu3  ;;  %v1150_v39 = vpop.f32.mrf.mxu2 }
 0xa7c   :  { %v1186_v22 = vadd.f32 %v1182_v20, %v1169_v21  ;;  %v1185_v42 = vadd.f32 %v1181_v30, %v1150_v39  ;;  %v1546_v21 = vld [vmem:[%s2202_s23] sm:$0xff] }
 0xa7d   :  { %1361 = vmatpush.bf16.msrb.mxu1 %v1546_v21 }
 0xa7e   :  { %v1197_v23 = vmul.f32 0.044715, %v1186_v22  ;;  %v1193_v47 = vmul.f32 0.5, %v1186_v22 }
 0xa80   :  { %v1201_v24 = vmul.f32 %v1197_v23, %v1186_v22 }
 0xa82   :  { %v1205_v25 = vmul.f32 %v1201_v24, %v1186_v22  ;;  %v1568_v24 = vld [vmem:[%s2198_s22] ss:$0 sm:$0xff] }
 0xa83   :  { %v1171_v26 = vpop.f32.mrf.mxu3  ;;  %v1152_v37 = vpop.f32.mrf.mxu2 }
 0xa84   :  { %v1209_v27 = vadd.f32 %v1205_v25, %v1186_v22  ;;  %v1188_v28 = vadd.f32 %v1182_v20, %v1171_v26  ;;  %v1187_v51 = vadd.f32 %v1181_v30, %v1152_v37 }
 0xa86   :  { %v1213_v29 = vmul.f32 0.7978846, %v1209_v27  ;;  %v1198_v32 = vmul.f32 0.044715, %v1188_v28  ;;  %v1194_v50 = vmul.f32 0.5, %v1188_v28 }
 0xa88   :  { %v1202_v33 = vmul.f32 %v1198_v32, %v1188_v28  ;;  %1634 = vtanh.f32 %v1213_v29 }
 0xa8a   :  { %v1206_v38 = vmul.f32 %v1202_v33, %v1188_v28 }
 0xa8c   :  { %v1210_v41 = vadd.f32 %v1206_v38, %v1188_v28 }
 0xa8e   :  { %v1214_v43 = vmul.f32 0.7978846, %v1210_v41  ;;  %v1635_v44 = vpop.eup %1634 }
 0xa8f   :  { %v1221_v36 = vadd.f32 1.0, %v1635_v44 }
 0xa90   :  { %1636 = vtanh.f32 %v1214_v43 }
 0xa91   :  { %v1225_v40 = vmul.f32 %v1221_v36, %v1193_v47 }
 0xa93   :  { %v1229_v45 = vmul.f32 %v1225_v40, %v1185_v42  ;;  %v1644_v40 = vld [vmem:[%s2219_s0 + $0x10] sm:$0xff] }
 0xa96   :  { %v1637_v34 = vpop.eup %1636 }
 0xa97   :  { %v1222_v52 = vadd.f32 1.0, %v1637_v34  ;;  %v1643_v34 = vld [vmem:[%s2219_s0 + $0x8] sm:$0xff] }
 0xa99   :  { %v1226_v53 = vmul.f32 %v1222_v52, %v1194_v50 }
 0xa9b   :  { %v1230_v55 = vmul.f32 %v1226_v53, %v1187_v51 }
 0xa9d   :  { %v1233_v56 = vpack.c.bf16 %v1230_v55, %v1229_v45  ;;  %v1645_v45 = vld [vmem:[%s2219_s0 + $0x18] sm:$0xff] }
 0xa9f   :  { %1307 = vmatmul.bf16.vlgmr.msrb.gmra.mxu0 %v1233_v56 }
 0xaac   :  { %v1174_v60 = vpop.f32.mrf.mxu3  ;;  %v1155_v8 = vpop.f32.mrf.mxu2 }
 0xaad   :  { %v1190_v54 = vadd.f32 %v1182_v20, %v1174_v60  ;;  %v1189_v16 = vadd.f32 %v1181_v30, %v1155_v8 }
 0xaaf   :  { %v1199_v61 = vmul.f32 0.044715, %v1190_v54  ;;  %v1195_v2 = vmul.f32 0.5, %v1190_v54 }
 0xab1   :  { %v1203_v63 = vmul.f32 %v1199_v61, %v1190_v54 }
 0xab3   :  { %v1207_v0 = vmul.f32 %v1203_v63, %v1190_v54 }
 0xab4   :  { %v1176_v1 = vpop.f32.mrf.mxu3  ;;  %v1157_v14 = vpop.f32.mrf.mxu2 }
 0xab5   :  { %v1192_v3 = vadd.f32 %v1182_v20, %v1176_v1  ;;  %v1211_v5 = vadd.f32 %v1207_v0, %v1190_v54  ;;  %v1191_v17 = vadd.f32 %v1181_v30, %v1157_v14  ;;  %v1642_v30 = vld [vmem:[%s2219_s0] sm:$0xff] }
 0xab7   :  { %v1200_v6 = vmul.f32 0.044715, %v1192_v3  ;;  %v1215_v58 = vmul.f32 0.7978846, %v1211_v5  ;;  %v1196_v15 = vmul.f32 0.5, %v1192_v3 }
 0xab9   :  { %v1204_v7 = vmul.f32 %v1200_v6, %v1192_v3  ;;  %1638 = vtanh.f32 %v1215_v58 }
 0xabb   :  { %v1208_v48 = vmul.f32 %v1204_v7, %v1192_v3 }
 0xabd   :  { %v1212_v9 = vadd.f32 %v1208_v48, %v1192_v3 }
 0xabf   :  { %v1216_v10 = vmul.f32 0.7978846, %v1212_v9  ;;  %v1639_v11 = vpop.eup %1638 }
 0xac0   :  { %v1223_v12 = vadd.f32 1.0, %v1639_v11 }
 0xac1   :  { %1640 = vtanh.f32 %v1216_v10 }
 0xac2   :  { %v1227_v4 = vmul.f32 %v1223_v12, %v1195_v2 }
 0xac4   :  { %v1231_v18 = vmul.f32 %v1227_v4, %v1189_v16 }
 0xac7   :  { %v1641_v13 = vpop.eup %1640 }
 0xac8   :  { %v1224_v62 = vadd.f32 1.0, %v1641_v13 }
 0xaca   :  { %v1228_v57 = vmul.f32 %v1224_v62, %v1196_v15 }
 0xacc   :  { %v1232_v19 = vmul.f32 %v1228_v57, %v1191_v17 }
 0xace   :  { %v1234_v20 = vpack.c.bf16 %v1232_v19, %v1231_v18 }
 0xad0   :  { %1312 = vmatmul.bf16.gmra.mxu0 %v1234_v20 }
 0xb1c   :  { %v1308_v22 = vpop.f32.mrf.mxu0 }
 0xb1d   :  { %v1318_v23 = vadd.f32 %v1308_v22, %v2016_v35 }
 0xb1f   :  { %v1326_v27 = vadd.f32 %v1568_v24, %v1318_v23 }
 0xb24   :  { %v1310_v25 = vpop.f32.mrf.mxu0 }
 0xb25   :  { %v1319_v26 = vadd.f32 %v1310_v25, %v2021_v31  ;;  %v1569_v31 = vld [vmem:[%s2201_s24] ss:$0 sm:$0xff] }
 0xb27   :  { %v1327_v28 = vadd.f32 %v1568_v24, %v1319_v26 }
 0xb29   :  { %v1330_v29 = vpack.c.bf16 %v1327_v28, %v1326_v27 }
 0xb2b   :  { %1520 = vmatmul.msk.bf16.vlgmr.msrb.gmra.mxu1 %vm87_vm0, %v1330_v29 }
 0xb4d   :  { %v1313_v32 = vpop.f32.mrf.mxu0 }
 0xb4e   :  { %v1320_v33 = vadd.f32 %v1313_v32, %v2026_v46 }
 0xb50   :  { %v1328_v41 = vadd.f32 %v1568_v24, %v1320_v33 }
 0xb55   :  { %v1315_v38 = vpop.f32.mrf.mxu0 }
 0xb56   :  { %v1321_v39 = vadd.f32 %v1315_v38, %v2031_v49 }
 0xb58   :  { %v1329_v35 = vadd.f32 %v1568_v24, %v1321_v39 }
 0xb5a   :  { %v1331_v43 = vpack.c.bf16 %v1329_v35, %v1328_v41 }
 0xb5c   :  { %1521 = vmatmul.msk.bf16.gmra.mxu1 %vm87_vm0, %v1331_v43 }
 0xba8   :  { %v1363_v44 = vpop.f32.mrf.mxu1 }
 0xba9   :  { %v1377_v36 = vadd.f32 %v1569_v31, %v1363_v44 }
 0xbab   :  { %v1381_v47 = vadd.f32 %v1642_v30, %v1377_v36 }
 0xbad   :  { %1385 = vst.msk [vmem:[%s2203_s25] sm:$0xff] %vm87_vm0, %v1381_v47 }
 0xbb0   :  { %v1365_v46 = vpop.f32.mrf.mxu1 }
 0xbb1   :  { %v1378_v49 = vadd.f32 %v1569_v31, %v1365_v46 }
 0xbb3   :  { %v1382_v37 = vadd.f32 %v1643_v34, %v1378_v49 }
 0xbb5   :  { %1386 = vst.msk [vmem:[%s2203_s25 + $0x8] sm:$0xff] %vm87_vm0, %v1382_v37 }
 0xbd9   :  { %v1368_v50 = vpop.f32.mrf.mxu1 }
 0xbda   :  { %v1379_v52 = vadd.f32 %v1569_v31, %v1368_v50 }
 0xbdc   :  { %v1383_v42 = vadd.f32 %v1644_v40, %v1379_v52 }
 0xbde   :  { %1387 = vst.msk [vmem:[%s2203_s25 + $0x10] sm:$0xff] %vm87_vm0, %v1383_v42 }
 0xbe1   :  { %v1370_v51 = vpop.f32.mrf.mxu1 }
 0xbe2   :  { %v1380_v53 = vadd.f32 %v1569_v31, %v1370_v51 }
 0xbe4   :  { %v1384_v55 = vadd.f32 %v1645_v45, %v1380_v53 }
 0xbe6   :  { %1388 = vst.msk [vmem:[%s2203_s25 + $0x18] sm:$0xff] %vm87_vm0, %v1384_v55 }

// kernel: generator_forward.7
= control target key start
LH: loop header
LB: loop body
LE: loop exit
PB: predicated region body
PF: predicated region fallthrough
CT: control target
= control target key end

     0   :  { %vm668_vm0 = vcmask 261120   ;;  %s1808_s1 = inlined_call_operand.vmem [shape: bf16[512,32], index: 1, kind: input, shape index: {}]   ;;  %s1809_s2 = inlined_call_operand.vmem [shape: f32[1,32], index: 2, kind: input, shape index: {}]   ;;  %s1810_s0 = inlined_call_operand.vmem [shape: bf16[128,512], index: 0, kind: input, shape index: {}]   ;;  %s1811_s3 = inlined_call_operand.vmem [shape: f32[1,32], index: 3, kind: input, shape index: {}]   ;;  %s1812_s4 = inlined_call_operand.vmem [shape: f32[1,32], index: 4, kind: input, shape index: {}]   ;;  %s1813_s5 = inlined_call_operand.vmem [shape: f32[128,32], index: 5, kind: output, shape index: {}]  }
   0x1   :  { %v1182_v0 = vld [vmem:[%s1808_s1 + $0x38] sm:$0xff]  ;;  %v1181_v4 = vld [vmem:[%s1808_s1 + $0x30] sm:$0xff]  ;;  %v1180_v8 = vld [vmem:[%s1808_s1 + $0x28] sm:$0xff] }
   0x2   :  { %v1190_v1 = vld [vmem:[%s1808_s1 + $0x78] sm:$0xff]  ;;  %472 = vmatpush.bf16.msra.mxu0 %v1182_v0  ;;  %v1189_v5 = vld [vmem:[%s1808_s1 + $0x70] sm:$0xff]  ;;  %v1188_v9 = vld [vmem:[%s1808_s1 + $0x68] sm:$0xff] }
   0x3   :  { %v1198_v2 = vld [vmem:[%s1808_s1 + $0xb8] sm:$0xff]  ;;  %521 = vmatpush.bf16.msra.mxu1 %v1190_v1  ;;  %v1197_v6 = vld [vmem:[%s1808_s1 + $0xb0] sm:$0xff]  ;;  %v1196_v10 = vld [vmem:[%s1808_s1 + $0xa8] sm:$0xff] }
   0x4   :  { %v1206_v3 = vld [vmem:[%s1808_s1 + $0xf8] sm:$0xff]  ;;  %570 = vmatpush.bf16.msra.mxu2 %v1198_v2  ;;  %v1205_v7 = vld [vmem:[%s1808_s1 + $0xf0] sm:$0xff]  ;;  %v1204_v11 = vld [vmem:[%s1808_s1 + $0xe8] sm:$0xff] }
   0x5   :  { %619 = vmatpush.bf16.msra.mxu3 %v1206_v3  ;;  %v1179_v12 = vld [vmem:[%s1808_s1 + $0x20] sm:$0xff]  ;;  %v1178_v16 = vld [vmem:[%s1808_s1 + $0x18] sm:$0xff]  ;;  %v1177_v20 = vld [vmem:[%s1808_s1 + $0x10] sm:$0xff] }
   0x6   :  { %473 = vmatpush.bf16.msra.mxu0 %v1181_v4  ;;  %v1187_v13 = vld [vmem:[%s1808_s1 + $0x60] sm:$0xff]  ;;  %v1186_v17 = vld [vmem:[%s1808_s1 + $0x58] sm:$0xff]  ;;  %v1185_v21 = vld [vmem:[%s1808_s1 + $0x50] sm:$0xff] }
   0x7   :  { %522 = vmatpush.bf16.msra.mxu1 %v1189_v5  ;;  %v1195_v14 = vld [vmem:[%s1808_s1 + $0xa0] sm:$0xff]  ;;  %v1194_v18 = vld [vmem:[%s1808_s1 + $0x98] sm:$0xff]  ;;  %v1193_v22 = vld [vmem:[%s1808_s1 + $0x90] sm:$0xff] }
   0x8   :  { %571 = vmatpush.bf16.msra.mxu2 %v1197_v6  ;;  %v1203_v15 = vld [vmem:[%s1808_s1 + $0xe0] sm:$0xff]  ;;  %v1202_v19 = vld [vmem:[%s1808_s1 + $0xd8] sm:$0xff]  ;;  %v1201_v23 = vld [vmem:[%s1808_s1 + $0xd0] sm:$0xff] }
   0x9   :  { %620 = vmatpush.bf16.msra.mxu3 %v1205_v7  ;;  %v1176_v24 = vld [vmem:[%s1808_s1 + $0x8] sm:$0xff]  ;;  %v1175_v28 = vld [vmem:[%s1808_s1] sm:$0xff]  ;;  %v1145_v33 = vld [vmem:[%s1810_s0 + $0xc] sm:$0xf0] }
   0xa   :  { %474 = vmatpush.bf16.msra.mxu0 %v1180_v8  ;;  %v1184_v25 = vld [vmem:[%s1808_s1 + $0x48] sm:$0xff]  ;;  %v1183_v29 = vld [vmem:[%s1808_s1 + $0x40] sm:$0xff]  ;;  %v891_v35 = vld [vmem:[%s1810_s0 + $0x10] sm:$0xf0] }
   0xb   :  { %523 = vmatpush.bf16.msra.mxu1 %v1188_v9  ;;  %v1192_v26 = vld [vmem:[%s1808_s1 + $0x88] sm:$0xff]  ;;  %v1191_v30 = vld [vmem:[%s1808_s1 + $0x80] sm:$0xff]  ;;  %v1146_v37 = vld [vmem:[%s1810_s0 + $0x14] sm:$0xf0] }
   0xc   :  { %572 = vmatpush.bf16.msra.mxu2 %v1196_v10  ;;  %v1200_v27 = vld [vmem:[%s1808_s1 + $0xc8] sm:$0xff]  ;;  %v1199_v31 = vld [vmem:[%s1808_s1 + $0xc0] sm:$0xff]  ;;  %v899_v39 = vld [vmem:[%s1810_s0 + $0x18] sm:$0xf0] }
   0xd   :  { %621 = vmatpush.bf16.msra.mxu3 %v1204_v11  ;;  %v889_v32 = vld [vmem:[%s1810_s0] sm:$0xf]  ;;  %v1143_v34 = vld [vmem:[%s1810_s0 + $0x4] sm:$0xf]  ;;  %v897_v36 = vld [vmem:[%s1810_s0 + $0x8] sm:$0xf] }
   0xe   :  { %475 = vmatpush.bf16.msra.mxu0 %v1179_v12  ;;  %v1144_v38 = vld [vmem:[%s1810_s0 + $0xc] sm:$0xf]  ;;  %v890_v40 = vor.u32 %v1145_v33, %v889_v32  ;;  %v894_v41 = vor.u32 %v1143_v34, %v891_v35  ;;  %v898_v42 = vor.u32 %v1146_v37, %v897_v36  ;;  %v905_v44 = vld [vmem:[%s1810_s0 + $0x20] sm:$0xf]  ;;  %v1149_v45 = vld [vmem:[%s1810_s0 + $0x2c] sm:$0xf0] }
   0xf   :  { %524 = vmatpush.bf16.msra.mxu1 %v1187_v13  ;;  %v902_v43 = vor.u32 %v1144_v38, %v899_v39  ;;  %v1147_v46 = vld [vmem:[%s1810_s0 + $0x24] sm:$0xf]  ;;  %v907_v47 = vld [vmem:[%s1810_s0 + $0x30] sm:$0xf0]  ;;  %v913_v48 = vld [vmem:[%s1810_s0 + $0x28] sm:$0xf]  ;;  %v906_v52 = vor.u32 %v1149_v45, %v905_v44 }
  0x10   :  { %573 = vmatpush.bf16.msra.mxu2 %v1195_v14  ;;  %v1150_v49 = vld [vmem:[%s1810_s0 + $0x34] sm:$0xf0]  ;;  %v1148_v50 = vld [vmem:[%s1810_s0 + $0x2c] sm:$0xf]  ;;  %v915_v51 = vld [vmem:[%s1810_s0 + $0x38] sm:$0xf0]  ;;  %v910_v53 = vor.u32 %v1147_v46, %v907_v47 }
  0x11   :  { %622 = vmatpush.bf16.msra.mxu3 %v1203_v15  ;;  %v914_v54 = vor.u32 %v1150_v49, %v913_v48  ;;  %v918_v55 = vor.u32 %v1148_v50, %v915_v51  ;;  %v921_v56 = vld [vmem:[%s1810_s0 + $0x40] sm:$0xf]  ;;  %v1153_v57 = vld [vmem:[%s1810_s0 + $0x4c] sm:$0xf0]  ;;  %v1151_v58 = vld [vmem:[%s1810_s0 + $0x44] sm:$0xf] }
  0x12   :  { %476 = vmatpush.bf16.msra.mxu0 %v1178_v16  ;;  %v923_v59 = vld [vmem:[%s1810_s0 + $0x50] sm:$0xf0]  ;;  %v929_v60 = vld [vmem:[%s1810_s0 + $0x48] sm:$0xf]  ;;  %v1154_v61 = vld [vmem:[%s1810_s0 + $0x54] sm:$0xf0]  ;;  %v922_v0 = vor.u32 %v1153_v57, %v921_v56 }
  0x13   :  { %525 = vmatpush.bf16.msra.mxu1 %v1186_v17  ;;  %v1152_v62 = vld [vmem:[%s1810_s0 + $0x4c] sm:$0xf]  ;;  %v931_v63 = vld [vmem:[%s1810_s0 + $0x58] sm:$0xf0]  ;;  %v926_v1 = vor.u32 %v1151_v58, %v923_v59  ;;  %v930_v2 = vor.u32 %v1154_v61, %v929_v60  ;;  %v937_v4 = vld [vmem:[%s1810_s0 + $0x60] sm:$0xf] }
  0x14   :  { %574 = vmatpush.bf16.msra.mxu2 %v1194_v18  ;;  %v934_v3 = vor.u32 %v1152_v62, %v931_v63  ;;  %v1157_v5 = vld [vmem:[%s1810_s0 + $0x6c] sm:$0xf0]  ;;  %v1155_v6 = vld [vmem:[%s1810_s0 + $0x64] sm:$0xf]  ;;  %v939_v7 = vld [vmem:[%s1810_s0 + $0x70] sm:$0xf0] }
  0x15   :  { %623 = vmatpush.bf16.msra.mxu3 %v1202_v19  ;;  %v945_v8 = vld [vmem:[%s1810_s0 + $0x68] sm:$0xf]  ;;  %v1158_v9 = vld [vmem:[%s1810_s0 + $0x74] sm:$0xf0]  ;;  %v1156_v10 = vld [vmem:[%s1810_s0 + $0x6c] sm:$0xf]  ;;  %v938_v12 = vor.u32 %v1157_v5, %v937_v4  ;;  %v942_v13 = vor.u32 %v1155_v6, %v939_v7 }
  0x16   :  { %477 = vmatpush.bf16.msra.mxu0 %v1177_v20  ;;  %v947_v11 = vld [vmem:[%s1810_s0 + $0x78] sm:$0xf0]  ;;  %v946_v14 = vor.u32 %v1158_v9, %v945_v8  ;;  %v953_v16 = vld [vmem:[%s1810_s0 + $0x80] sm:$0xf]  ;;  %v1161_v17 = vld [vmem:[%s1810_s0 + $0x8c] sm:$0xf0] }
  0x17   :  { %526 = vmatpush.bf16.msra.mxu1 %v1185_v21  ;;  %v950_v15 = vor.u32 %v1156_v10, %v947_v11  ;;  %v1159_v18 = vld [vmem:[%s1810_s0 + $0x84] sm:$0xf]  ;;  %v955_v19 = vld [vmem:[%s1810_s0 + $0x90] sm:$0xf0]  ;;  %v961_v20 = vld [vmem:[%s1810_s0 + $0x88] sm:$0xf] }
  0x18   :  { %575 = vmatpush.bf16.msra.mxu2 %v1193_v22  ;;  %v1162_v21 = vld [vmem:[%s1810_s0 + $0x94] sm:$0xf0]  ;;  %v1160_v22 = vld [vmem:[%s1810_s0 + $0x8c] sm:$0xf]  ;;  %v977_v32 = vld [vmem:[%s1810_s0 + $0xa8] sm:$0xf] }
  0x19   :  { %624 = vmatpush.bf16.msra.mxu3 %v1201_v23  ;;  %v963_v23 = vld [vmem:[%s1810_s0 + $0x98] sm:$0xf0]  ;;  %v1166_v33 = vld [vmem:[%s1810_s0 + $0xb4] sm:$0xf0]  ;;  %v1164_v34 = vld [vmem:[%s1810_s0 + $0xac] sm:$0xf] }
  0x1a   :  { %478 = vmatpush.bf16.msra.mxu0 %v1176_v24  ;;  %v954_v24 = vor.u32 %v1161_v17, %v953_v16  ;;  %v979_v35 = vld [vmem:[%s1810_s0 + $0xb8] sm:$0xf0]  ;;  %v978_v38 = vor.u32 %v1166_v33, %v977_v32  ;;  %v993_v44 = vld [vmem:[%s1810_s0 + $0xc8] sm:$0xf]  ;;  %v1170_v45 = vld [vmem:[%s1810_s0 + $0xd4] sm:$0xf0] }
  0x1b   :  { %527 = vmatpush.bf16.msra.mxu1 %v1184_v25  ;;  %v958_v25 = vor.u32 %v1159_v18, %v955_v19  ;;  %v982_v39 = vor.u32 %v1164_v34, %v979_v35  ;;  %v1168_v46 = vld [vmem:[%s1810_s0 + $0xcc] sm:$0xf]  ;;  %v995_v47 = vld [vmem:[%s1810_s0 + $0xd8] sm:$0xf0]  ;;  %v994_v50 = vor.u32 %v1170_v45, %v993_v44  ;;  %v1009_v56 = vld [vmem:[%s1810_s0 + $0xe8] sm:$0xf] }
  0x1c   :  { %576 = vmatpush.bf16.msra.mxu2 %v1192_v26  ;;  %v962_v26 = vor.u32 %v1162_v21, %v961_v20  ;;  %v998_v51 = vor.u32 %v1168_v46, %v995_v47  ;;  %v1174_v57 = vld [vmem:[%s1810_s0 + $0xf4] sm:$0xf0]  ;;  %v1172_v58 = vld [vmem:[%s1810_s0 + $0xec] sm:$0xf]  ;;  %v1011_v59 = vld [vmem:[%s1810_s0 + $0xf8] sm:$0xf0] }
  0x1d   :  { %625 = vmatpush.bf16.msra.mxu3 %v1200_v27  ;;  %v966_v27 = vor.u32 %v1160_v22, %v963_v23  ;;  %v1010_v62 = vor.u32 %v1174_v57, %v1009_v56  ;;  %v1014_v63 = vor.u32 %v1172_v58, %v1011_v59 }
  0x1e   :  { %479 = vmatpush.bf16.msra.mxu0 %v1175_v28  ;;  %v969_v28 = vld [vmem:[%s1810_s0 + $0xa0] sm:$0xf] }
  0x1f   :  { %528 = vmatpush.bf16.msra.mxu1 %v1183_v29  ;;  %v1165_v29 = vld [vmem:[%s1810_s0 + $0xac] sm:$0xf0] }
  0x20   :  { %577 = vmatpush.bf16.msra.mxu2 %v1191_v30  ;;  %v1163_v30 = vld [vmem:[%s1810_s0 + $0xa4] sm:$0xf]  ;;  %v970_v36 = vor.u32 %v1165_v29, %v969_v28 }
  0x21   :  { %626 = vmatpush.bf16.msra.mxu3 %v1199_v31  ;;  %480 = vmatmul.bf16.vlgmr.msra.gmra.mxu0 %v890_v40  ;;  %v971_v31 = vld [vmem:[%s1810_s0 + $0xb0] sm:$0xf0]  ;;  %v985_v40 = vld [vmem:[%s1810_s0 + $0xc0] sm:$0xf] }
  0x22   :  { %529 = vmatmul.bf16.vlgmr.msra.gmra.mxu1 %v894_v41  ;;  %v974_v37 = vor.u32 %v1163_v30, %v971_v31  ;;  %v1169_v41 = vld [vmem:[%s1810_s0 + $0xcc] sm:$0xf0] }
  0x23   :  { %578 = vmatmul.bf16.vlgmr.msra.gmra.mxu2 %v898_v42  ;;  %v1167_v42 = vld [vmem:[%s1810_s0 + $0xc4] sm:$0xf]  ;;  %v986_v48 = vor.u32 %v1169_v41, %v985_v40 }
  0x24   :  { %627 = vmatmul.bf16.vlgmr.msra.gmra.mxu3 %v902_v43  ;;  %v987_v43 = vld [vmem:[%s1810_s0 + $0xd0] sm:$0xf0] }
  0x25   :  { %v990_v49 = vor.u32 %v1167_v42, %v987_v43 }
  0x31   :  { %485 = vmatmul.bf16.gmra.mxu0 %v906_v52  ;;  %v1001_v52 = vld [vmem:[%s1810_s0 + $0xe0] sm:$0xf] }
  0x32   :  { %534 = vmatmul.bf16.gmra.mxu1 %v910_v53  ;;  %v1173_v53 = vld [vmem:[%s1810_s0 + $0xec] sm:$0xf0] }
  0x33   :  { %583 = vmatmul.bf16.gmra.mxu2 %v914_v54  ;;  %v1171_v54 = vld [vmem:[%s1810_s0 + $0xe4] sm:$0xf]  ;;  %v1002_v60 = vor.u32 %v1173_v53, %v1001_v52 }
  0x34   :  { %632 = vmatmul.bf16.gmra.mxu3 %v918_v55  ;;  %v1003_v55 = vld [vmem:[%s1810_s0 + $0xf0] sm:$0xf0] }
  0x35   :  { %v1006_v61 = vor.u32 %v1171_v54, %v1003_v55 }
  0x41   :  { %490 = vmatmul.bf16.gmra.mxu0 %v922_v0  ;;  %v1537_v0 = vld [vmem:[%s1809_s2] ss:$0 sm:$0xff] }
  0x42   :  { %539 = vmatmul.bf16.gmra.mxu1 %v926_v1 }
  0x43   :  { %588 = vmatmul.bf16.gmra.mxu2 %v930_v2 }
  0x44   :  { %637 = vmatmul.bf16.gmra.mxu3 %v934_v3 }
  0x51   :  { %495 = vmatmul.bf16.gmra.mxu0 %v938_v12 }
  0x52   :  { %544 = vmatmul.bf16.gmra.mxu1 %v942_v13 }
  0x53   :  { %593 = vmatmul.bf16.gmra.mxu2 %v946_v14 }
  0x54   :  { %642 = vmatmul.bf16.gmra.mxu3 %v950_v15 }
  0x61   :  { %500 = vmatmul.bf16.gmra.mxu0 %v954_v24 }
  0x62   :  { %549 = vmatmul.bf16.gmra.mxu1 %v958_v25 }
  0x63   :  { %598 = vmatmul.bf16.gmra.mxu2 %v962_v26 }
  0x64   :  { %647 = vmatmul.bf16.gmra.mxu3 %v966_v27 }
  0x71   :  { %505 = vmatmul.bf16.gmra.mxu0 %v970_v36 }
  0x72   :  { %554 = vmatmul.bf16.gmra.mxu1 %v974_v37 }
  0x73   :  { %603 = vmatmul.bf16.gmra.mxu2 %v978_v38 }
  0x74   :  { %652 = vmatmul.bf16.gmra.mxu3 %v982_v39 }
  0x81   :  { %510 = vmatmul.bf16.gmra.mxu0 %v986_v48 }
  0x82   :  { %559 = vmatmul.bf16.gmra.mxu1 %v990_v49 }
  0x83   :  { %608 = vmatmul.bf16.gmra.mxu2 %v994_v50 }
  0x84   :  { %657 = vmatmul.bf16.gmra.mxu3 %v998_v51 }
  0x91   :  { %515 = vmatmul.bf16.gmra.mxu0 %v1002_v60 }
  0x92   :  { %564 = vmatmul.bf16.gmra.mxu1 %v1006_v61 }
  0x93   :  { %613 = vmatmul.bf16.gmra.mxu2 %v1010_v62 }
  0x94   :  { %662 = vmatmul.bf16.gmra.mxu3 %v1014_v63 }
  0x9e   :  { %v481_v1 = vpop.f32.mrf.mxu0 }
  0x9f   :  { %v530_v2 = vpop.f32.mrf.mxu1  ;;  %v482_v3 = vadd.f32 %v1537_v0, %v481_v1 }
  0xa1   :  { %v531_v4 = vadd.f32 %v530_v2, %v482_v3 }
  0xa6   :  { %v579_v5 = vpop.f32.mrf.mxu2  ;;  %v483_v8 = vpop.f32.mrf.mxu0 }
  0xa7   :  { %v628_v6 = vpop.f32.mrf.mxu3  ;;  %v580_v7 = vadd.f32 %v579_v5, %v531_v4  ;;  %v532_v9 = vpop.f32.mrf.mxu1  ;;  %v484_v10 = vadd.f32 %v1537_v0, %v483_v8 }
  0xa9   :  { %v1541_v11 = vadd.f32 %v628_v6, %v580_v7  ;;  %v533_v12 = vadd.f32 %v532_v9, %v484_v10 }
  0xab   :  { %v669_v21 = vsel %vm668_vm0, %v1541_v11, 0.0 }
  0xae   :  { %v581_v13 = vpop.f32.mrf.mxu2  ;;  %v486_v16 = vpop.f32.mrf.mxu0 }
  0xaf   :  { %v630_v14 = vpop.f32.mrf.mxu3  ;;  %v582_v15 = vadd.f32 %v581_v13, %v533_v12  ;;  %v535_v17 = vpop.f32.mrf.mxu1  ;;  %v487_v18 = vadd.f32 %v1537_v0, %v486_v16 }
  0xb1   :  { %v1544_v19 = vadd.f32 %v630_v14, %v582_v15  ;;  %v536_v20 = vadd.f32 %v535_v17, %v487_v18 }
  0xb3   :  { %v670_v22 = vsel %vm668_vm0, %v1544_v19, 0.0 }
  0xb4   :  { %v671_v23 = vadd.f32 %v670_v22, %v669_v21 }
  0xb6   :  { %v584_v24 = vpop.f32.mrf.mxu2  ;;  %v488_v27 = vpop.f32.mrf.mxu0 }
  0xb7   :  { %v633_v25 = vpop.f32.mrf.mxu3  ;;  %v585_v26 = vadd.f32 %v584_v24, %v536_v20  ;;  %v537_v28 = vpop.f32.mrf.mxu1  ;;  %v489_v29 = vadd.f32 %v1537_v0, %v488_v27 }
  0xb9   :  { %v1551_v30 = vadd.f32 %v633_v25, %v585_v26  ;;  %v538_v31 = vadd.f32 %v537_v28, %v489_v29 }
  0xbb   :  { %v672_v32 = vsel %vm668_vm0, %v1551_v30, 0.0 }
  0xbc   :  { %v673_v33 = vadd.f32 %v672_v32, %v671_v23 }
  0xbe   :  { %v586_v34 = vpop.f32.mrf.mxu2  ;;  %v491_v37 = vpop.f32.mrf.mxu0 }
  0xbf   :  { %v635_v35 = vpop.f32.mrf.mxu3  ;;  %v587_v36 = vadd.f32 %v586_v34, %v538_v31  ;;  %v540_v38 = vpop.f32.mrf.mxu1  ;;  %v492_v39 = vadd.f32 %v1537_v0, %v491_v37 }
  0xc1   :  { %v1556_v40 = vadd.f32 %v635_v35, %v587_v36  ;;  %v541_v41 = vadd.f32 %v540_v38, %v492_v39 }
  0xc3   :  { %v674_v42 = vsel %vm668_vm0, %v1556_v40, 0.0 }
  0xc4   :  { %v675_v43 = vadd.f32 %v674_v42, %v673_v33 }
  0xc6   :  { %v589_v44 = vpop.f32.mrf.mxu2  ;;  %v493_v47 = vpop.f32.mrf.mxu0 }
  0xc7   :  { %v638_v45 = vpop.f32.mrf.mxu3  ;;  %v590_v46 = vadd.f32 %v589_v44, %v541_v41  ;;  %v542_v48 = vpop.f32.mrf.mxu1  ;;  %v494_v16 = vadd.f32 %v1537_v0, %v493_v47 }
  0xc9   :  { %v1560_v49 = vadd.f32 %v638_v45, %v590_v46  ;;  %v543_v22 = vadd.f32 %v542_v48, %v494_v16 }
  0xcb   :  { %v676_v50 = vsel %vm668_vm0, %v1560_v49, 0.0 }
  0xcc   :  { %v1564_v51 = vadd.f32 %v676_v50, %v675_v43 }
  0xce   :  { %v591_v52 = vpop.f32.mrf.mxu2  ;;  %v496_v54 = vpop.f32.mrf.mxu0 }
  0xcf   :  { %v640_v53 = vpop.f32.mrf.mxu3  ;;  %v545_v55 = vpop.f32.mrf.mxu1  ;;  %v497_v17 = vadd.f32 %v1537_v0, %v496_v54  ;;  %v592_v25 = vadd.f32 %v591_v52, %v543_v22 }
  0xd1   :  { %v546_v23 = vadd.f32 %v545_v55, %v497_v17  ;;  %v1572_v36 = vadd.f32 %v640_v53, %v592_v25  ;;  %v1215_v17 = vmov 128.0  }
  0xd2   :  { %1211 = vrcp.f32 %v1215_v17 }
  0xd3   :  { %v678_v45 = vsel %vm668_vm0, %v1572_v36, 0.0 }
  0xd6   :  { %v594_v56 = vpop.f32.mrf.mxu2  ;;  %v498_v58 = vpop.f32.mrf.mxu0 }
  0xd7   :  { %v643_v57 = vpop.f32.mrf.mxu3  ;;  %v547_v59 = vpop.f32.mrf.mxu1  ;;  %v499_v24 = vadd.f32 %v1537_v0, %v498_v58  ;;  %v595_v31 = vadd.f32 %v594_v56, %v546_v23 }
  0xd9   :  { %v548_v32 = vadd.f32 %v547_v59, %v499_v24  ;;  %v1574_v41 = vadd.f32 %v643_v57, %v595_v31  ;;  %v679_v59 = vadd.f32 %v678_v45, %v1564_v51 }
  0xdb   :  { %v680_v54 = vsel %vm668_vm0, %v1574_v41, 0.0 }
  0xde   :  { %v596_v60 = vpop.f32.mrf.mxu2  ;;  %v501_v62 = vpop.f32.mrf.mxu0 }
  0xdf   :  { %v645_v61 = vpop.f32.mrf.mxu3  ;;  %v550_v63 = vpop.f32.mrf.mxu1  ;;  %v502_v21 = vadd.f32 %v1537_v0, %v501_v62  ;;  %v597_v37 = vadd.f32 %v596_v60, %v548_v32 }
  0xe1   :  { %v551_v26 = vadd.f32 %v550_v63, %v502_v21  ;;  %v1580_v46 = vadd.f32 %v645_v61, %v597_v37 }
  0xe3   :  { %v682_v61 = vsel %vm668_vm0, %v1580_v46, 0.0 }
  0xe6   :  { %v599_v1 = vpop.f32.mrf.mxu2  ;;  %v503_v3 = vpop.f32.mrf.mxu0 }
  0xe7   :  { %v648_v2 = vpop.f32.mrf.mxu3  ;;  %v552_v4 = vpop.f32.mrf.mxu1  ;;  %v504_v33 = vadd.f32 %v1537_v0, %v503_v3  ;;  %v600_v38 = vadd.f32 %v599_v1, %v551_v26  ;;  %v681_v1 = vadd.f32 %v680_v54, %v679_v59 }
  0xe9   :  { %v553_v42 = vadd.f32 %v552_v4, %v504_v33  ;;  %v1582_v48 = vadd.f32 %v648_v2, %v600_v38 }
  0xeb   :  { %v684_v2 = vsel %vm668_vm0, %v1582_v48, 0.0 }
  0xee   :  { %v601_v5 = vpop.f32.mrf.mxu2  ;;  %v506_v7 = vpop.f32.mrf.mxu0 }
  0xef   :  { %v650_v6 = vpop.f32.mrf.mxu3  ;;  %v555_v8 = vpop.f32.mrf.mxu1  ;;  %v507_v27 = vadd.f32 %v1537_v0, %v506_v7  ;;  %v602_v47 = vadd.f32 %v601_v5, %v553_v42 }
  0xf1   :  { %v556_v39 = vadd.f32 %v555_v8, %v507_v27  ;;  %v1591_v62 = vadd.f32 %v650_v6, %v602_v47 }
  0xf3   :  { %v686_v51 = vsel %vm668_vm0, %v1591_v62, 0.0 }
  0xf6   :  { %v604_v9 = vpop.f32.mrf.mxu2  ;;  %v508_v12 = vpop.f32.mrf.mxu0 }
  0xf7   :  { %v653_v10 = vpop.f32.mrf.mxu3  ;;  %v557_v13 = vpop.f32.mrf.mxu1  ;;  %v509_v43 = vadd.f32 %v1537_v0, %v508_v12  ;;  %v605_v50 = vadd.f32 %v604_v9, %v556_v39  ;;  %v683_v9 = vadd.f32 %v682_v61, %v681_v1 }
  0xf9   :  { %v558_v55 = vadd.f32 %v557_v13, %v509_v43  ;;  %v1595_v3 = vadd.f32 %v653_v10, %v605_v50  ;;  %v685_v6 = vadd.f32 %v684_v2, %v683_v9 }
  0xfb   :  { %v688_v10 = vsel %vm668_vm0, %v1595_v3, 0.0  ;;  %v687_v22 = vadd.f32 %v686_v51, %v685_v6 }
  0xfd   :  { %v689_v25 = vadd.f32 %v688_v10, %v687_v22 }
  0xfe   :  { %v606_v14 = vpop.f32.mrf.mxu2  ;;  %v511_v18 = vpop.f32.mrf.mxu0 }
  0xff   :  { %v655_v15 = vpop.f32.mrf.mxu3  ;;  %v560_v20 = vpop.f32.mrf.mxu1  ;;  %v512_v44 = vadd.f32 %v1537_v0, %v511_v18  ;;  %v607_v63 = vadd.f32 %v606_v14, %v558_v55 }
 0x101   :  { %v561_v56 = vadd.f32 %v560_v20, %v512_v44  ;;  %v1599_v12 = vadd.f32 %v655_v15, %v607_v63 }
 0x103   :  { %v690_v23 = vsel %vm668_vm0, %v1599_v12, 0.0 }
 0x104   :  { %v691_v31 = vadd.f32 %v690_v23, %v689_v25 }
 0x106   :  { %v609_v28 = vpop.f32.mrf.mxu2  ;;  %v513_v34 = vpop.f32.mrf.mxu0 }
 0x107   :  { %v658_v29 = vpop.f32.mrf.mxu3  ;;  %v562_v35 = vpop.f32.mrf.mxu1  ;;  %v514_v57 = vadd.f32 %v1537_v0, %v513_v34  ;;  %v610_v5 = vadd.f32 %v609_v28, %v561_v56 }
 0x108   :  { %v1212_v28 = vpop.eup %1211 }
 0x109   :  { %v563_v7 = vadd.f32 %v562_v35, %v514_v57  ;;  %v1603_v18 = vadd.f32 %v658_v29, %v610_v5  ;;  %vm711_vm1 = vweird.f32 %v1212_v28 }
 0x10b   :  { %v692_v26 = vsel %vm668_vm0, %v1603_v18, 0.0 }
 0x10c   :  { %v693_v34 = vadd.f32 %v692_v26, %v691_v31 }
 0x10e   :  { %v611_v52 = vpop.f32.mrf.mxu2  ;;  %v516_v58 = vpop.f32.mrf.mxu0 }
 0x10f   :  { %v660_v53 = vpop.f32.mrf.mxu3  ;;  %v517_v60 = vadd.f32 %v1537_v0, %v516_v58  ;;  %v565_v4 = vpop.f32.mrf.mxu1  ;;  %v612_v13 = vadd.f32 %v611_v52, %v563_v7 }
 0x111   :  { %v566_v8 = vadd.f32 %v565_v4, %v517_v60  ;;  %v1607_v24 = vadd.f32 %v660_v53, %v612_v13 }
 0x113   :  { %v694_v32 = vsel %vm668_vm0, %v1607_v24, 0.0 }
 0x114   :  { %v695_v39 = vadd.f32 %v694_v32, %v693_v34 }
 0x116   :  { %v614_v16 = vpop.f32.mrf.mxu2  ;;  %v518_v21 = vpop.f32.mrf.mxu0 }
 0x117   :  { %v663_v14 = vpop.f32.mrf.mxu3  ;;  %v615_v20 = vadd.f32 %v614_v16, %v566_v8  ;;  %v519_v15 = vadd.f32 %v1537_v0, %v518_v21  ;;  %v567_v29 = vpop.f32.mrf.mxu1  ;;  %v707_v0 = vmul.f32 128.0, %v1212_v28 }
 0x119   :  { %v1612_v27 = vadd.f32 %v663_v14, %v615_v20  ;;  %v568_v33 = vadd.f32 %v567_v29, %v519_v15  ;;  %v708_v47 = vsub.f32 1.0, %v707_v0 }
 0x11b   :  { %v696_v37 = vsel %vm668_vm0, %v1612_v27, 0.0  ;;  %v709_v53 = vmul.f32 %v1212_v28, %v708_v47 }
 0x11c   :  { %v697_v44 = vadd.f32 %v696_v37, %v695_v39 }
 0x11d   :  { %v710_v56 = vadd.f32 %v1212_v28, %v709_v53 }
 0x11e   :  { %v616_v35 = vpop.f32.mrf.mxu2 }
 0x11f   :  { %v617_v38 = vadd.f32 %v616_v35, %v568_v33  ;;  %v665_v42 = vpop.f32.mrf.mxu3  ;;  %v1622_v59 = vsel %vm711_vm1, %v1212_v28, %v710_v56 }
 0x121   :  { %v1618_v43 = vadd.f32 %v665_v42, %v617_v38 }
 0x123   :  { %v698_v45 = vsel %vm668_vm0, %v1618_v43, 0.0 }
 0x124   :  { %v699_v50 = vadd.f32 %v698_v45, %v697_v44 }
 0x126   :  { %v700_v52 = vrot.slane %v699_v50, 4 }
 0x128   :  { %v701_v54 = vadd.f32 %v700_v52, %v699_v50 }
 0x12a   :  { %v702_v55 = vrot.slane %v701_v54, 2 }
 0x12c   :  { %v703_v57 = vadd.f32 %v702_v55, %v701_v54 }
 0x12e   :  { %v704_v58 = vrot.slane %v703_v57, 1 }
 0x130   :  { %v705_v60 = vadd.f32 %v704_v58, %v703_v57 }
 0x132   :  { %v713_v61 = vmul.f32 %v1622_v59, %v705_v60 }
 0x134   :  { %v1626_v63 = vsub.f32 %v1541_v11, %v713_v61  ;;  %v1629_v1 = vsub.f32 %v1544_v19, %v713_v61  ;;  %v1632_v2 = vsub.f32 %v1551_v30, %v713_v61  ;;  %v1635_v4 = vsub.f32 %v1556_v40, %v713_v61 }
 0x135   :  { %v1638_v5 = vsub.f32 %v1560_v49, %v713_v61  ;;  %v1647_v19 = vsub.f32 %v1572_v36, %v713_v61  ;;  %v1654_v51 = vsub.f32 %v1574_v41, %v713_v61  ;;  %v1660_v36 = vsub.f32 %v1580_v46, %v713_v61 }
 0x136   :  { %v730_v7 = vmul.f32 %v1626_v63, %v1626_v63  ;;  %v731_v8 = vmul.f32 %v1629_v1, %v1629_v1  ;;  %v732_v11 = vmul.f32 %v1632_v2, %v1632_v2  ;;  %v733_v30 = vmul.f32 %v1635_v4, %v1635_v4 }
 0x137   :  { %v734_v13 = vmul.f32 %v1638_v5, %v1638_v5  ;;  %v735_v14 = vmul.f32 %v1647_v19, %v1647_v19  ;;  %v1666_v20 = vsub.f32 %v1582_v48, %v713_v61  ;;  %v736_v41 = vmul.f32 %v1654_v51, %v1654_v51 }
 0x138   :  { %v746_v40 = vsel %vm668_vm0, %v730_v7, 0.0  ;;  %v747_v49 = vsel %vm668_vm0, %v731_v8, 0.0  ;;  %v749_v6 = vsel %vm668_vm0, %v732_v11, 0.0  ;;  %v751_v17 = vsel %vm668_vm0, %v733_v30, 0.0 }
 0x139   :  { %v748_v9 = vadd.f32 %v747_v49, %v746_v40  ;;  %v753_v21 = vsel %vm668_vm0, %v734_v13, 0.0  ;;  %v1672_v23 = vsub.f32 %v1591_v62, %v713_v61  ;;  %v737_v46 = vmul.f32 %v1660_v36, %v1660_v36 }
 0x13a   :  { %v755_v15 = vsel %vm668_vm0, %v735_v14, 0.0  ;;  %v1678_v26 = vsub.f32 %v1595_v3, %v713_v61  ;;  %v738_v48 = vmul.f32 %v1666_v20, %v1666_v20  ;;  %v757_v28 = vsel %vm668_vm0, %v736_v41, 0.0 }
 0x13b   :  { %v750_v16 = vadd.f32 %v749_v6, %v748_v9  ;;  %v1684_v29 = vsub.f32 %v1599_v12, %v713_v61  ;;  %v739_v62 = vmul.f32 %v1672_v23, %v1672_v23  ;;  %v759_v32 = vsel %vm668_vm0, %v737_v46, 0.0 }
 0x13c   :  { %v1690_v34 = vsub.f32 %v1603_v18, %v713_v61  ;;  %v740_v3 = vmul.f32 %v1678_v26, %v1678_v26  ;;  %v761_v35 = vsel %vm668_vm0, %v738_v48, 0.0  ;;  %v1696_v38 = vsub.f32 %v1607_v24, %v713_v61 }
 0x13d   :  { %v752_v10 = vadd.f32 %v751_v17, %v750_v16  ;;  %v741_v12 = vmul.f32 %v1684_v29, %v1684_v29  ;;  %v763_v0 = vsel %vm668_vm0, %v739_v62, 0.0  ;;  %v1702_v42 = vsub.f32 %v1612_v27, %v713_v61 }
 0x13e   :  { %v742_v18 = vmul.f32 %v1690_v34, %v1690_v34  ;;  %v765_v44 = vsel %vm668_vm0, %v740_v3, 0.0  ;;  %v1708_v47 = vsub.f32 %v1618_v43, %v713_v61  ;;  %v743_v24 = vmul.f32 %v1696_v38, %v1696_v38 }
 0x13f   :  { %v754_v22 = vadd.f32 %v753_v21, %v752_v10  ;;  %v767_v50 = vsel %vm668_vm0, %v741_v12, 0.0  ;;  %v744_v53 = vmul.f32 %v1702_v42, %v1702_v42 }
 0x140   :  { %v769_v27 = vsel %vm668_vm0, %v742_v18, 0.0  ;;  %v745_v55 = vmul.f32 %v1708_v47, %v1708_v47  ;;  %v771_v56 = vsel %vm668_vm0, %v743_v24, 0.0 }
 0x141   :  { %v756_v25 = vadd.f32 %v755_v15, %v754_v22  ;;  %v773_v43 = vsel %vm668_vm0, %v744_v53, 0.0 }
 0x142   :  { %v775_v60 = vsel %vm668_vm0, %v745_v55, 0.0 }
 0x143   :  { %v758_v31 = vadd.f32 %v757_v28, %v756_v25 }
 0x145   :  { %v760_v33 = vadd.f32 %v759_v32, %v758_v31 }
 0x147   :  { %v762_v37 = vadd.f32 %v761_v35, %v760_v33 }
 0x149   :  { %v764_v39 = vadd.f32 %v763_v0, %v762_v37 }
 0x14b   :  { %v766_v45 = vadd.f32 %v765_v44, %v764_v39 }
 0x14d   :  { %v768_v52 = vadd.f32 %v767_v50, %v766_v45 }
 0x14f   :  { %v770_v54 = vadd.f32 %v769_v27, %v768_v52 }
 0x151   :  { %v772_v57 = vadd.f32 %v771_v56, %v770_v54 }
 0x153   :  { %v774_v58 = vadd.f32 %v773_v43, %v772_v57 }
 0x155   :  { %v776_v61 = vadd.f32 %v775_v60, %v774_v58 }
 0x157   :  { %v777_v7 = vrot.slane %v776_v61, 4 }
 0x159   :  { %v778_v8 = vadd.f32 %v777_v7, %v776_v61 }
 0x15b   :  { %v779_v11 = vrot.slane %v778_v8, 2 }
 0x15d   :  { %v780_v30 = vadd.f32 %v779_v11, %v778_v8 }
 0x15f   :  { %v781_v40 = vrot.slane %v780_v30, 1 }
 0x161   :  { %v782_v49 = vadd.f32 %v781_v40, %v780_v30 }
 0x163   :  { %v783_v9 = vmul.f32 %v782_v49, %v1622_v59  ;;  %v1209_v59 = vld [vmem:[%s1811_s3] ss:$0 sm:$0xff] }
 0x165   :  { %v784_v13 = vadd.f32 1e-05, %v783_v9 }
 0x167   :  { %1213 = vrsqrt.f32 %v784_v13  ;;  %vm791_vm3 = vweird.f32 %v784_v13 }
 0x16d   :  { %v1214_v6 = vpop.eup %1213 }
 0x16e   :  { %v786_v16 = vmul.f32 %v1214_v6, %v784_v13  ;;  %vm792_vm2 = vweird.f32 %v1214_v6 }
 0x16f   :  { %vm793_vm4 = vmor %vm791_vm3, %vm792_vm2 }
 0x170   :  { %v787_v14 = vmul.f32 %v1214_v6, %v786_v16 }
 0x172   :  { %v788_v17 = vmul.f32 0.5, %v787_v14 }
 0x174   :  { %v789_v10 = vsub.f32 1.5, %v788_v17 }
 0x176   :  { %v790_v41 = vmul.f32 %v1214_v6, %v789_v10 }
 0x178   :  { %v794_v21 = vsel %vm793_vm4, %v1214_v6, %v790_v41 }
 0x179   :  { %v795_v22 = vmul.f32 %v794_v21, %v1626_v63  ;;  %v796_v46 = vmul.f32 %v794_v21, %v1629_v1  ;;  %v797_v15 = vmul.f32 %v794_v21, %v1632_v2  ;;  %v798_v25 = vmul.f32 %v794_v21, %v1635_v4  ;;  %v1210_v63 = vld [vmem:[%s1812_s4] ss:$0 sm:$0xff] }
 0x17a   :  { %v800_v48 = vmul.f32 %v794_v21, %v1647_v19  ;;  %v801_v28 = vmul.f32 %v794_v21, %v1654_v51  ;;  %v799_v31 = vmul.f32 %v794_v21, %v1638_v5  ;;  %v802_v1 = vmul.f32 %v794_v21, %v1660_v36 }
 0x17b   :  { %v815_v62 = vmul.f32 %v1209_v59, %v795_v22  ;;  %v816_v32 = vmul.f32 %v1209_v59, %v796_v46  ;;  %v817_v33 = vmul.f32 %v1209_v59, %v797_v15  ;;  %v818_v2 = vmul.f32 %v1209_v59, %v798_v25 }
 0x17c   :  { %v803_v3 = vmul.f32 %v794_v21, %v1666_v20  ;;  %v819_v35 = vmul.f32 %v1209_v59, %v799_v31  ;;  %v804_v4 = vmul.f32 %v794_v21, %v1672_v23  ;;  %v805_v19 = vmul.f32 %v794_v21, %v1678_v26 }
 0x17d   :  { %v820_v51 = vmul.f32 %v1209_v59, %v800_v48  ;;  %v821_v37 = vmul.f32 %v1209_v59, %v801_v28  ;;  %v835_v5 = vadd.f32 %v1210_v63, %v815_v62  ;;  %v836_v12 = vadd.f32 %v1210_v63, %v816_v32 }
 0x17e   :  { %v837_v0 = vadd.f32 %v1210_v63, %v817_v33  ;;  %v806_v39 = vmul.f32 %v794_v21, %v1684_v29  ;;  %v822_v18 = vmul.f32 %v1209_v59, %v802_v1  ;;  %v838_v44 = vadd.f32 %v1210_v63, %v818_v2 }
 0x17f   :  { %v807_v45 = vmul.f32 %v794_v21, %v1690_v34  ;;  %v808_v36 = vmul.f32 %v794_v21, %v1696_v38  ;;  %v823_v24 = vmul.f32 %v1209_v59, %v803_v3  ;;  %v839_v20 = vadd.f32 %v1210_v63, %v819_v35 }
 0x180   :  { %v809_v50 = vmul.f32 %v794_v21, %v1702_v42  ;;  %v824_v23 = vmul.f32 %v1209_v59, %v804_v4  ;;  %v825_v52 = vmul.f32 %v1209_v59, %v805_v19  ;;  %v840_v26 = vadd.f32 %v1210_v63, %v820_v51 }
 0x181   :  { %v841_v53 = vadd.f32 %v1210_v63, %v821_v37  ;;  %v851_v27 = vmax.f32 %v835_v5, 0.0  ;;  %v852_v54 = vmax.f32 %v836_v12, 0.0  ;;  %v853_v55 = vmax.f32 %v837_v0, 0.0 }
 0x182   :  { %v810_v56 = vmul.f32 %v794_v21, %v1708_v47  ;;  %v826_v29 = vmul.f32 %v1209_v59, %v806_v39  ;;  %v842_v57 = vadd.f32 %v1210_v63, %v822_v18  ;;  %v854_v43 = vmax.f32 %v838_v44, 0.0 }
 0x183   :  { %v827_v58 = vmul.f32 %v1209_v59, %v807_v45  ;;  %v843_v34 = vadd.f32 %v1210_v63, %v823_v24  ;;  %v855_v60 = vmax.f32 %v839_v20, 0.0  ;;  %867 = vst.msk [vmem:[%s1813_s5] sm:$0xff] %vm668_vm0, %v851_v27  ;;  %v828_v38 = vmul.f32 %v1209_v59, %v808_v36 }
 0x184   :  { %v844_v42 = vadd.f32 %v1210_v63, %v824_v23  ;;  %v856_v61 = vmax.f32 %v840_v26, 0.0  ;;  %868 = vst.msk [vmem:[%s1813_s5 + $0x8] sm:$0xff] %vm668_vm0, %v852_v54  ;;  %v829_v47 = vmul.f32 %v1209_v59, %v809_v50  ;;  %v845_v7 = vadd.f32 %v1210_v63, %v825_v52 }
 0x185   :  { %v857_v8 = vmax.f32 %v841_v53, 0.0  ;;  %869 = vst.msk [vmem:[%s1813_s5 + $0x10] sm:$0xff] %vm668_vm0, %v853_v55  ;;  %v830_v11 = vmul.f32 %v1209_v59, %v810_v56  ;;  %v846_v30 = vadd.f32 %v1210_v63, %v826_v29  ;;  %v858_v40 = vmax.f32 %v842_v57, 0.0 }
 0x186   :  { %870 = vst.msk [vmem:[%s1813_s5 + $0x18] sm:$0xff] %vm668_vm0, %v854_v43  ;;  %v847_v49 = vadd.f32 %v1210_v63, %v827_v58  ;;  %v859_v9 = vmax.f32 %v843_v34, 0.0  ;;  %v848_v13 = vadd.f32 %v1210_v63, %v828_v38  ;;  %v860_v6 = vmax.f32 %v844_v42, 0.0 }
 0x187   :  { %871 = vst.msk [vmem:[%s1813_s5 + $0x20] sm:$0xff] %vm668_vm0, %v855_v60  ;;  %v849_v16 = vadd.f32 %v1210_v63, %v829_v47  ;;  %v861_v14 = vmax.f32 %v845_v7, 0.0  ;;  %v850_v17 = vadd.f32 %v1210_v63, %v830_v11  ;;  %v862_v10 = vmax.f32 %v846_v30, 0.0 }
 0x188   :  { %872 = vst.msk [vmem:[%s1813_s5 + $0x28] sm:$0xff] %vm668_vm0, %v856_v61  ;;  %v863_v41 = vmax.f32 %v847_v49, 0.0  ;;  %v864_v21 = vmax.f32 %v848_v13, 0.0 }
 0x189   :  { %873 = vst.msk [vmem:[%s1813_s5 + $0x30] sm:$0xff] %vm668_vm0, %v857_v8  ;;  %v865_v22 = vmax.f32 %v849_v16, 0.0  ;;  %v866_v46 = vmax.f32 %v850_v17, 0.0 }
 0x18a   :  { %874 = vst.msk [vmem:[%s1813_s5 + $0x38] sm:$0xff] %vm668_vm0, %v858_v40 }
 0x18b   :  { %875 = vst.msk [vmem:[%s1813_s5 + $0x40] sm:$0xff] %vm668_vm0, %v859_v9 }
 0x18c   :  { %876 = vst.msk [vmem:[%s1813_s5 + $0x48] sm:$0xff] %vm668_vm0, %v860_v6 }
 0x18d   :  { %877 = vst.msk [vmem:[%s1813_s5 + $0x50] sm:$0xff] %vm668_vm0, %v861_v14 }
 0x18e   :  { %878 = vst.msk [vmem:[%s1813_s5 + $0x58] sm:$0xff] %vm668_vm0, %v862_v10 }
 0x18f   :  { %879 = vst.msk [vmem:[%s1813_s5 + $0x60] sm:$0xff] %vm668_vm0, %v863_v41 }
 0x190   :  { %880 = vst.msk [vmem:[%s1813_s5 + $0x68] sm:$0xff] %vm668_vm0, %v864_v21 }
 0x191   :  { %881 = vst.msk [vmem:[%s1813_s5 + $0x70] sm:$0xff] %vm668_vm0, %v865_v22 }
 0x192   :  { %882 = vst.msk [vmem:[%s1813_s5 + $0x78] sm:$0xff] %vm668_vm0, %v866_v46 }

// kernel: generator_forward.8
= control target key start
LH: loop header
LB: loop body
LE: loop exit
PB: predicated region body
PF: predicated region fallthrough
CT: control target
= control target key end

     0   :  { %vm1782_vm0 = vcmask 23552   ;;  %s3994_s1 = inlined_call_operand.vmem [shape: bf16[512,3], index: 1, kind: input, shape index: {}]   ;;  %s3995_s2 = inlined_call_operand.vmem [shape: f32[1,3], index: 2, kind: input, shape index: {}]   ;;  %s3996_s0 = inlined_call_operand.vmem [shape: bf16[512,512], index: 0, kind: input, shape index: {}]   ;;  %s3997_s3 = inlined_call_operand.vmem [shape: f32[512,3], index: 3, kind: output, shape index: {}]  }
   0x1   :  { %v2626_v0 = vld [vmem:[%s3994_s1 + $0x38] sm:$0xff]  ;;  %v2625_v4 = vld [vmem:[%s3994_s1 + $0x30] sm:$0xff]  ;;  %v2624_v8 = vld [vmem:[%s3994_s1 + $0x28] sm:$0xff] }
   0x2   :  { %v2634_v1 = vld [vmem:[%s3994_s1 + $0x78] sm:$0xff]  ;;  %1042 = vmatpush.bf16.msra.mxu0 %v2626_v0  ;;  %v2633_v5 = vld [vmem:[%s3994_s1 + $0x70] sm:$0xff]  ;;  %v2632_v9 = vld [vmem:[%s3994_s1 + $0x68] sm:$0xff] }
   0x3   :  { %v2642_v2 = vld [vmem:[%s3994_s1 + $0xb8] sm:$0xff]  ;;  %1211 = vmatpush.bf16.msra.mxu1 %v2634_v1  ;;  %v2641_v6 = vld [vmem:[%s3994_s1 + $0xb0] sm:$0xff]  ;;  %v2640_v10 = vld [vmem:[%s3994_s1 + $0xa8] sm:$0xff] }
   0x4   :  { %v2650_v3 = vld [vmem:[%s3994_s1 + $0xf8] sm:$0xff]  ;;  %1380 = vmatpush.bf16.msra.mxu2 %v2642_v2  ;;  %v2649_v7 = vld [vmem:[%s3994_s1 + $0xf0] sm:$0xff]  ;;  %v2648_v11 = vld [vmem:[%s3994_s1 + $0xe8] sm:$0xff] }
   0x5   :  { %1549 = vmatpush.bf16.msra.mxu3 %v2650_v3  ;;  %v2623_v12 = vld [vmem:[%s3994_s1 + $0x20] sm:$0xff]  ;;  %v2622_v16 = vld [vmem:[%s3994_s1 + $0x18] sm:$0xff]  ;;  %v2621_v20 = vld [vmem:[%s3994_s1 + $0x10] sm:$0xff] }
   0x6   :  { %1043 = vmatpush.bf16.msra.mxu0 %v2625_v4  ;;  %v2631_v13 = vld [vmem:[%s3994_s1 + $0x60] sm:$0xff]  ;;  %v2630_v17 = vld [vmem:[%s3994_s1 + $0x58] sm:$0xff]  ;;  %v2629_v21 = vld [vmem:[%s3994_s1 + $0x50] sm:$0xff] }
   0x7   :  { %1212 = vmatpush.bf16.msra.mxu1 %v2633_v5  ;;  %v2639_v14 = vld [vmem:[%s3994_s1 + $0xa0] sm:$0xff]  ;;  %v2638_v18 = vld [vmem:[%s3994_s1 + $0x98] sm:$0xff]  ;;  %v2637_v22 = vld [vmem:[%s3994_s1 + $0x90] sm:$0xff] }
   0x8   :  { %1381 = vmatpush.bf16.msra.mxu2 %v2641_v6  ;;  %v2647_v15 = vld [vmem:[%s3994_s1 + $0xe0] sm:$0xff]  ;;  %v2646_v19 = vld [vmem:[%s3994_s1 + $0xd8] sm:$0xff]  ;;  %v2645_v23 = vld [vmem:[%s3994_s1 + $0xd0] sm:$0xff] }
   0x9   :  { %1550 = vmatpush.bf16.msra.mxu3 %v2649_v7  ;;  %v2620_v24 = vld [vmem:[%s3994_s1 + $0x8] sm:$0xff]  ;;  %v2619_v28 = vld [vmem:[%s3994_s1] sm:$0xff]  ;;  %v2493_v33 = vld [vmem:[%s3996_s0 + $0xc] sm:$0xf0] }
   0xa   :  { %1044 = vmatpush.bf16.msra.mxu0 %v2624_v8  ;;  %v2628_v25 = vld [vmem:[%s3994_s1 + $0x48] sm:$0xff]  ;;  %v2627_v29 = vld [vmem:[%s3994_s1 + $0x40] sm:$0xff]  ;;  %v1855_v35 = vld [vmem:[%s3996_s0 + $0x10] sm:$0xf0] }
   0xb   :  { %1213 = vmatpush.bf16.msra.mxu1 %v2632_v9  ;;  %v2636_v26 = vld [vmem:[%s3994_s1 + $0x88] sm:$0xff]  ;;  %v2635_v30 = vld [vmem:[%s3994_s1 + $0x80] sm:$0xff]  ;;  %v2494_v37 = vld [vmem:[%s3996_s0 + $0x14] sm:$0xf0] }
   0xc   :  { %1382 = vmatpush.bf16.msra.mxu2 %v2640_v10  ;;  %v2644_v27 = vld [vmem:[%s3994_s1 + $0xc8] sm:$0xff]  ;;  %v2643_v31 = vld [vmem:[%s3994_s1 + $0xc0] sm:$0xff]  ;;  %v1863_v39 = vld [vmem:[%s3996_s0 + $0x18] sm:$0xf0] }
   0xd   :  { %1551 = vmatpush.bf16.msra.mxu3 %v2648_v11  ;;  %v1853_v32 = vld [vmem:[%s3996_s0] sm:$0xf]  ;;  %v2491_v34 = vld [vmem:[%s3996_s0 + $0x4] sm:$0xf]  ;;  %v1861_v36 = vld [vmem:[%s3996_s0 + $0x8] sm:$0xf] }
   0xe   :  { %1045 = vmatpush.bf16.msra.mxu0 %v2623_v12  ;;  %v2492_v38 = vld [vmem:[%s3996_s0 + $0xc] sm:$0xf]  ;;  %v1854_v40 = vor.u32 %v2493_v33, %v1853_v32  ;;  %v1858_v41 = vor.u32 %v2491_v34, %v1855_v35  ;;  %v1862_v42 = vor.u32 %v2494_v37, %v1861_v36  ;;  %v1869_v44 = vld [vmem:[%s3996_s0 + $0x20] sm:$0xf]  ;;  %v2497_v45 = vld [vmem:[%s3996_s0 + $0x2c] sm:$0xf0] }
   0xf   :  { %1214 = vmatpush.bf16.msra.mxu1 %v2631_v13  ;;  %v1866_v43 = vor.u32 %v2492_v38, %v1863_v39  ;;  %v2495_v46 = vld [vmem:[%s3996_s0 + $0x24] sm:$0xf]  ;;  %v1871_v47 = vld [vmem:[%s3996_s0 + $0x30] sm:$0xf0]  ;;  %v1877_v48 = vld [vmem:[%s3996_s0 + $0x28] sm:$0xf]  ;;  %v1870_v52 = vor.u32 %v2497_v45, %v1869_v44 }
  0x10   :  { %1383 = vmatpush.bf16.msra.mxu2 %v2639_v14  ;;  %v2498_v49 = vld [vmem:[%s3996_s0 + $0x34] sm:$0xf0]  ;;  %v2496_v50 = vld [vmem:[%s3996_s0 + $0x2c] sm:$0xf]  ;;  %v1879_v51 = vld [vmem:[%s3996_s0 + $0x38] sm:$0xf0]  ;;  %v1874_v53 = vor.u32 %v2495_v46, %v1871_v47 }
  0x11   :  { %1552 = vmatpush.bf16.msra.mxu3 %v2647_v15  ;;  %v1878_v54 = vor.u32 %v2498_v49, %v1877_v48  ;;  %v1882_v55 = vor.u32 %v2496_v50, %v1879_v51  ;;  %v1885_v56 = vld [vmem:[%s3996_s0 + $0x40] sm:$0xf]  ;;  %v2501_v57 = vld [vmem:[%s3996_s0 + $0x4c] sm:$0xf0]  ;;  %v2499_v58 = vld [vmem:[%s3996_s0 + $0x44] sm:$0xf] }
  0x12   :  { %1046 = vmatpush.bf16.msra.mxu0 %v2622_v16  ;;  %v1887_v59 = vld [vmem:[%s3996_s0 + $0x50] sm:$0xf0]  ;;  %v1893_v60 = vld [vmem:[%s3996_s0 + $0x48] sm:$0xf]  ;;  %v2502_v61 = vld [vmem:[%s3996_s0 + $0x54] sm:$0xf0]  ;;  %v1886_v0 = vor.u32 %v2501_v57, %v1885_v56 }
  0x13   :  { %1215 = vmatpush.bf16.msra.mxu1 %v2630_v17  ;;  %v2500_v62 = vld [vmem:[%s3996_s0 + $0x4c] sm:$0xf]  ;;  %v1895_v63 = vld [vmem:[%s3996_s0 + $0x58] sm:$0xf0]  ;;  %v1890_v1 = vor.u32 %v2499_v58, %v1887_v59  ;;  %v1894_v2 = vor.u32 %v2502_v61, %v1893_v60  ;;  %v1901_v4 = vld [vmem:[%s3996_s0 + $0x60] sm:$0xf] }
  0x14   :  { %1384 = vmatpush.bf16.msra.mxu2 %v2638_v18  ;;  %v1898_v3 = vor.u32 %v2500_v62, %v1895_v63  ;;  %v2505_v5 = vld [vmem:[%s3996_s0 + $0x6c] sm:$0xf0]  ;;  %v2503_v6 = vld [vmem:[%s3996_s0 + $0x64] sm:$0xf]  ;;  %v1903_v7 = vld [vmem:[%s3996_s0 + $0x70] sm:$0xf0] }
  0x15   :  { %1553 = vmatpush.bf16.msra.mxu3 %v2646_v19  ;;  %v1909_v8 = vld [vmem:[%s3996_s0 + $0x68] sm:$0xf]  ;;  %v2506_v9 = vld [vmem:[%s3996_s0 + $0x74] sm:$0xf0]  ;;  %v2504_v10 = vld [vmem:[%s3996_s0 + $0x6c] sm:$0xf]  ;;  %v1902_v12 = vor.u32 %v2505_v5, %v1901_v4  ;;  %v1906_v13 = vor.u32 %v2503_v6, %v1903_v7 }
  0x16   :  { %1047 = vmatpush.bf16.msra.mxu0 %v2621_v20  ;;  %v1911_v11 = vld [vmem:[%s3996_s0 + $0x78] sm:$0xf0]  ;;  %v1910_v14 = vor.u32 %v2506_v9, %v1909_v8  ;;  %v1917_v16 = vld [vmem:[%s3996_s0 + $0x80] sm:$0xf]  ;;  %v2509_v17 = vld [vmem:[%s3996_s0 + $0x8c] sm:$0xf0] }
  0x17   :  { %1216 = vmatpush.bf16.msra.mxu1 %v2629_v21  ;;  %v1914_v15 = vor.u32 %v2504_v10, %v1911_v11  ;;  %v2507_v18 = vld [vmem:[%s3996_s0 + $0x84] sm:$0xf]  ;;  %v1919_v19 = vld [vmem:[%s3996_s0 + $0x90] sm:$0xf0]  ;;  %v1925_v20 = vld [vmem:[%s3996_s0 + $0x88] sm:$0xf] }
  0x18   :  { %1385 = vmatpush.bf16.msra.mxu2 %v2637_v22  ;;  %v2510_v21 = vld [vmem:[%s3996_s0 + $0x94] sm:$0xf0]  ;;  %v2508_v22 = vld [vmem:[%s3996_s0 + $0x8c] sm:$0xf]  ;;  %v1941_v32 = vld [vmem:[%s3996_s0 + $0xa8] sm:$0xf] }
  0x19   :  { %1554 = vmatpush.bf16.msra.mxu3 %v2645_v23  ;;  %v1927_v23 = vld [vmem:[%s3996_s0 + $0x98] sm:$0xf0]  ;;  %v2514_v33 = vld [vmem:[%s3996_s0 + $0xb4] sm:$0xf0]  ;;  %v2512_v34 = vld [vmem:[%s3996_s0 + $0xac] sm:$0xf] }
  0x1a   :  { %1048 = vmatpush.bf16.msra.mxu0 %v2620_v24  ;;  %v1918_v24 = vor.u32 %v2509_v17, %v1917_v16  ;;  %v1943_v35 = vld [vmem:[%s3996_s0 + $0xb8] sm:$0xf0]  ;;  %v1942_v38 = vor.u32 %v2514_v33, %v1941_v32  ;;  %v1957_v44 = vld [vmem:[%s3996_s0 + $0xc8] sm:$0xf]  ;;  %v2518_v45 = vld [vmem:[%s3996_s0 + $0xd4] sm:$0xf0] }
  0x1b   :  { %1217 = vmatpush.bf16.msra.mxu1 %v2628_v25  ;;  %v1922_v25 = vor.u32 %v2507_v18, %v1919_v19  ;;  %v1946_v39 = vor.u32 %v2512_v34, %v1943_v35  ;;  %v2516_v46 = vld [vmem:[%s3996_s0 + $0xcc] sm:$0xf]  ;;  %v1959_v47 = vld [vmem:[%s3996_s0 + $0xd8] sm:$0xf0]  ;;  %v1958_v50 = vor.u32 %v2518_v45, %v1957_v44  ;;  %v1973_v56 = vld [vmem:[%s3996_s0 + $0xe8] sm:$0xf] }
  0x1c   :  { %1386 = vmatpush.bf16.msra.mxu2 %v2636_v26  ;;  %v1926_v26 = vor.u32 %v2510_v21, %v1925_v20  ;;  %v1962_v51 = vor.u32 %v2516_v46, %v1959_v47  ;;  %v2522_v57 = vld [vmem:[%s3996_s0 + $0xf4] sm:$0xf0]  ;;  %v2520_v58 = vld [vmem:[%s3996_s0 + $0xec] sm:$0xf]  ;;  %v1975_v59 = vld [vmem:[%s3996_s0 + $0xf8] sm:$0xf0] }
  0x1d   :  { %1555 = vmatpush.bf16.msra.mxu3 %v2644_v27  ;;  %v1930_v27 = vor.u32 %v2508_v22, %v1927_v23  ;;  %v1974_v62 = vor.u32 %v2522_v57, %v1973_v56  ;;  %v1978_v63 = vor.u32 %v2520_v58, %v1975_v59  ;;  %v1983_v4 = vld [vmem:[%s3996_s0 + $0x110] sm:$0xf0]  ;;  %v1989_v5 = vld [vmem:[%s3996_s0 + $0x108] sm:$0xf]  ;;  %v2526_v6 = vld [vmem:[%s3996_s0 + $0x114] sm:$0xf0] }
  0x1e   :  { %1049 = vmatpush.bf16.msra.mxu0 %v2619_v28  ;;  %v1933_v28 = vld [vmem:[%s3996_s0 + $0xa0] sm:$0xf]  ;;  %v2524_v7 = vld [vmem:[%s3996_s0 + $0x10c] sm:$0xf]  ;;  %v1991_v8 = vld [vmem:[%s3996_s0 + $0x118] sm:$0xf0] }
  0x1f   :  { %1218 = vmatpush.bf16.msra.mxu1 %v2627_v29  ;;  %v2513_v29 = vld [vmem:[%s3996_s0 + $0xac] sm:$0xf0]  ;;  %v2531_v56 = vld [vmem:[%s3996_s0 + $0x144] sm:$0xf]  ;;  %v2015_v57 = vld [vmem:[%s3996_s0 + $0x150] sm:$0xf0] }
  0x20   :  { %1387 = vmatpush.bf16.msra.mxu2 %v2635_v30  ;;  %v2511_v30 = vld [vmem:[%s3996_s0 + $0xa4] sm:$0xf]  ;;  %v1934_v36 = vor.u32 %v2513_v29, %v1933_v28  ;;  %v2005_v28 = vld [vmem:[%s3996_s0 + $0x128] sm:$0xf]  ;;  %v2530_v29 = vld [vmem:[%s3996_s0 + $0x134] sm:$0xf0] }
  0x21   :  { %1556 = vmatpush.bf16.msra.mxu3 %v2643_v31  ;;  %1050 = vmatmul.bf16.vlgmr.msra.gmra.mxu0 %v1854_v40  ;;  %v1935_v31 = vld [vmem:[%s3996_s0 + $0xb0] sm:$0xf0]  ;;  %v1949_v40 = vld [vmem:[%s3996_s0 + $0xc0] sm:$0xf]  ;;  %v2021_v58 = vld [vmem:[%s3996_s0 + $0x148] sm:$0xf] }
  0x22   :  { %1219 = vmatmul.bf16.vlgmr.msra.gmra.mxu1 %v1858_v41  ;;  %v1938_v37 = vor.u32 %v2511_v30, %v1935_v31  ;;  %v2517_v41 = vld [vmem:[%s3996_s0 + $0xcc] sm:$0xf0]  ;;  %v2528_v30 = vld [vmem:[%s3996_s0 + $0x12c] sm:$0xf]  ;;  %v2007_v31 = vld [vmem:[%s3996_s0 + $0x138] sm:$0xf0] }
  0x23   :  { %1388 = vmatmul.bf16.vlgmr.msra.gmra.mxu2 %v1862_v42  ;;  %v2515_v42 = vld [vmem:[%s3996_s0 + $0xc4] sm:$0xf]  ;;  %v1950_v48 = vor.u32 %v2517_v41, %v1949_v40  ;;  %v2006_v40 = vor.u32 %v2530_v29, %v2005_v28  ;;  %v2010_v41 = vor.u32 %v2528_v30, %v2007_v31  ;;  %v2534_v59 = vld [vmem:[%s3996_s0 + $0x154] sm:$0xf0]  ;;  %v2039_v28 = vld [vmem:[%s3996_s0 + $0x178] sm:$0xf0] }
  0x24   :  { %1557 = vmatmul.bf16.vlgmr.msra.gmra.mxu3 %v1866_v43  ;;  %v1951_v43 = vld [vmem:[%s3996_s0 + $0xd0] sm:$0xf0] }
  0x25   :  { %v1954_v49 = vor.u32 %v2515_v42, %v1951_v43 }
  0x31   :  { %1055 = vmatmul.bf16.gmra.mxu0 %v1870_v52  ;;  %v1965_v52 = vld [vmem:[%s3996_s0 + $0xe0] sm:$0xf] }
  0x32   :  { %1224 = vmatmul.bf16.gmra.mxu1 %v1874_v53  ;;  %v2521_v53 = vld [vmem:[%s3996_s0 + $0xec] sm:$0xf0] }
  0x33   :  { %1393 = vmatmul.bf16.gmra.mxu2 %v1878_v54  ;;  %v2519_v54 = vld [vmem:[%s3996_s0 + $0xe4] sm:$0xf]  ;;  %v1966_v60 = vor.u32 %v2521_v53, %v1965_v52 }
  0x34   :  { %1562 = vmatmul.bf16.gmra.mxu3 %v1882_v55  ;;  %v1967_v55 = vld [vmem:[%s3996_s0 + $0xf0] sm:$0xf0] }
  0x35   :  { %v1970_v61 = vor.u32 %v2519_v54, %v1967_v55  ;;  %v2013_v54 = vld [vmem:[%s3996_s0 + $0x140] sm:$0xf]  ;;  %v2533_v55 = vld [vmem:[%s3996_s0 + $0x14c] sm:$0xf0] }
  0x41   :  { %1060 = vmatmul.bf16.gmra.mxu0 %v1886_v0  ;;  %v3093_v0 = vld [vmem:[%s3995_s2] ss:$0 sm:$0xff] }
  0x42   :  { %1229 = vmatmul.bf16.gmra.mxu1 %v1890_v1  ;;  %v1981_v1 = vld [vmem:[%s3996_s0 + $0x100] sm:$0xf] }
  0x43   :  { %1398 = vmatmul.bf16.gmra.mxu2 %v1894_v2  ;;  %v2525_v2 = vld [vmem:[%s3996_s0 + $0x10c] sm:$0xf0] }
  0x44   :  { %1567 = vmatmul.bf16.gmra.mxu3 %v1898_v3  ;;  %v2523_v3 = vld [vmem:[%s3996_s0 + $0x104] sm:$0xf]  ;;  %v1982_v9 = vor.u32 %v2525_v2, %v1981_v1  ;;  %v2014_v2 = vor.u32 %v2533_v55, %v2013_v54  ;;  %v2047_v54 = vld [vmem:[%s3996_s0 + $0x190] sm:$0xf0]  ;;  %v2053_v55 = vld [vmem:[%s3996_s0 + $0x188] sm:$0xf] }
  0x45   :  { %v1986_v10 = vor.u32 %v2523_v3, %v1983_v4  ;;  %v2018_v3 = vor.u32 %v2531_v56, %v2015_v57  ;;  %v2542_v56 = vld [vmem:[%s3996_s0 + $0x194] sm:$0xf0]  ;;  %v2540_v57 = vld [vmem:[%s3996_s0 + $0x18c] sm:$0xf] }
  0x51   :  { %1065 = vmatmul.bf16.gmra.mxu0 %v1902_v12 }
  0x52   :  { %1234 = vmatmul.bf16.gmra.mxu1 %v1906_v13  ;;  %v1990_v13 = vor.u32 %v2526_v6, %v1989_v5 }
  0x53   :  { %1403 = vmatmul.bf16.gmra.mxu2 %v1910_v14  ;;  %v1994_v14 = vor.u32 %v2524_v7, %v1991_v8  ;;  %v2022_v7 = vor.u32 %v2534_v59, %v2021_v58  ;;  %v2055_v58 = vld [vmem:[%s3996_s0 + $0x198] sm:$0xf0] }
  0x54   :  { %1572 = vmatmul.bf16.gmra.mxu3 %v1914_v15 }
  0x61   :  { %1070 = vmatmul.bf16.gmra.mxu0 %v1918_v24  ;;  %v1997_v24 = vld [vmem:[%s3996_s0 + $0x120] sm:$0xf] }
  0x62   :  { %1239 = vmatmul.bf16.gmra.mxu1 %v1922_v25  ;;  %v2529_v25 = vld [vmem:[%s3996_s0 + $0x12c] sm:$0xf0] }
  0x63   :  { %1408 = vmatmul.bf16.gmra.mxu2 %v1926_v26  ;;  %v2527_v26 = vld [vmem:[%s3996_s0 + $0x124] sm:$0xf]  ;;  %v1998_v35 = vor.u32 %v2529_v25, %v1997_v24  ;;  %v2031_v24 = vld [vmem:[%s3996_s0 + $0x170] sm:$0xf0]  ;;  %v2037_v25 = vld [vmem:[%s3996_s0 + $0x168] sm:$0xf] }
  0x64   :  { %1577 = vmatmul.bf16.gmra.mxu3 %v1930_v27  ;;  %v1999_v27 = vld [vmem:[%s3996_s0 + $0x130] sm:$0xf0] }
  0x71   :  { %1075 = vmatmul.bf16.gmra.mxu0 %v1934_v36  ;;  %v2002_v36 = vor.u32 %v2527_v26, %v1999_v27  ;;  %v2538_v26 = vld [vmem:[%s3996_s0 + $0x174] sm:$0xf0]  ;;  %v2536_v27 = vld [vmem:[%s3996_s0 + $0x16c] sm:$0xf] }
  0x72   :  { %1244 = vmatmul.bf16.gmra.mxu1 %v1938_v37 }
  0x73   :  { %1413 = vmatmul.bf16.gmra.mxu2 %v1942_v38 }
  0x74   :  { %1582 = vmatmul.bf16.gmra.mxu3 %v1946_v39 }
  0x81   :  { %1080 = vmatmul.bf16.gmra.mxu0 %v1950_v48 }
  0x82   :  { %1249 = vmatmul.bf16.gmra.mxu1 %v1954_v49 }
  0x83   :  { %1418 = vmatmul.bf16.gmra.mxu2 %v1958_v50 }
  0x84   :  { %1587 = vmatmul.bf16.gmra.mxu3 %v1962_v51 }
  0x91   :  { %1085 = vmatmul.bf16.gmra.mxu0 %v1966_v60  ;;  %v2532_v60 = vld [vmem:[%s3996_s0 + $0x14c] sm:$0xf] }
  0x92   :  { %1254 = vmatmul.bf16.gmra.mxu1 %v1970_v61  ;;  %v2023_v61 = vld [vmem:[%s3996_s0 + $0x158] sm:$0xf0] }
  0x93   :  { %1423 = vmatmul.bf16.gmra.mxu2 %v1974_v62  ;;  %v2026_v8 = vor.u32 %v2532_v60, %v2023_v61 }
  0x94   :  { %1592 = vmatmul.bf16.gmra.mxu3 %v1978_v63 }
  0x9e   :  { %v1051_v11 = vpop.f32.mrf.mxu0 }
  0x9f   :  { %v1220_v12 = vpop.f32.mrf.mxu1  ;;  %v1052_v15 = vadd.f32 %v3093_v0, %v1051_v11 }
  0xa1   :  { %1090 = vmatmul.bf16.gmra.mxu0 %v1982_v9  ;;  %v1221_v16 = vadd.f32 %v1220_v12, %v1052_v15 }
  0xa2   :  { %1259 = vmatmul.bf16.gmra.mxu1 %v1986_v10 }
  0xa3   :  { %1428 = vmatmul.bf16.gmra.mxu2 %v1990_v13 }
  0xa4   :  { %1597 = vmatmul.bf16.gmra.mxu3 %v1994_v14 }
  0xa6   :  { %v1389_v17 = vpop.f32.mrf.mxu2  ;;  %v1053_v20 = vpop.f32.mrf.mxu0 }
  0xa7   :  { %v1558_v18 = vpop.f32.mrf.mxu3  ;;  %v1390_v19 = vadd.f32 %v1389_v17, %v1221_v16  ;;  %v1222_v21 = vpop.f32.mrf.mxu1  ;;  %v1054_v23 = vadd.f32 %v3093_v0, %v1053_v20 }
  0xa9   :  { %v1559_v22 = vadd.f32 %v1558_v18, %v1390_v19  ;;  %v1223_v32 = vadd.f32 %v1222_v21, %v1054_v23  ;;  %v2029_v21 = vld [vmem:[%s3996_s0 + $0x160] sm:$0xf]  ;;  %v2535_v23 = vld [vmem:[%s3996_s0 + $0x164] sm:$0xf] }
  0xab   :  { %2652 = vtanh.f32 %v1559_v22  ;;  %v2537_v22 = vld [vmem:[%s3996_s0 + $0x16c] sm:$0xf0] }
  0xae   :  { %v1391_v33 = vpop.f32.mrf.mxu2  ;;  %v1056_v38 = vpop.f32.mrf.mxu0 }
  0xaf   :  { %v1560_v34 = vpop.f32.mrf.mxu3  ;;  %v1392_v37 = vadd.f32 %v1391_v33, %v1223_v32  ;;  %v1225_v39 = vpop.f32.mrf.mxu1  ;;  %v1057_v42 = vadd.f32 %v3093_v0, %v1056_v38  ;;  %v2030_v32 = vor.u32 %v2537_v22, %v2029_v21  ;;  %v2034_v33 = vor.u32 %v2535_v23, %v2031_v24  ;;  %v2063_v21 = vld [vmem:[%s3996_s0 + $0x1b0] sm:$0xf0]  ;;  %v2069_v22 = vld [vmem:[%s3996_s0 + $0x1a8] sm:$0xf]  ;;  %v2546_v23 = vld [vmem:[%s3996_s0 + $0x1b4] sm:$0xf0] }
  0xb0   :  { %v2042_v38 = vor.u32 %v2536_v27, %v2039_v28  ;;  %v2544_v24 = vld [vmem:[%s3996_s0 + $0x1ac] sm:$0xf] }
  0xb1   :  { %v2653_v43 = vpop.eup %2652  ;;  %v1561_v44 = vadd.f32 %v1560_v34, %v1392_v37  ;;  %1095 = vmatmul.bf16.gmra.mxu0 %v1998_v35  ;;  %v1226_v45 = vadd.f32 %v1225_v39, %v1057_v42  ;;  %v2038_v37 = vor.u32 %v2538_v26, %v2037_v25  ;;  %v2071_v25 = vld [vmem:[%s3996_s0 + $0x1b8] sm:$0xf0] }
  0xb2   :  { %1783 = vst.msk [vmem:[%s3997_s3] sm:$0xff] %vm1782_vm0, %v2653_v43  ;;  %1264 = vmatmul.bf16.gmra.mxu1 %v2002_v36 }
  0xb3   :  { %2654 = vtanh.f32 %v1561_v44  ;;  %1433 = vmatmul.bf16.gmra.mxu2 %v2006_v40 }
  0xb4   :  { %1602 = vmatmul.bf16.gmra.mxu3 %v2010_v41 }
  0xb6   :  { %v1394_v46 = vpop.f32.mrf.mxu2  ;;  %v1058_v49 = vpop.f32.mrf.mxu0 }
  0xb7   :  { %v1563_v47 = vpop.f32.mrf.mxu3  ;;  %v1395_v48 = vadd.f32 %v1394_v46, %v1226_v45  ;;  %v1227_v50 = vpop.f32.mrf.mxu1  ;;  %v1059_v53 = vadd.f32 %v3093_v0, %v1058_v49 }
  0xb9   :  { %v2655_v51 = vpop.eup %2654  ;;  %v1564_v52 = vadd.f32 %v1563_v47, %v1395_v48  ;;  %v1228_v62 = vadd.f32 %v1227_v50, %v1059_v53  ;;  %v2539_v53 = vld [vmem:[%s3996_s0 + $0x184] sm:$0xf] }
  0xba   :  { %1784 = vst.msk [vmem:[%s3997_s3 + $0x8] sm:$0xff] %vm1782_vm0, %v2655_v51  ;;  %v2045_v51 = vld [vmem:[%s3996_s0 + $0x180] sm:$0xf] }
  0xbb   :  { %2656 = vtanh.f32 %v1564_v52  ;;  %v2541_v52 = vld [vmem:[%s3996_s0 + $0x18c] sm:$0xf0] }
  0xbe   :  { %v1396_v63 = vpop.f32.mrf.mxu2  ;;  %v1061_v5 = vpop.f32.mrf.mxu0 }
  0xbf   :  { %v1565_v1 = vpop.f32.mrf.mxu3  ;;  %v1397_v4 = vadd.f32 %v1396_v63, %v1228_v62  ;;  %v1230_v6 = vpop.f32.mrf.mxu1  ;;  %v1062_v9 = vadd.f32 %v3093_v0, %v1061_v5  ;;  %v2046_v62 = vor.u32 %v2541_v52, %v2045_v51  ;;  %v2050_v63 = vor.u32 %v2539_v53, %v2047_v54  ;;  %v2079_v51 = vld [vmem:[%s3996_s0 + $0x1d0] sm:$0xf0]  ;;  %v2085_v52 = vld [vmem:[%s3996_s0 + $0x1c8] sm:$0xf]  ;;  %v2550_v53 = vld [vmem:[%s3996_s0 + $0x1d4] sm:$0xf0] }
  0xc0   :  { %v2058_v5 = vor.u32 %v2540_v57, %v2055_v58  ;;  %v2548_v54 = vld [vmem:[%s3996_s0 + $0x1cc] sm:$0xf] }
  0xc1   :  { %v2657_v10 = vpop.eup %2656  ;;  %v1566_v11 = vadd.f32 %v1565_v1, %v1397_v4  ;;  %1100 = vmatmul.bf16.gmra.mxu0 %v2014_v2  ;;  %v1231_v12 = vadd.f32 %v1230_v6, %v1062_v9  ;;  %v2054_v4 = vor.u32 %v2542_v56, %v2053_v55  ;;  %v2087_v55 = vld [vmem:[%s3996_s0 + $0x1d8] sm:$0xf0] }
  0xc2   :  { %1785 = vst.msk [vmem:[%s3997_s3 + $0x10] sm:$0xff] %vm1782_vm0, %v2657_v10  ;;  %1269 = vmatmul.bf16.gmra.mxu1 %v2018_v3 }
  0xc3   :  { %2658 = vtanh.f32 %v1566_v11  ;;  %1438 = vmatmul.bf16.gmra.mxu2 %v2022_v7 }
  0xc4   :  { %1607 = vmatmul.bf16.gmra.mxu3 %v2026_v8 }
  0xc6   :  { %v1399_v13 = vpop.f32.mrf.mxu2  ;;  %v1063_v16 = vpop.f32.mrf.mxu0 }
  0xc7   :  { %v1568_v14 = vpop.f32.mrf.mxu3  ;;  %v1400_v15 = vadd.f32 %v1399_v13, %v1231_v12  ;;  %v1232_v17 = vpop.f32.mrf.mxu1  ;;  %v1064_v20 = vadd.f32 %v3093_v0, %v1063_v16 }
  0xc9   :  { %v2659_v18 = vpop.eup %2658  ;;  %v1569_v19 = vadd.f32 %v1568_v14, %v1400_v15  ;;  %v1233_v29 = vadd.f32 %v1232_v17, %v1064_v20  ;;  %v2543_v20 = vld [vmem:[%s3996_s0 + $0x1a4] sm:$0xf] }
  0xca   :  { %1786 = vst.msk [vmem:[%s3997_s3 + $0x18] sm:$0xff] %vm1782_vm0, %v2659_v18  ;;  %v2061_v18 = vld [vmem:[%s3996_s0 + $0x1a0] sm:$0xf] }
  0xcb   :  { %2660 = vtanh.f32 %v1569_v19  ;;  %v2545_v19 = vld [vmem:[%s3996_s0 + $0x1ac] sm:$0xf0] }
  0xce   :  { %v1401_v30 = vpop.f32.mrf.mxu2  ;;  %v1066_v35 = vpop.f32.mrf.mxu0 }
  0xcf   :  { %v1570_v31 = vpop.f32.mrf.mxu3  ;;  %v1402_v34 = vadd.f32 %v1401_v30, %v1233_v29  ;;  %v1235_v36 = vpop.f32.mrf.mxu1  ;;  %v1067_v39 = vadd.f32 %v3093_v0, %v1066_v35  ;;  %v2062_v29 = vor.u32 %v2545_v19, %v2061_v18  ;;  %v2066_v30 = vor.u32 %v2543_v20, %v2063_v21  ;;  %v2095_v18 = vld [vmem:[%s3996_s0 + $0x1f0] sm:$0xf0]  ;;  %v2101_v19 = vld [vmem:[%s3996_s0 + $0x1e8] sm:$0xf]  ;;  %v2554_v20 = vld [vmem:[%s3996_s0 + $0x1f4] sm:$0xf0] }
  0xd0   :  { %v2074_v35 = vor.u32 %v2544_v24, %v2071_v25  ;;  %v2552_v21 = vld [vmem:[%s3996_s0 + $0x1ec] sm:$0xf] }
  0xd1   :  { %v2661_v40 = vpop.eup %2660  ;;  %v1571_v41 = vadd.f32 %v1570_v31, %v1402_v34  ;;  %1105 = vmatmul.bf16.gmra.mxu0 %v2030_v32  ;;  %v1236_v42 = vadd.f32 %v1235_v36, %v1067_v39  ;;  %v2070_v34 = vor.u32 %v2546_v23, %v2069_v22  ;;  %v2103_v22 = vld [vmem:[%s3996_s0 + $0x1f8] sm:$0xf0] }
  0xd2   :  { %1787 = vst.msk [vmem:[%s3997_s3 + $0x20] sm:$0xff] %vm1782_vm0, %v2661_v40  ;;  %1274 = vmatmul.bf16.gmra.mxu1 %v2034_v33 }
  0xd3   :  { %2662 = vtanh.f32 %v1571_v41  ;;  %1443 = vmatmul.bf16.gmra.mxu2 %v2038_v37 }
  0xd4   :  { %1612 = vmatmul.bf16.gmra.mxu3 %v2042_v38 }
  0xd6   :  { %v1404_v43 = vpop.f32.mrf.mxu2  ;;  %v1068_v46 = vpop.f32.mrf.mxu0 }
  0xd7   :  { %v1573_v44 = vpop.f32.mrf.mxu3  ;;  %v1405_v45 = vadd.f32 %v1404_v43, %v1236_v42  ;;  %v1237_v47 = vpop.f32.mrf.mxu1  ;;  %v1069_v50 = vadd.f32 %v3093_v0, %v1068_v46 }
  0xd9   :  { %v2663_v48 = vpop.eup %2662  ;;  %v1574_v49 = vadd.f32 %v1573_v44, %v1405_v45  ;;  %v1238_v59 = vadd.f32 %v1237_v47, %v1069_v50  ;;  %v2547_v50 = vld [vmem:[%s3996_s0 + $0x1c4] sm:$0xf] }
  0xda   :  { %1788 = vst.msk [vmem:[%s3997_s3 + $0x28] sm:$0xff] %vm1782_vm0, %v2663_v48  ;;  %v2077_v48 = vld [vmem:[%s3996_s0 + $0x1c0] sm:$0xf] }
  0xdb   :  { %2664 = vtanh.f32 %v1574_v49  ;;  %v2549_v49 = vld [vmem:[%s3996_s0 + $0x1cc] sm:$0xf0] }
  0xde   :  { %v1406_v60 = vpop.f32.mrf.mxu2  ;;  %v1071_v2 = vpop.f32.mrf.mxu0 }
  0xdf   :  { %v1575_v61 = vpop.f32.mrf.mxu3  ;;  %v1407_v1 = vadd.f32 %v1406_v60, %v1238_v59  ;;  %v1240_v3 = vpop.f32.mrf.mxu1  ;;  %v1072_v6 = vadd.f32 %v3093_v0, %v1071_v2  ;;  %v2078_v59 = vor.u32 %v2549_v49, %v2077_v48  ;;  %v2082_v60 = vor.u32 %v2547_v50, %v2079_v51  ;;  %v2111_v48 = vld [vmem:[%s3996_s0 + $0x210] sm:$0xf0]  ;;  %v2117_v49 = vld [vmem:[%s3996_s0 + $0x208] sm:$0xf]  ;;  %v2558_v50 = vld [vmem:[%s3996_s0 + $0x214] sm:$0xf0] }
  0xe0   :  { %v2090_v2 = vor.u32 %v2548_v54, %v2087_v55  ;;  %v2556_v51 = vld [vmem:[%s3996_s0 + $0x20c] sm:$0xf] }
  0xe1   :  { %v2665_v7 = vpop.eup %2664  ;;  %v1576_v8 = vadd.f32 %v1575_v61, %v1407_v1  ;;  %1110 = vmatmul.bf16.gmra.mxu0 %v2046_v62  ;;  %v1241_v9 = vadd.f32 %v1240_v3, %v1072_v6  ;;  %v2086_v1 = vor.u32 %v2550_v53, %v2085_v52  ;;  %v2119_v52 = vld [vmem:[%s3996_s0 + $0x218] sm:$0xf0] }
  0xe2   :  { %1789 = vst.msk [vmem:[%s3997_s3 + $0x30] sm:$0xff] %vm1782_vm0, %v2665_v7  ;;  %1279 = vmatmul.bf16.gmra.mxu1 %v2050_v63 }
  0xe3   :  { %2666 = vtanh.f32 %v1576_v8  ;;  %1448 = vmatmul.bf16.gmra.mxu2 %v2054_v4 }
  0xe4   :  { %1617 = vmatmul.bf16.gmra.mxu3 %v2058_v5 }
  0xe6   :  { %v1409_v10 = vpop.f32.mrf.mxu2  ;;  %v1073_v13 = vpop.f32.mrf.mxu0 }
  0xe7   :  { %v1578_v11 = vpop.f32.mrf.mxu3  ;;  %v1410_v12 = vadd.f32 %v1409_v10, %v1241_v9  ;;  %v1242_v14 = vpop.f32.mrf.mxu1  ;;  %v1074_v17 = vadd.f32 %v3093_v0, %v1073_v13 }
  0xe9   :  { %v2667_v15 = vpop.eup %2666  ;;  %v1579_v16 = vadd.f32 %v1578_v11, %v1410_v12  ;;  %v1243_v26 = vadd.f32 %v1242_v14, %v1074_v17  ;;  %v2551_v17 = vld [vmem:[%s3996_s0 + $0x1e4] sm:$0xf] }
  0xea   :  { %1790 = vst.msk [vmem:[%s3997_s3 + $0x38] sm:$0xff] %vm1782_vm0, %v2667_v15  ;;  %v2093_v15 = vld [vmem:[%s3996_s0 + $0x1e0] sm:$0xf] }
  0xeb   :  { %2668 = vtanh.f32 %v1579_v16  ;;  %v2553_v16 = vld [vmem:[%s3996_s0 + $0x1ec] sm:$0xf0] }
  0xee   :  { %v1411_v27 = vpop.f32.mrf.mxu2  ;;  %v1076_v32 = vpop.f32.mrf.mxu0 }
  0xef   :  { %v1580_v28 = vpop.f32.mrf.mxu3  ;;  %v1412_v31 = vadd.f32 %v1411_v27, %v1243_v26  ;;  %v1245_v33 = vpop.f32.mrf.mxu1  ;;  %v1077_v36 = vadd.f32 %v3093_v0, %v1076_v32  ;;  %v2094_v26 = vor.u32 %v2553_v16, %v2093_v15  ;;  %v2098_v27 = vor.u32 %v2551_v17, %v2095_v18  ;;  %v2127_v15 = vld [vmem:[%s3996_s0 + $0x230] sm:$0xf0]  ;;  %v2133_v16 = vld [vmem:[%s3996_s0 + $0x228] sm:$0xf]  ;;  %v2562_v17 = vld [vmem:[%s3996_s0 + $0x234] sm:$0xf0] }
  0xf0   :  { %v2106_v32 = vor.u32 %v2552_v21, %v2103_v22  ;;  %v2560_v18 = vld [vmem:[%s3996_s0 + $0x22c] sm:$0xf] }
  0xf1   :  { %v2669_v37 = vpop.eup %2668  ;;  %v1581_v38 = vadd.f32 %v1580_v28, %v1412_v31  ;;  %1115 = vmatmul.bf16.gmra.mxu0 %v2062_v29  ;;  %v1246_v39 = vadd.f32 %v1245_v33, %v1077_v36  ;;  %v2102_v31 = vor.u32 %v2554_v20, %v2101_v19  ;;  %v2135_v19 = vld [vmem:[%s3996_s0 + $0x238] sm:$0xf0] }
  0xf2   :  { %1791 = vst.msk [vmem:[%s3997_s3 + $0x40] sm:$0xff] %vm1782_vm0, %v2669_v37  ;;  %1284 = vmatmul.bf16.gmra.mxu1 %v2066_v30 }
  0xf3   :  { %2670 = vtanh.f32 %v1581_v38  ;;  %1453 = vmatmul.bf16.gmra.mxu2 %v2070_v34 }
  0xf4   :  { %1622 = vmatmul.bf16.gmra.mxu3 %v2074_v35 }
  0xf6   :  { %v1414_v40 = vpop.f32.mrf.mxu2  ;;  %v1078_v43 = vpop.f32.mrf.mxu0 }
  0xf7   :  { %v1583_v41 = vpop.f32.mrf.mxu3  ;;  %v1415_v42 = vadd.f32 %v1414_v40, %v1246_v39  ;;  %v1247_v44 = vpop.f32.mrf.mxu1  ;;  %v1079_v47 = vadd.f32 %v3093_v0, %v1078_v43 }
  0xf9   :  { %v2671_v45 = vpop.eup %2670  ;;  %v1584_v46 = vadd.f32 %v1583_v41, %v1415_v42  ;;  %v1248_v56 = vadd.f32 %v1247_v44, %v1079_v47  ;;  %v2555_v47 = vld [vmem:[%s3996_s0 + $0x204] sm:$0xf] }
  0xfa   :  { %1792 = vst.msk [vmem:[%s3997_s3 + $0x48] sm:$0xff] %vm1782_vm0, %v2671_v45  ;;  %v2109_v45 = vld [vmem:[%s3996_s0 + $0x200] sm:$0xf] }
  0xfb   :  { %2672 = vtanh.f32 %v1584_v46  ;;  %v2557_v46 = vld [vmem:[%s3996_s0 + $0x20c] sm:$0xf0] }
  0xfe   :  { %v1416_v57 = vpop.f32.mrf.mxu2  ;;  %v1081_v62 = vpop.f32.mrf.mxu0 }
  0xff   :  { %v1585_v58 = vpop.f32.mrf.mxu3  ;;  %v1417_v61 = vadd.f32 %v1416_v57, %v1248_v56  ;;  %v1250_v63 = vpop.f32.mrf.mxu1  ;;  %v1082_v3 = vadd.f32 %v3093_v0, %v1081_v62  ;;  %v2110_v56 = vor.u32 %v2557_v46, %v2109_v45  ;;  %v2114_v57 = vor.u32 %v2555_v47, %v2111_v48  ;;  %v2143_v45 = vld [vmem:[%s3996_s0 + $0x250] sm:$0xf0]  ;;  %v2149_v46 = vld [vmem:[%s3996_s0 + $0x248] sm:$0xf]  ;;  %v2566_v47 = vld [vmem:[%s3996_s0 + $0x254] sm:$0xf0] }
 0x100   :  { %v2122_v62 = vor.u32 %v2556_v51, %v2119_v52  ;;  %v2564_v48 = vld [vmem:[%s3996_s0 + $0x24c] sm:$0xf] }
 0x101   :  { %v2673_v4 = vpop.eup %2672  ;;  %v1586_v5 = vadd.f32 %v1585_v58, %v1417_v61  ;;  %1120 = vmatmul.bf16.gmra.mxu0 %v2078_v59  ;;  %v1251_v6 = vadd.f32 %v1250_v63, %v1082_v3  ;;  %v2118_v61 = vor.u32 %v2558_v50, %v2117_v49  ;;  %v2151_v49 = vld [vmem:[%s3996_s0 + $0x258] sm:$0xf0] }
 0x102   :  { %1793 = vst.msk [vmem:[%s3997_s3 + $0x50] sm:$0xff] %vm1782_vm0, %v2673_v4  ;;  %1289 = vmatmul.bf16.gmra.mxu1 %v2082_v60 }
 0x103   :  { %2674 = vtanh.f32 %v1586_v5  ;;  %1458 = vmatmul.bf16.gmra.mxu2 %v2086_v1 }
 0x104   :  { %1627 = vmatmul.bf16.gmra.mxu3 %v2090_v2 }
 0x106   :  { %v1419_v7 = vpop.f32.mrf.mxu2  ;;  %v1083_v10 = vpop.f32.mrf.mxu0 }
 0x107   :  { %v1588_v8 = vpop.f32.mrf.mxu3  ;;  %v1420_v9 = vadd.f32 %v1419_v7, %v1251_v6  ;;  %v1252_v11 = vpop.f32.mrf.mxu1  ;;  %v1084_v14 = vadd.f32 %v3093_v0, %v1083_v10 }
 0x109   :  { %v2675_v12 = vpop.eup %2674  ;;  %v1589_v13 = vadd.f32 %v1588_v8, %v1420_v9  ;;  %v1253_v23 = vadd.f32 %v1252_v11, %v1084_v14  ;;  %v2559_v14 = vld [vmem:[%s3996_s0 + $0x224] sm:$0xf] }
 0x10a   :  { %1794 = vst.msk [vmem:[%s3997_s3 + $0x58] sm:$0xff] %vm1782_vm0, %v2675_v12  ;;  %v2125_v12 = vld [vmem:[%s3996_s0 + $0x220] sm:$0xf] }
 0x10b   :  { %2676 = vtanh.f32 %v1589_v13  ;;  %v2561_v13 = vld [vmem:[%s3996_s0 + $0x22c] sm:$0xf0] }
 0x10e   :  { %v1421_v24 = vpop.f32.mrf.mxu2  ;;  %v1086_v29 = vpop.f32.mrf.mxu0 }
 0x10f   :  { %v1590_v25 = vpop.f32.mrf.mxu3  ;;  %v1422_v28 = vadd.f32 %v1421_v24, %v1253_v23  ;;  %v1255_v30 = vpop.f32.mrf.mxu1  ;;  %v1087_v33 = vadd.f32 %v3093_v0, %v1086_v29  ;;  %v2126_v23 = vor.u32 %v2561_v13, %v2125_v12  ;;  %v2130_v24 = vor.u32 %v2559_v14, %v2127_v15  ;;  %v2159_v12 = vld [vmem:[%s3996_s0 + $0x270] sm:$0xf0]  ;;  %v2165_v13 = vld [vmem:[%s3996_s0 + $0x268] sm:$0xf]  ;;  %v2570_v14 = vld [vmem:[%s3996_s0 + $0x274] sm:$0xf0] }
 0x110   :  { %v2138_v29 = vor.u32 %v2560_v18, %v2135_v19  ;;  %v2568_v15 = vld [vmem:[%s3996_s0 + $0x26c] sm:$0xf] }
 0x111   :  { %v2677_v34 = vpop.eup %2676  ;;  %v1591_v35 = vadd.f32 %v1590_v25, %v1422_v28  ;;  %1125 = vmatmul.bf16.gmra.mxu0 %v2094_v26  ;;  %v1256_v36 = vadd.f32 %v1255_v30, %v1087_v33  ;;  %v2134_v28 = vor.u32 %v2562_v17, %v2133_v16  ;;  %v2167_v16 = vld [vmem:[%s3996_s0 + $0x278] sm:$0xf0] }
 0x112   :  { %1795 = vst.msk [vmem:[%s3997_s3 + $0x60] sm:$0xff] %vm1782_vm0, %v2677_v34  ;;  %1294 = vmatmul.bf16.gmra.mxu1 %v2098_v27 }
 0x113   :  { %2678 = vtanh.f32 %v1591_v35  ;;  %1463 = vmatmul.bf16.gmra.mxu2 %v2102_v31 }
 0x114   :  { %1632 = vmatmul.bf16.gmra.mxu3 %v2106_v32 }
 0x116   :  { %v1424_v37 = vpop.f32.mrf.mxu2  ;;  %v1088_v40 = vpop.f32.mrf.mxu0 }
 0x117   :  { %v1593_v38 = vpop.f32.mrf.mxu3  ;;  %v1425_v39 = vadd.f32 %v1424_v37, %v1256_v36  ;;  %v1257_v41 = vpop.f32.mrf.mxu1  ;;  %v1089_v44 = vadd.f32 %v3093_v0, %v1088_v40 }
 0x119   :  { %v2679_v42 = vpop.eup %2678  ;;  %v1594_v43 = vadd.f32 %v1593_v38, %v1425_v39  ;;  %v1258_v53 = vadd.f32 %v1257_v41, %v1089_v44  ;;  %v2563_v44 = vld [vmem:[%s3996_s0 + $0x244] sm:$0xf] }
 0x11a   :  { %1796 = vst.msk [vmem:[%s3997_s3 + $0x68] sm:$0xff] %vm1782_vm0, %v2679_v42  ;;  %v2141_v42 = vld [vmem:[%s3996_s0 + $0x240] sm:$0xf] }
 0x11b   :  { %2680 = vtanh.f32 %v1594_v43  ;;  %v2565_v43 = vld [vmem:[%s3996_s0 + $0x24c] sm:$0xf0] }
 0x11e   :  { %v1426_v54 = vpop.f32.mrf.mxu2  ;;  %v1091_v59 = vpop.f32.mrf.mxu0 }
 0x11f   :  { %v1595_v55 = vpop.f32.mrf.mxu3  ;;  %v1427_v58 = vadd.f32 %v1426_v54, %v1258_v53  ;;  %v1260_v60 = vpop.f32.mrf.mxu1  ;;  %v1092_v63 = vadd.f32 %v3093_v0, %v1091_v59  ;;  %v2142_v53 = vor.u32 %v2565_v43, %v2141_v42  ;;  %v2146_v54 = vor.u32 %v2563_v44, %v2143_v45  ;;  %v2175_v42 = vld [vmem:[%s3996_s0 + $0x290] sm:$0xf0]  ;;  %v2181_v43 = vld [vmem:[%s3996_s0 + $0x288] sm:$0xf]  ;;  %v2574_v44 = vld [vmem:[%s3996_s0 + $0x294] sm:$0xf0] }
 0x120   :  { %v2154_v59 = vor.u32 %v2564_v48, %v2151_v49  ;;  %v2572_v45 = vld [vmem:[%s3996_s0 + $0x28c] sm:$0xf] }
 0x121   :  { %v2681_v1 = vpop.eup %2680  ;;  %v1596_v2 = vadd.f32 %v1595_v55, %v1427_v58  ;;  %1130 = vmatmul.bf16.gmra.mxu0 %v2110_v56  ;;  %v1261_v3 = vadd.f32 %v1260_v60, %v1092_v63  ;;  %v2150_v58 = vor.u32 %v2566_v47, %v2149_v46  ;;  %v2183_v46 = vld [vmem:[%s3996_s0 + $0x298] sm:$0xf0] }
 0x122   :  { %1797 = vst.msk [vmem:[%s3997_s3 + $0x70] sm:$0xff] %vm1782_vm0, %v2681_v1  ;;  %1299 = vmatmul.bf16.gmra.mxu1 %v2114_v57 }
 0x123   :  { %2682 = vtanh.f32 %v1596_v2  ;;  %1468 = vmatmul.bf16.gmra.mxu2 %v2118_v61 }
 0x124   :  { %1637 = vmatmul.bf16.gmra.mxu3 %v2122_v62 }
 0x126   :  { %v1429_v4 = vpop.f32.mrf.mxu2  ;;  %v1093_v7 = vpop.f32.mrf.mxu0 }
 0x127   :  { %v1598_v5 = vpop.f32.mrf.mxu3  ;;  %v1430_v6 = vadd.f32 %v1429_v4, %v1261_v3  ;;  %v1262_v8 = vpop.f32.mrf.mxu1  ;;  %v1094_v11 = vadd.f32 %v3093_v0, %v1093_v7 }
 0x129   :  { %v2683_v9 = vpop.eup %2682  ;;  %v1599_v10 = vadd.f32 %v1598_v5, %v1430_v6  ;;  %v1263_v20 = vadd.f32 %v1262_v8, %v1094_v11  ;;  %v2567_v11 = vld [vmem:[%s3996_s0 + $0x264] sm:$0xf] }
 0x12a   :  { %1798 = vst.msk [vmem:[%s3997_s3 + $0x78] sm:$0xff] %vm1782_vm0, %v2683_v9  ;;  %v2157_v9 = vld [vmem:[%s3996_s0 + $0x260] sm:$0xf] }
 0x12b   :  { %2684 = vtanh.f32 %v1599_v10  ;;  %v2569_v10 = vld [vmem:[%s3996_s0 + $0x26c] sm:$0xf0] }
 0x12e   :  { %v1431_v21 = vpop.f32.mrf.mxu2  ;;  %v1096_v26 = vpop.f32.mrf.mxu0 }
 0x12f   :  { %v1600_v22 = vpop.f32.mrf.mxu3  ;;  %v1432_v25 = vadd.f32 %v1431_v21, %v1263_v20  ;;  %v1265_v27 = vpop.f32.mrf.mxu1  ;;  %v1097_v30 = vadd.f32 %v3093_v0, %v1096_v26  ;;  %v2158_v20 = vor.u32 %v2569_v10, %v2157_v9  ;;  %v2162_v21 = vor.u32 %v2567_v11, %v2159_v12  ;;  %v2191_v9 = vld [vmem:[%s3996_s0 + $0x2b0] sm:$0xf0]  ;;  %v2197_v10 = vld [vmem:[%s3996_s0 + $0x2a8] sm:$0xf]  ;;  %v2578_v11 = vld [vmem:[%s3996_s0 + $0x2b4] sm:$0xf0] }
 0x130   :  { %v2170_v26 = vor.u32 %v2568_v15, %v2167_v16  ;;  %v2576_v12 = vld [vmem:[%s3996_s0 + $0x2ac] sm:$0xf] }
 0x131   :  { %v2685_v31 = vpop.eup %2684  ;;  %v1601_v32 = vadd.f32 %v1600_v22, %v1432_v25  ;;  %1135 = vmatmul.bf16.gmra.mxu0 %v2126_v23  ;;  %v1266_v33 = vadd.f32 %v1265_v27, %v1097_v30  ;;  %v2166_v25 = vor.u32 %v2570_v14, %v2165_v13  ;;  %v2199_v13 = vld [vmem:[%s3996_s0 + $0x2b8] sm:$0xf0] }
 0x132   :  { %1799 = vst.msk [vmem:[%s3997_s3 + $0x80] sm:$0xff] %vm1782_vm0, %v2685_v31  ;;  %1304 = vmatmul.bf16.gmra.mxu1 %v2130_v24 }
 0x133   :  { %2686 = vtanh.f32 %v1601_v32  ;;  %1473 = vmatmul.bf16.gmra.mxu2 %v2134_v28 }
 0x134   :  { %1642 = vmatmul.bf16.gmra.mxu3 %v2138_v29 }
 0x136   :  { %v1434_v34 = vpop.f32.mrf.mxu2  ;;  %v1098_v37 = vpop.f32.mrf.mxu0 }
 0x137   :  { %v1603_v35 = vpop.f32.mrf.mxu3  ;;  %v1435_v36 = vadd.f32 %v1434_v34, %v1266_v33  ;;  %v1267_v38 = vpop.f32.mrf.mxu1  ;;  %v1099_v41 = vadd.f32 %v3093_v0, %v1098_v37 }
 0x139   :  { %v2687_v39 = vpop.eup %2686  ;;  %v1604_v40 = vadd.f32 %v1603_v35, %v1435_v36  ;;  %v1268_v50 = vadd.f32 %v1267_v38, %v1099_v41  ;;  %v2571_v41 = vld [vmem:[%s3996_s0 + $0x284] sm:$0xf] }
 0x13a   :  { %1800 = vst.msk [vmem:[%s3997_s3 + $0x88] sm:$0xff] %vm1782_vm0, %v2687_v39  ;;  %v2173_v39 = vld [vmem:[%s3996_s0 + $0x280] sm:$0xf] }
 0x13b   :  { %2688 = vtanh.f32 %v1604_v40  ;;  %v2573_v40 = vld [vmem:[%s3996_s0 + $0x28c] sm:$0xf0] }
 0x13e   :  { %v1436_v51 = vpop.f32.mrf.mxu2  ;;  %v1101_v56 = vpop.f32.mrf.mxu0 }
 0x13f   :  { %v1605_v52 = vpop.f32.mrf.mxu3  ;;  %v1437_v55 = vadd.f32 %v1436_v51, %v1268_v50  ;;  %v1270_v57 = vpop.f32.mrf.mxu1  ;;  %v1102_v60 = vadd.f32 %v3093_v0, %v1101_v56  ;;  %v2174_v50 = vor.u32 %v2573_v40, %v2173_v39  ;;  %v2178_v51 = vor.u32 %v2571_v41, %v2175_v42  ;;  %v2207_v39 = vld [vmem:[%s3996_s0 + $0x2d0] sm:$0xf0]  ;;  %v2213_v40 = vld [vmem:[%s3996_s0 + $0x2c8] sm:$0xf]  ;;  %v2582_v41 = vld [vmem:[%s3996_s0 + $0x2d4] sm:$0xf0] }
 0x140   :  { %v2186_v56 = vor.u32 %v2572_v45, %v2183_v46  ;;  %v2580_v42 = vld [vmem:[%s3996_s0 + $0x2cc] sm:$0xf] }
 0x141   :  { %v2689_v61 = vpop.eup %2688  ;;  %v1606_v62 = vadd.f32 %v1605_v52, %v1437_v55  ;;  %1140 = vmatmul.bf16.gmra.mxu0 %v2142_v53  ;;  %v1271_v63 = vadd.f32 %v1270_v57, %v1102_v60  ;;  %v2182_v55 = vor.u32 %v2574_v44, %v2181_v43  ;;  %v2215_v43 = vld [vmem:[%s3996_s0 + $0x2d8] sm:$0xf0] }
 0x142   :  { %1801 = vst.msk [vmem:[%s3997_s3 + $0x90] sm:$0xff] %vm1782_vm0, %v2689_v61  ;;  %1309 = vmatmul.bf16.gmra.mxu1 %v2146_v54 }
 0x143   :  { %2690 = vtanh.f32 %v1606_v62  ;;  %1478 = vmatmul.bf16.gmra.mxu2 %v2150_v58 }
 0x144   :  { %1647 = vmatmul.bf16.gmra.mxu3 %v2154_v59 }
 0x146   :  { %v1439_v1 = vpop.f32.mrf.mxu2  ;;  %v1103_v4 = vpop.f32.mrf.mxu0 }
 0x147   :  { %v1608_v2 = vpop.f32.mrf.mxu3  ;;  %v1440_v3 = vadd.f32 %v1439_v1, %v1271_v63  ;;  %v1272_v5 = vpop.f32.mrf.mxu1  ;;  %v1104_v8 = vadd.f32 %v3093_v0, %v1103_v4 }
 0x149   :  { %v2691_v6 = vpop.eup %2690  ;;  %v1609_v7 = vadd.f32 %v1608_v2, %v1440_v3  ;;  %v1273_v17 = vadd.f32 %v1272_v5, %v1104_v8  ;;  %v2575_v8 = vld [vmem:[%s3996_s0 + $0x2a4] sm:$0xf] }
 0x14a   :  { %1802 = vst.msk [vmem:[%s3997_s3 + $0x98] sm:$0xff] %vm1782_vm0, %v2691_v6  ;;  %v2189_v6 = vld [vmem:[%s3996_s0 + $0x2a0] sm:$0xf] }
 0x14b   :  { %2692 = vtanh.f32 %v1609_v7  ;;  %v2577_v7 = vld [vmem:[%s3996_s0 + $0x2ac] sm:$0xf0] }
 0x14e   :  { %v1441_v18 = vpop.f32.mrf.mxu2  ;;  %v1106_v23 = vpop.f32.mrf.mxu0 }
 0x14f   :  { %v1610_v19 = vpop.f32.mrf.mxu3  ;;  %v1442_v22 = vadd.f32 %v1441_v18, %v1273_v17  ;;  %v1275_v24 = vpop.f32.mrf.mxu1  ;;  %v1107_v27 = vadd.f32 %v3093_v0, %v1106_v23  ;;  %v2190_v17 = vor.u32 %v2577_v7, %v2189_v6  ;;  %v2194_v18 = vor.u32 %v2575_v8, %v2191_v9  ;;  %v2223_v6 = vld [vmem:[%s3996_s0 + $0x2f0] sm:$0xf0]  ;;  %v2229_v7 = vld [vmem:[%s3996_s0 + $0x2e8] sm:$0xf]  ;;  %v2586_v8 = vld [vmem:[%s3996_s0 + $0x2f4] sm:$0xf0] }
 0x150   :  { %v2202_v23 = vor.u32 %v2576_v12, %v2199_v13  ;;  %v2584_v9 = vld [vmem:[%s3996_s0 + $0x2ec] sm:$0xf] }
 0x151   :  { %v2693_v28 = vpop.eup %2692  ;;  %v1611_v29 = vadd.f32 %v1610_v19, %v1442_v22  ;;  %1145 = vmatmul.bf16.gmra.mxu0 %v2158_v20  ;;  %v1276_v30 = vadd.f32 %v1275_v24, %v1107_v27  ;;  %v2198_v22 = vor.u32 %v2578_v11, %v2197_v10  ;;  %v2231_v10 = vld [vmem:[%s3996_s0 + $0x2f8] sm:$0xf0] }
 0x152   :  { %1803 = vst.msk [vmem:[%s3997_s3 + $0xa0] sm:$0xff] %vm1782_vm0, %v2693_v28  ;;  %1314 = vmatmul.bf16.gmra.mxu1 %v2162_v21 }
 0x153   :  { %2694 = vtanh.f32 %v1611_v29  ;;  %1483 = vmatmul.bf16.gmra.mxu2 %v2166_v25 }
 0x154   :  { %1652 = vmatmul.bf16.gmra.mxu3 %v2170_v26 }
 0x156   :  { %v1444_v31 = vpop.f32.mrf.mxu2  ;;  %v1108_v34 = vpop.f32.mrf.mxu0 }
 0x157   :  { %v1613_v32 = vpop.f32.mrf.mxu3  ;;  %v1445_v33 = vadd.f32 %v1444_v31, %v1276_v30  ;;  %v1277_v35 = vpop.f32.mrf.mxu1  ;;  %v1109_v38 = vadd.f32 %v3093_v0, %v1108_v34  ;;  %v3561_v34 = vld [vmem:[%s3995_s2] ss:$0 sm:$0xff] }
 0x159   :  { %v2695_v36 = vpop.eup %2694  ;;  %v1614_v37 = vadd.f32 %v1613_v32, %v1445_v33  ;;  %v1278_v47 = vadd.f32 %v1277_v35, %v1109_v38  ;;  %v2579_v38 = vld [vmem:[%s3996_s0 + $0x2c4] sm:$0xf] }
 0x15a   :  { %1804 = vst.msk [vmem:[%s3997_s3 + $0xa8] sm:$0xff] %vm1782_vm0, %v2695_v36  ;;  %v2205_v36 = vld [vmem:[%s3996_s0 + $0x2c0] sm:$0xf] }
 0x15b   :  { %2696 = vtanh.f32 %v1614_v37  ;;  %v2581_v37 = vld [vmem:[%s3996_s0 + $0x2cc] sm:$0xf0] }
 0x15e   :  { %v1446_v48 = vpop.f32.mrf.mxu2  ;;  %v1111_v53 = vpop.f32.mrf.mxu0 }
 0x15f   :  { %v1615_v49 = vpop.f32.mrf.mxu3  ;;  %v1447_v52 = vadd.f32 %v1446_v48, %v1278_v47  ;;  %v1280_v54 = vpop.f32.mrf.mxu1  ;;  %v1112_v57 = vadd.f32 %v3093_v0, %v1111_v53  ;;  %v2206_v47 = vor.u32 %v2581_v37, %v2205_v36  ;;  %v2210_v48 = vor.u32 %v2579_v38, %v2207_v39  ;;  %v2239_v36 = vld [vmem:[%s3996_s0 + $0x310] sm:$0xf0]  ;;  %v2245_v37 = vld [vmem:[%s3996_s0 + $0x308] sm:$0xf]  ;;  %v2590_v38 = vld [vmem:[%s3996_s0 + $0x314] sm:$0xf0] }
 0x160   :  { %v2218_v53 = vor.u32 %v2580_v42, %v2215_v43  ;;  %v2588_v39 = vld [vmem:[%s3996_s0 + $0x30c] sm:$0xf] }
 0x161   :  { %v2697_v58 = vpop.eup %2696  ;;  %v1616_v59 = vadd.f32 %v1615_v49, %v1447_v52  ;;  %1150 = vmatmul.bf16.gmra.mxu0 %v2174_v50  ;;  %v1281_v60 = vadd.f32 %v1280_v54, %v1112_v57  ;;  %v2214_v52 = vor.u32 %v2582_v41, %v2213_v40  ;;  %v2247_v40 = vld [vmem:[%s3996_s0 + $0x318] sm:$0xf0] }
 0x162   :  { %1805 = vst.msk [vmem:[%s3997_s3 + $0xb0] sm:$0xff] %vm1782_vm0, %v2697_v58  ;;  %1319 = vmatmul.bf16.gmra.mxu1 %v2178_v51 }
 0x163   :  { %2698 = vtanh.f32 %v1616_v59  ;;  %1488 = vmatmul.bf16.gmra.mxu2 %v2182_v55 }
 0x164   :  { %1657 = vmatmul.bf16.gmra.mxu3 %v2186_v56 }
 0x166   :  { %v1449_v61 = vpop.f32.mrf.mxu2  ;;  %v1113_v1 = vpop.f32.mrf.mxu0 }
 0x167   :  { %v1618_v62 = vpop.f32.mrf.mxu3  ;;  %v1450_v63 = vadd.f32 %v1449_v61, %v1281_v60  ;;  %v1282_v2 = vpop.f32.mrf.mxu1  ;;  %v1114_v5 = vadd.f32 %v3093_v0, %v1113_v1 }
 0x169   :  { %v2699_v3 = vpop.eup %2698  ;;  %v1619_v4 = vadd.f32 %v1618_v62, %v1450_v63  ;;  %v1283_v14 = vadd.f32 %v1282_v2, %v1114_v5  ;;  %v2583_v5 = vld [vmem:[%s3996_s0 + $0x2e4] sm:$0xf] }
 0x16a   :  { %1806 = vst.msk [vmem:[%s3997_s3 + $0xb8] sm:$0xff] %vm1782_vm0, %v2699_v3  ;;  %v2221_v3 = vld [vmem:[%s3996_s0 + $0x2e0] sm:$0xf] }
 0x16b   :  { %2700 = vtanh.f32 %v1619_v4  ;;  %v2585_v4 = vld [vmem:[%s3996_s0 + $0x2ec] sm:$0xf0] }
 0x16e   :  { %v1451_v15 = vpop.f32.mrf.mxu2  ;;  %v1116_v20 = vpop.f32.mrf.mxu0 }
 0x16f   :  { %v1620_v16 = vpop.f32.mrf.mxu3  ;;  %v1452_v19 = vadd.f32 %v1451_v15, %v1283_v14  ;;  %v1285_v21 = vpop.f32.mrf.mxu1  ;;  %v1117_v24 = vadd.f32 %v3093_v0, %v1116_v20  ;;  %v2222_v14 = vor.u32 %v2585_v4, %v2221_v3  ;;  %v2226_v15 = vor.u32 %v2583_v5, %v2223_v6  ;;  %v2255_v3 = vld [vmem:[%s3996_s0 + $0x330] sm:$0xf0]  ;;  %v2261_v4 = vld [vmem:[%s3996_s0 + $0x328] sm:$0xf]  ;;  %v2594_v5 = vld [vmem:[%s3996_s0 + $0x334] sm:$0xf0] }
 0x170   :  { %v2234_v20 = vor.u32 %v2584_v9, %v2231_v10  ;;  %v2592_v6 = vld [vmem:[%s3996_s0 + $0x32c] sm:$0xf] }
 0x171   :  { %v2701_v25 = vpop.eup %2700  ;;  %v1621_v26 = vadd.f32 %v1620_v16, %v1452_v19  ;;  %1155 = vmatmul.bf16.gmra.mxu0 %v2190_v17  ;;  %v1286_v27 = vadd.f32 %v1285_v21, %v1117_v24  ;;  %v2230_v19 = vor.u32 %v2586_v8, %v2229_v7  ;;  %v2263_v7 = vld [vmem:[%s3996_s0 + $0x338] sm:$0xf0] }
 0x172   :  { %1807 = vst.msk [vmem:[%s3997_s3 + $0xc0] sm:$0xff] %vm1782_vm0, %v2701_v25  ;;  %1324 = vmatmul.bf16.gmra.mxu1 %v2194_v18 }
 0x173   :  { %2702 = vtanh.f32 %v1621_v26  ;;  %1493 = vmatmul.bf16.gmra.mxu2 %v2198_v22 }
 0x174   :  { %1662 = vmatmul.bf16.gmra.mxu3 %v2202_v23 }
 0x176   :  { %v1454_v28 = vpop.f32.mrf.mxu2  ;;  %v1118_v31 = vpop.f32.mrf.mxu0 }
 0x177   :  { %v1623_v29 = vpop.f32.mrf.mxu3  ;;  %v1455_v30 = vadd.f32 %v1454_v28, %v1286_v27  ;;  %v1287_v32 = vpop.f32.mrf.mxu1  ;;  %v1119_v35 = vadd.f32 %v3561_v34, %v1118_v31 }
 0x179   :  { %v2703_v33 = vpop.eup %2702  ;;  %v1624_v0 = vadd.f32 %v1623_v29, %v1455_v30  ;;  %v1288_v44 = vadd.f32 %v1287_v32, %v1119_v35  ;;  %v2587_v35 = vld [vmem:[%s3996_s0 + $0x304] sm:$0xf] }
 0x17a   :  { %1808 = vst.msk [vmem:[%s3997_s3 + $0xc8] sm:$0xff] %vm1782_vm0, %v2703_v33  ;;  %v2237_v33 = vld [vmem:[%s3996_s0 + $0x300] sm:$0xf] }
 0x17b   :  { %2704 = vtanh.f32 %v1624_v0  ;;  %v2589_v0 = vld [vmem:[%s3996_s0 + $0x30c] sm:$0xf0] }
 0x17e   :  { %v1456_v45 = vpop.f32.mrf.mxu2  ;;  %v1121_v50 = vpop.f32.mrf.mxu0 }
 0x17f   :  { %v1625_v46 = vpop.f32.mrf.mxu3  ;;  %v1457_v49 = vadd.f32 %v1456_v45, %v1288_v44  ;;  %v1290_v51 = vpop.f32.mrf.mxu1  ;;  %v1122_v54 = vadd.f32 %v3561_v34, %v1121_v50  ;;  %v2238_v44 = vor.u32 %v2589_v0, %v2237_v33  ;;  %v2242_v45 = vor.u32 %v2587_v35, %v2239_v36  ;;  %v2271_v33 = vld [vmem:[%s3996_s0 + $0x350] sm:$0xf0]  ;;  %v2277_v0 = vld [vmem:[%s3996_s0 + $0x348] sm:$0xf]  ;;  %v2598_v35 = vld [vmem:[%s3996_s0 + $0x354] sm:$0xf0] }
 0x180   :  { %v2250_v50 = vor.u32 %v2588_v39, %v2247_v40  ;;  %v2596_v36 = vld [vmem:[%s3996_s0 + $0x34c] sm:$0xf] }
 0x181   :  { %v2705_v55 = vpop.eup %2704  ;;  %v1626_v56 = vadd.f32 %v1625_v46, %v1457_v49  ;;  %1160 = vmatmul.bf16.gmra.mxu0 %v2206_v47  ;;  %v1291_v57 = vadd.f32 %v1290_v51, %v1122_v54  ;;  %v2246_v49 = vor.u32 %v2590_v38, %v2245_v37  ;;  %v2279_v37 = vld [vmem:[%s3996_s0 + $0x358] sm:$0xf0] }
 0x182   :  { %1809 = vst.msk [vmem:[%s3997_s3 + $0xd0] sm:$0xff] %vm1782_vm0, %v2705_v55  ;;  %1329 = vmatmul.bf16.gmra.mxu1 %v2210_v48 }
 0x183   :  { %2706 = vtanh.f32 %v1626_v56  ;;  %1498 = vmatmul.bf16.gmra.mxu2 %v2214_v52 }
 0x184   :  { %1667 = vmatmul.bf16.gmra.mxu3 %v2218_v53 }
 0x186   :  { %v1459_v58 = vpop.f32.mrf.mxu2  ;;  %v1123_v61 = vpop.f32.mrf.mxu0 }
 0x187   :  { %v1628_v59 = vpop.f32.mrf.mxu3  ;;  %v1460_v60 = vadd.f32 %v1459_v58, %v1291_v57  ;;  %v1292_v62 = vpop.f32.mrf.mxu1  ;;  %v1124_v2 = vadd.f32 %v3561_v34, %v1123_v61 }
 0x189   :  { %v2707_v63 = vpop.eup %2706  ;;  %v1629_v1 = vadd.f32 %v1628_v59, %v1460_v60  ;;  %v1293_v11 = vadd.f32 %v1292_v62, %v1124_v2  ;;  %v2591_v2 = vld [vmem:[%s3996_s0 + $0x324] sm:$0xf] }
 0x18a   :  { %1810 = vst.msk [vmem:[%s3997_s3 + $0xd8] sm:$0xff] %vm1782_vm0, %v2707_v63  ;;  %v2253_v63 = vld [vmem:[%s3996_s0 + $0x320] sm:$0xf] }
 0x18b   :  { %2708 = vtanh.f32 %v1629_v1  ;;  %v2593_v1 = vld [vmem:[%s3996_s0 + $0x32c] sm:$0xf0] }
 0x18e   :  { %v1461_v12 = vpop.f32.mrf.mxu2  ;;  %v1126_v17 = vpop.f32.mrf.mxu0 }
 0x18f   :  { %v1630_v13 = vpop.f32.mrf.mxu3  ;;  %v1462_v16 = vadd.f32 %v1461_v12, %v1293_v11  ;;  %v1295_v18 = vpop.f32.mrf.mxu1  ;;  %v1127_v21 = vadd.f32 %v3561_v34, %v1126_v17  ;;  %v2254_v11 = vor.u32 %v2593_v1, %v2253_v63  ;;  %v2258_v12 = vor.u32 %v2591_v2, %v2255_v3  ;;  %v2287_v63 = vld [vmem:[%s3996_s0 + $0x370] sm:$0xf0]  ;;  %v2293_v1 = vld [vmem:[%s3996_s0 + $0x368] sm:$0xf]  ;;  %v2602_v2 = vld [vmem:[%s3996_s0 + $0x374] sm:$0xf0] }
 0x190   :  { %v2266_v17 = vor.u32 %v2592_v6, %v2263_v7  ;;  %v2600_v3 = vld [vmem:[%s3996_s0 + $0x36c] sm:$0xf] }
 0x191   :  { %v2709_v22 = vpop.eup %2708  ;;  %v1631_v23 = vadd.f32 %v1630_v13, %v1462_v16  ;;  %1165 = vmatmul.bf16.gmra.mxu0 %v2222_v14  ;;  %v1296_v24 = vadd.f32 %v1295_v18, %v1127_v21  ;;  %v2262_v16 = vor.u32 %v2594_v5, %v2261_v4  ;;  %v2295_v4 = vld [vmem:[%s3996_s0 + $0x378] sm:$0xf0] }
 0x192   :  { %1811 = vst.msk [vmem:[%s3997_s3 + $0xe0] sm:$0xff] %vm1782_vm0, %v2709_v22  ;;  %1334 = vmatmul.bf16.gmra.mxu1 %v2226_v15 }
 0x193   :  { %2710 = vtanh.f32 %v1631_v23  ;;  %1503 = vmatmul.bf16.gmra.mxu2 %v2230_v19 }
 0x194   :  { %1672 = vmatmul.bf16.gmra.mxu3 %v2234_v20 }
 0x196   :  { %v1464_v25 = vpop.f32.mrf.mxu2  ;;  %v1128_v28 = vpop.f32.mrf.mxu0 }
 0x197   :  { %v1633_v26 = vpop.f32.mrf.mxu3  ;;  %v1465_v27 = vadd.f32 %v1464_v25, %v1296_v24  ;;  %v1297_v29 = vpop.f32.mrf.mxu1  ;;  %v1129_v32 = vadd.f32 %v3561_v34, %v1128_v28 }
 0x199   :  { %v2711_v30 = vpop.eup %2710  ;;  %v1634_v31 = vadd.f32 %v1633_v26, %v1465_v27  ;;  %v1298_v41 = vadd.f32 %v1297_v29, %v1129_v32  ;;  %v2595_v32 = vld [vmem:[%s3996_s0 + $0x344] sm:$0xf] }
 0x19a   :  { %1812 = vst.msk [vmem:[%s3997_s3 + $0xe8] sm:$0xff] %vm1782_vm0, %v2711_v30  ;;  %v2269_v30 = vld [vmem:[%s3996_s0 + $0x340] sm:$0xf] }
 0x19b   :  { %2712 = vtanh.f32 %v1634_v31  ;;  %v2597_v31 = vld [vmem:[%s3996_s0 + $0x34c] sm:$0xf0] }
 0x19e   :  { %v1466_v42 = vpop.f32.mrf.mxu2  ;;  %v1131_v47 = vpop.f32.mrf.mxu0 }
 0x19f   :  { %v1635_v43 = vpop.f32.mrf.mxu3  ;;  %v1467_v46 = vadd.f32 %v1466_v42, %v1298_v41  ;;  %v1300_v48 = vpop.f32.mrf.mxu1  ;;  %v1132_v51 = vadd.f32 %v3561_v34, %v1131_v47  ;;  %v2270_v41 = vor.u32 %v2597_v31, %v2269_v30  ;;  %v2274_v42 = vor.u32 %v2595_v32, %v2271_v33  ;;  %v2303_v30 = vld [vmem:[%s3996_s0 + $0x390] sm:$0xf0]  ;;  %v2309_v31 = vld [vmem:[%s3996_s0 + $0x388] sm:$0xf]  ;;  %v2606_v32 = vld [vmem:[%s3996_s0 + $0x394] sm:$0xf0] }
 0x1a0   :  { %v2282_v47 = vor.u32 %v2596_v36, %v2279_v37  ;;  %v2604_v33 = vld [vmem:[%s3996_s0 + $0x38c] sm:$0xf] }
 0x1a1   :  { %v2713_v52 = vpop.eup %2712  ;;  %v1636_v53 = vadd.f32 %v1635_v43, %v1467_v46  ;;  %1170 = vmatmul.bf16.gmra.mxu0 %v2238_v44  ;;  %v1301_v54 = vadd.f32 %v1300_v48, %v1132_v51  ;;  %v2278_v46 = vor.u32 %v2598_v35, %v2277_v0  ;;  %v2311_v0 = vld [vmem:[%s3996_s0 + $0x398] sm:$0xf0] }
 0x1a2   :  { %1813 = vst.msk [vmem:[%s3997_s3 + $0xf0] sm:$0xff] %vm1782_vm0, %v2713_v52  ;;  %1339 = vmatmul.bf16.gmra.mxu1 %v2242_v45 }
 0x1a3   :  { %2714 = vtanh.f32 %v1636_v53  ;;  %1508 = vmatmul.bf16.gmra.mxu2 %v2246_v49 }
 0x1a4   :  { %1677 = vmatmul.bf16.gmra.mxu3 %v2250_v50 }
 0x1a6   :  { %v1469_v55 = vpop.f32.mrf.mxu2  ;;  %v1133_v58 = vpop.f32.mrf.mxu0 }
 0x1a7   :  { %v1638_v56 = vpop.f32.mrf.mxu3  ;;  %v1470_v57 = vadd.f32 %v1469_v55, %v1301_v54  ;;  %v1302_v59 = vpop.f32.mrf.mxu1  ;;  %v1134_v62 = vadd.f32 %v3561_v34, %v1133_v58 }
 0x1a9   :  { %v2715_v60 = vpop.eup %2714  ;;  %v1639_v61 = vadd.f32 %v1638_v56, %v1470_v57  ;;  %v1303_v8 = vadd.f32 %v1302_v59, %v1134_v62  ;;  %v2599_v62 = vld [vmem:[%s3996_s0 + $0x364] sm:$0xf] }
 0x1aa   :  { %1814 = vst.msk [vmem:[%s3997_s3 + $0xf8] sm:$0xff] %vm1782_vm0, %v2715_v60  ;;  %v2285_v60 = vld [vmem:[%s3996_s0 + $0x360] sm:$0xf] }
 0x1ab   :  { %2716 = vtanh.f32 %v1639_v61  ;;  %v2601_v61 = vld [vmem:[%s3996_s0 + $0x36c] sm:$0xf0] }
 0x1ae   :  { %v1471_v9 = vpop.f32.mrf.mxu2  ;;  %v1136_v14 = vpop.f32.mrf.mxu0 }
 0x1af   :  { %v1640_v10 = vpop.f32.mrf.mxu3  ;;  %v1472_v13 = vadd.f32 %v1471_v9, %v1303_v8  ;;  %v1305_v15 = vpop.f32.mrf.mxu1  ;;  %v1137_v18 = vadd.f32 %v3561_v34, %v1136_v14  ;;  %v2286_v8 = vor.u32 %v2601_v61, %v2285_v60  ;;  %v2290_v9 = vor.u32 %v2599_v62, %v2287_v63  ;;  %v2319_v60 = vld [vmem:[%s3996_s0 + $0x3b0] sm:$0xf0]  ;;  %v2325_v61 = vld [vmem:[%s3996_s0 + $0x3a8] sm:$0xf]  ;;  %v2610_v62 = vld [vmem:[%s3996_s0 + $0x3b4] sm:$0xf0] }
 0x1b0   :  { %v2298_v14 = vor.u32 %v2600_v3, %v2295_v4  ;;  %v2608_v63 = vld [vmem:[%s3996_s0 + $0x3ac] sm:$0xf] }
 0x1b1   :  { %v2717_v19 = vpop.eup %2716  ;;  %v1641_v20 = vadd.f32 %v1640_v10, %v1472_v13  ;;  %1175 = vmatmul.bf16.gmra.mxu0 %v2254_v11  ;;  %v1306_v21 = vadd.f32 %v1305_v15, %v1137_v18  ;;  %v2294_v13 = vor.u32 %v2602_v2, %v2293_v1  ;;  %v2327_v1 = vld [vmem:[%s3996_s0 + $0x3b8] sm:$0xf0] }
 0x1b2   :  { %1815 = vst.msk [vmem:[%s3997_s3 + $0x100] sm:$0xff] %vm1782_vm0, %v2717_v19  ;;  %1344 = vmatmul.bf16.gmra.mxu1 %v2258_v12 }
 0x1b3   :  { %2718 = vtanh.f32 %v1641_v20  ;;  %1513 = vmatmul.bf16.gmra.mxu2 %v2262_v16 }
 0x1b4   :  { %1682 = vmatmul.bf16.gmra.mxu3 %v2266_v17 }
 0x1b6   :  { %v1474_v22 = vpop.f32.mrf.mxu2  ;;  %v1138_v25 = vpop.f32.mrf.mxu0 }
 0x1b7   :  { %v1643_v23 = vpop.f32.mrf.mxu3  ;;  %v1475_v24 = vadd.f32 %v1474_v22, %v1306_v21  ;;  %v1307_v26 = vpop.f32.mrf.mxu1  ;;  %v1139_v29 = vadd.f32 %v3561_v34, %v1138_v25 }
 0x1b9   :  { %v2719_v27 = vpop.eup %2718  ;;  %v1644_v28 = vadd.f32 %v1643_v23, %v1475_v24  ;;  %v1308_v38 = vadd.f32 %v1307_v26, %v1139_v29  ;;  %v2603_v29 = vld [vmem:[%s3996_s0 + $0x384] sm:$0xf] }
 0x1ba   :  { %1816 = vst.msk [vmem:[%s3997_s3 + $0x108] sm:$0xff] %vm1782_vm0, %v2719_v27  ;;  %v2301_v27 = vld [vmem:[%s3996_s0 + $0x380] sm:$0xf] }
 0x1bb   :  { %2720 = vtanh.f32 %v1644_v28  ;;  %v2605_v28 = vld [vmem:[%s3996_s0 + $0x38c] sm:$0xf0] }
 0x1be   :  { %v1476_v39 = vpop.f32.mrf.mxu2  ;;  %v1141_v44 = vpop.f32.mrf.mxu0 }
 0x1bf   :  { %v1645_v40 = vpop.f32.mrf.mxu3  ;;  %v1477_v43 = vadd.f32 %v1476_v39, %v1308_v38  ;;  %v1310_v45 = vpop.f32.mrf.mxu1  ;;  %v1142_v48 = vadd.f32 %v3561_v34, %v1141_v44  ;;  %v2302_v38 = vor.u32 %v2605_v28, %v2301_v27  ;;  %v2306_v39 = vor.u32 %v2603_v29, %v2303_v30  ;;  %v2335_v27 = vld [vmem:[%s3996_s0 + $0x3d0] sm:$0xf0]  ;;  %v2341_v28 = vld [vmem:[%s3996_s0 + $0x3c8] sm:$0xf]  ;;  %v2614_v29 = vld [vmem:[%s3996_s0 + $0x3d4] sm:$0xf0] }
 0x1c0   :  { %v2314_v44 = vor.u32 %v2604_v33, %v2311_v0  ;;  %v2612_v30 = vld [vmem:[%s3996_s0 + $0x3cc] sm:$0xf] }
 0x1c1   :  { %v2721_v49 = vpop.eup %2720  ;;  %v1646_v50 = vadd.f32 %v1645_v40, %v1477_v43  ;;  %1180 = vmatmul.bf16.gmra.mxu0 %v2270_v41  ;;  %v1311_v51 = vadd.f32 %v1310_v45, %v1142_v48  ;;  %v2310_v43 = vor.u32 %v2606_v32, %v2309_v31  ;;  %v2343_v31 = vld [vmem:[%s3996_s0 + $0x3d8] sm:$0xf0] }
 0x1c2   :  { %1817 = vst.msk [vmem:[%s3997_s3 + $0x110] sm:$0xff] %vm1782_vm0, %v2721_v49  ;;  %1349 = vmatmul.bf16.gmra.mxu1 %v2274_v42 }
 0x1c3   :  { %2722 = vtanh.f32 %v1646_v50  ;;  %1518 = vmatmul.bf16.gmra.mxu2 %v2278_v46 }
 0x1c4   :  { %1687 = vmatmul.bf16.gmra.mxu3 %v2282_v47 }
 0x1c6   :  { %v1479_v52 = vpop.f32.mrf.mxu2  ;;  %v1143_v55 = vpop.f32.mrf.mxu0 }
 0x1c7   :  { %v1648_v53 = vpop.f32.mrf.mxu3  ;;  %v1480_v54 = vadd.f32 %v1479_v52, %v1311_v51  ;;  %v1312_v56 = vpop.f32.mrf.mxu1  ;;  %v1144_v59 = vadd.f32 %v3561_v34, %v1143_v55 }
 0x1c9   :  { %v2723_v57 = vpop.eup %2722  ;;  %v1649_v58 = vadd.f32 %v1648_v53, %v1480_v54  ;;  %v1313_v5 = vadd.f32 %v1312_v56, %v1144_v59  ;;  %v2607_v59 = vld [vmem:[%s3996_s0 + $0x3a4] sm:$0xf] }
 0x1ca   :  { %1818 = vst.msk [vmem:[%s3997_s3 + $0x118] sm:$0xff] %vm1782_vm0, %v2723_v57  ;;  %v2317_v57 = vld [vmem:[%s3996_s0 + $0x3a0] sm:$0xf] }
 0x1cb   :  { %2724 = vtanh.f32 %v1649_v58  ;;  %v2609_v58 = vld [vmem:[%s3996_s0 + $0x3ac] sm:$0xf0] }
 0x1ce   :  { %v1481_v6 = vpop.f32.mrf.mxu2  ;;  %v1146_v11 = vpop.f32.mrf.mxu0 }
 0x1cf   :  { %v1650_v7 = vpop.f32.mrf.mxu3  ;;  %v1482_v10 = vadd.f32 %v1481_v6, %v1313_v5  ;;  %v1315_v12 = vpop.f32.mrf.mxu1  ;;  %v1147_v15 = vadd.f32 %v3561_v34, %v1146_v11  ;;  %v2318_v5 = vor.u32 %v2609_v58, %v2317_v57  ;;  %v2322_v6 = vor.u32 %v2607_v59, %v2319_v60  ;;  %v2351_v57 = vld [vmem:[%s3996_s0 + $0x3f0] sm:$0xf0]  ;;  %v2357_v58 = vld [vmem:[%s3996_s0 + $0x3e8] sm:$0xf]  ;;  %v2618_v59 = vld [vmem:[%s3996_s0 + $0x3f4] sm:$0xf0] }
 0x1d0   :  { %v2330_v11 = vor.u32 %v2608_v63, %v2327_v1  ;;  %v2616_v60 = vld [vmem:[%s3996_s0 + $0x3ec] sm:$0xf] }
 0x1d1   :  { %v2725_v16 = vpop.eup %2724  ;;  %v1651_v17 = vadd.f32 %v1650_v7, %v1482_v10  ;;  %1185 = vmatmul.bf16.gmra.mxu0 %v2286_v8  ;;  %v1316_v18 = vadd.f32 %v1315_v12, %v1147_v15  ;;  %v2326_v10 = vor.u32 %v2610_v62, %v2325_v61  ;;  %v2359_v61 = vld [vmem:[%s3996_s0 + $0x3f8] sm:$0xf0] }
 0x1d2   :  { %1819 = vst.msk [vmem:[%s3997_s3 + $0x120] sm:$0xff] %vm1782_vm0, %v2725_v16  ;;  %1354 = vmatmul.bf16.gmra.mxu1 %v2290_v9 }
 0x1d3   :  { %2726 = vtanh.f32 %v1651_v17  ;;  %1523 = vmatmul.bf16.gmra.mxu2 %v2294_v13 }
 0x1d4   :  { %1692 = vmatmul.bf16.gmra.mxu3 %v2298_v14 }
 0x1d6   :  { %v1484_v19 = vpop.f32.mrf.mxu2  ;;  %v1148_v22 = vpop.f32.mrf.mxu0 }
 0x1d7   :  { %v1653_v20 = vpop.f32.mrf.mxu3  ;;  %v1485_v21 = vadd.f32 %v1484_v19, %v1316_v18  ;;  %v1317_v23 = vpop.f32.mrf.mxu1  ;;  %v1149_v26 = vadd.f32 %v3561_v34, %v1148_v22 }
 0x1d9   :  { %v2727_v24 = vpop.eup %2726  ;;  %v1654_v25 = vadd.f32 %v1653_v20, %v1485_v21  ;;  %v1318_v35 = vadd.f32 %v1317_v23, %v1149_v26  ;;  %v2611_v26 = vld [vmem:[%s3996_s0 + $0x3c4] sm:$0xf] }
 0x1da   :  { %1820 = vst.msk [vmem:[%s3997_s3 + $0x128] sm:$0xff] %vm1782_vm0, %v2727_v24  ;;  %v2333_v24 = vld [vmem:[%s3996_s0 + $0x3c0] sm:$0xf] }
 0x1db   :  { %2728 = vtanh.f32 %v1654_v25  ;;  %v2613_v25 = vld [vmem:[%s3996_s0 + $0x3cc] sm:$0xf0] }
 0x1de   :  { %v1486_v36 = vpop.f32.mrf.mxu2  ;;  %v1151_v41 = vpop.f32.mrf.mxu0 }
 0x1df   :  { %v1655_v37 = vpop.f32.mrf.mxu3  ;;  %v1487_v40 = vadd.f32 %v1486_v36, %v1318_v35  ;;  %v1320_v42 = vpop.f32.mrf.mxu1  ;;  %v1152_v45 = vadd.f32 %v3561_v34, %v1151_v41  ;;  %v2334_v35 = vor.u32 %v2613_v25, %v2333_v24  ;;  %v2338_v36 = vor.u32 %v2611_v26, %v2335_v27 }
 0x1e0   :  { %v2346_v41 = vor.u32 %v2612_v30, %v2343_v31 }
 0x1e1   :  { %v2729_v46 = vpop.eup %2728  ;;  %v1656_v47 = vadd.f32 %v1655_v37, %v1487_v40  ;;  %1190 = vmatmul.bf16.gmra.mxu0 %v2302_v38  ;;  %v1321_v48 = vadd.f32 %v1320_v42, %v1152_v45  ;;  %v2342_v40 = vor.u32 %v2614_v29, %v2341_v28 }
 0x1e2   :  { %1821 = vst.msk [vmem:[%s3997_s3 + $0x130] sm:$0xff] %vm1782_vm0, %v2729_v46  ;;  %1359 = vmatmul.bf16.gmra.mxu1 %v2306_v39 }
 0x1e3   :  { %2730 = vtanh.f32 %v1656_v47  ;;  %1528 = vmatmul.bf16.gmra.mxu2 %v2310_v43 }
 0x1e4   :  { %1697 = vmatmul.bf16.gmra.mxu3 %v2314_v44 }
 0x1e6   :  { %v1489_v49 = vpop.f32.mrf.mxu2  ;;  %v1153_v52 = vpop.f32.mrf.mxu0 }
 0x1e7   :  { %v1658_v50 = vpop.f32.mrf.mxu3  ;;  %v1490_v51 = vadd.f32 %v1489_v49, %v1321_v48  ;;  %v1322_v53 = vpop.f32.mrf.mxu1  ;;  %v1154_v56 = vadd.f32 %v3561_v34, %v1153_v52 }
 0x1e9   :  { %v2731_v54 = vpop.eup %2730  ;;  %v1659_v55 = vadd.f32 %v1658_v50, %v1490_v51  ;;  %v1323_v2 = vadd.f32 %v1322_v53, %v1154_v56  ;;  %v2615_v56 = vld [vmem:[%s3996_s0 + $0x3e4] sm:$0xf] }
 0x1ea   :  { %1822 = vst.msk [vmem:[%s3997_s3 + $0x138] sm:$0xff] %vm1782_vm0, %v2731_v54  ;;  %v2349_v54 = vld [vmem:[%s3996_s0 + $0x3e0] sm:$0xf] }
 0x1eb   :  { %2732 = vtanh.f32 %v1659_v55  ;;  %v2617_v55 = vld [vmem:[%s3996_s0 + $0x3ec] sm:$0xf0] }
 0x1ee   :  { %v1491_v3 = vpop.f32.mrf.mxu2  ;;  %v1156_v8 = vpop.f32.mrf.mxu0 }
 0x1ef   :  { %v1660_v4 = vpop.f32.mrf.mxu3  ;;  %v1492_v7 = vadd.f32 %v1491_v3, %v1323_v2  ;;  %v1325_v9 = vpop.f32.mrf.mxu1  ;;  %v1157_v12 = vadd.f32 %v3561_v34, %v1156_v8  ;;  %v2350_v2 = vor.u32 %v2617_v55, %v2349_v54  ;;  %v2354_v3 = vor.u32 %v2615_v56, %v2351_v57 }
 0x1f0   :  { %v2362_v8 = vor.u32 %v2616_v60, %v2359_v61 }
 0x1f1   :  { %v2733_v13 = vpop.eup %2732  ;;  %v1661_v14 = vadd.f32 %v1660_v4, %v1492_v7  ;;  %1195 = vmatmul.bf16.gmra.mxu0 %v2318_v5  ;;  %v1326_v15 = vadd.f32 %v1325_v9, %v1157_v12  ;;  %v2358_v7 = vor.u32 %v2618_v59, %v2357_v58 }
 0x1f2   :  { %1823 = vst.msk [vmem:[%s3997_s3 + $0x140] sm:$0xff] %vm1782_vm0, %v2733_v13  ;;  %1364 = vmatmul.bf16.gmra.mxu1 %v2322_v6 }
 0x1f3   :  { %2734 = vtanh.f32 %v1661_v14  ;;  %1533 = vmatmul.bf16.gmra.mxu2 %v2326_v10 }
 0x1f4   :  { %1702 = vmatmul.bf16.gmra.mxu3 %v2330_v11 }
 0x1f6   :  { %v1494_v16 = vpop.f32.mrf.mxu2  ;;  %v1158_v19 = vpop.f32.mrf.mxu0 }
 0x1f7   :  { %v1663_v17 = vpop.f32.mrf.mxu3  ;;  %v1495_v18 = vadd.f32 %v1494_v16, %v1326_v15  ;;  %v1327_v20 = vpop.f32.mrf.mxu1  ;;  %v1159_v23 = vadd.f32 %v3561_v34, %v1158_v19 }
 0x1f9   :  { %v2735_v21 = vpop.eup %2734  ;;  %v1664_v22 = vadd.f32 %v1663_v17, %v1495_v18  ;;  %v1328_v32 = vadd.f32 %v1327_v20, %v1159_v23 }
 0x1fa   :  { %1824 = vst.msk [vmem:[%s3997_s3 + $0x148] sm:$0xff] %vm1782_vm0, %v2735_v21 }
 0x1fb   :  { %2736 = vtanh.f32 %v1664_v22 }
 0x1fe   :  { %v1496_v33 = vpop.f32.mrf.mxu2  ;;  %v1161_v38 = vpop.f32.mrf.mxu0 }
 0x1ff   :  { %v1665_v0 = vpop.f32.mrf.mxu3  ;;  %v1497_v37 = vadd.f32 %v1496_v33, %v1328_v32  ;;  %v1330_v39 = vpop.f32.mrf.mxu1  ;;  %v1162_v42 = vadd.f32 %v3561_v34, %v1161_v38 }
 0x201   :  { %v2737_v43 = vpop.eup %2736  ;;  %v1666_v44 = vadd.f32 %v1665_v0, %v1497_v37  ;;  %1200 = vmatmul.bf16.gmra.mxu0 %v2334_v35  ;;  %v1331_v45 = vadd.f32 %v1330_v39, %v1162_v42 }
 0x202   :  { %1825 = vst.msk [vmem:[%s3997_s3 + $0x150] sm:$0xff] %vm1782_vm0, %v2737_v43  ;;  %1369 = vmatmul.bf16.gmra.mxu1 %v2338_v36 }
 0x203   :  { %2738 = vtanh.f32 %v1666_v44  ;;  %1538 = vmatmul.bf16.gmra.mxu2 %v2342_v40 }
 0x204   :  { %1707 = vmatmul.bf16.gmra.mxu3 %v2346_v41 }
 0x206   :  { %v1499_v46 = vpop.f32.mrf.mxu2  ;;  %v1163_v49 = vpop.f32.mrf.mxu0 }
 0x207   :  { %v1668_v47 = vpop.f32.mrf.mxu3  ;;  %v1500_v48 = vadd.f32 %v1499_v46, %v1331_v45  ;;  %v1332_v50 = vpop.f32.mrf.mxu1  ;;  %v1164_v53 = vadd.f32 %v3561_v34, %v1163_v49 }
 0x209   :  { %v2739_v51 = vpop.eup %2738  ;;  %v1669_v52 = vadd.f32 %v1668_v47, %v1500_v48  ;;  %v1333_v62 = vadd.f32 %v1332_v50, %v1164_v53 }
 0x20a   :  { %1826 = vst.msk [vmem:[%s3997_s3 + $0x158] sm:$0xff] %vm1782_vm0, %v2739_v51 }
 0x20b   :  { %2740 = vtanh.f32 %v1669_v52 }
 0x20e   :  { %v1501_v63 = vpop.f32.mrf.mxu2  ;;  %v1166_v5 = vpop.f32.mrf.mxu0 }
 0x20f   :  { %v1670_v1 = vpop.f32.mrf.mxu3  ;;  %v1502_v4 = vadd.f32 %v1501_v63, %v1333_v62  ;;  %v1335_v6 = vpop.f32.mrf.mxu1  ;;  %v1167_v9 = vadd.f32 %v3561_v34, %v1166_v5 }
 0x211   :  { %v2741_v10 = vpop.eup %2740  ;;  %v1671_v11 = vadd.f32 %v1670_v1, %v1502_v4  ;;  %1205 = vmatmul.bf16.gmra.mxu0 %v2350_v2  ;;  %v1336_v12 = vadd.f32 %v1335_v6, %v1167_v9 }
 0x212   :  { %1827 = vst.msk [vmem:[%s3997_s3 + $0x160] sm:$0xff] %vm1782_vm0, %v2741_v10  ;;  %1374 = vmatmul.bf16.gmra.mxu1 %v2354_v3 }
 0x213   :  { %2742 = vtanh.f32 %v1671_v11  ;;  %1543 = vmatmul.bf16.gmra.mxu2 %v2358_v7 }
 0x214   :  { %1712 = vmatmul.bf16.gmra.mxu3 %v2362_v8 }
 0x216   :  { %v1504_v13 = vpop.f32.mrf.mxu2  ;;  %v1168_v16 = vpop.f32.mrf.mxu0 }
 0x217   :  { %v1673_v14 = vpop.f32.mrf.mxu3  ;;  %v1505_v15 = vadd.f32 %v1504_v13, %v1336_v12  ;;  %v1337_v17 = vpop.f32.mrf.mxu1  ;;  %v1169_v20 = vadd.f32 %v3561_v34, %v1168_v16 }
 0x219   :  { %v2743_v18 = vpop.eup %2742  ;;  %v1674_v19 = vadd.f32 %v1673_v14, %v1505_v15  ;;  %v1338_v21 = vadd.f32 %v1337_v17, %v1169_v20 }
 0x21a   :  { %1828 = vst.msk [vmem:[%s3997_s3 + $0x168] sm:$0xff] %vm1782_vm0, %v2743_v18 }
 0x21b   :  { %2744 = vtanh.f32 %v1674_v19 }
 0x21e   :  { %v1506_v22 = vpop.f32.mrf.mxu2  ;;  %v1171_v25 = vpop.f32.mrf.mxu0 }
 0x21f   :  { %v1675_v23 = vpop.f32.mrf.mxu3  ;;  %v1507_v24 = vadd.f32 %v1506_v22, %v1338_v21  ;;  %v1340_v26 = vpop.f32.mrf.mxu1  ;;  %v1172_v27 = vadd.f32 %v3561_v34, %v1171_v25 }
 0x221   :  { %v2745_v28 = vpop.eup %2744  ;;  %v1676_v29 = vadd.f32 %v1675_v23, %v1507_v24  ;;  %v1341_v30 = vadd.f32 %v1340_v26, %v1172_v27 }
 0x222   :  { %1829 = vst.msk [vmem:[%s3997_s3 + $0x170] sm:$0xff] %vm1782_vm0, %v2745_v28 }
 0x223   :  { %2746 = vtanh.f32 %v1676_v29 }
 0x226   :  { %v1509_v31 = vpop.f32.mrf.mxu2  ;;  %v1173_v0 = vpop.f32.mrf.mxu0 }
 0x227   :  { %v1678_v32 = vpop.f32.mrf.mxu3  ;;  %v1510_v33 = vadd.f32 %v1509_v31, %v1341_v30  ;;  %v1342_v35 = vpop.f32.mrf.mxu1  ;;  %v1174_v38 = vadd.f32 %v3561_v34, %v1173_v0 }
 0x229   :  { %v2747_v36 = vpop.eup %2746  ;;  %v1679_v37 = vadd.f32 %v1678_v32, %v1510_v33  ;;  %v1343_v39 = vadd.f32 %v1342_v35, %v1174_v38 }
 0x22a   :  { %1830 = vst.msk [vmem:[%s3997_s3 + $0x178] sm:$0xff] %vm1782_vm0, %v2747_v36 }
 0x22b   :  { %2748 = vtanh.f32 %v1679_v37 }
 0x22e   :  { %v1511_v40 = vpop.f32.mrf.mxu2  ;;  %v1176_v43 = vpop.f32.mrf.mxu0 }
 0x22f   :  { %v1680_v41 = vpop.f32.mrf.mxu3  ;;  %v1512_v42 = vadd.f32 %v1511_v40, %v1343_v39  ;;  %v1345_v44 = vpop.f32.mrf.mxu1  ;;  %v1177_v45 = vadd.f32 %v3561_v34, %v1176_v43 }
 0x231   :  { %v2749_v46 = vpop.eup %2748  ;;  %v1681_v47 = vadd.f32 %v1680_v41, %v1512_v42  ;;  %v1346_v48 = vadd.f32 %v1345_v44, %v1177_v45 }
 0x232   :  { %1831 = vst.msk [vmem:[%s3997_s3 + $0x180] sm:$0xff] %vm1782_vm0, %v2749_v46 }
 0x233   :  { %2750 = vtanh.f32 %v1681_v47 }
 0x236   :  { %v1514_v49 = vpop.f32.mrf.mxu2  ;;  %v1178_v52 = vpop.f32.mrf.mxu0 }
 0x237   :  { %v1683_v50 = vpop.f32.mrf.mxu3  ;;  %v1515_v51 = vadd.f32 %v1514_v49, %v1346_v48  ;;  %v1347_v53 = vpop.f32.mrf.mxu1  ;;  %v1179_v56 = vadd.f32 %v3561_v34, %v1178_v52 }
 0x239   :  { %v2751_v54 = vpop.eup %2750  ;;  %v1684_v55 = vadd.f32 %v1683_v50, %v1515_v51  ;;  %v1348_v57 = vadd.f32 %v1347_v53, %v1179_v56 }
 0x23a   :  { %1832 = vst.msk [vmem:[%s3997_s3 + $0x188] sm:$0xff] %vm1782_vm0, %v2751_v54 }
 0x23b   :  { %2752 = vtanh.f32 %v1684_v55 }
 0x23e   :  { %v1516_v58 = vpop.f32.mrf.mxu2  ;;  %v1181_v61 = vpop.f32.mrf.mxu0 }
 0x23f   :  { %v1685_v59 = vpop.f32.mrf.mxu3  ;;  %v1517_v60 = vadd.f32 %v1516_v58, %v1348_v57  ;;  %v1350_v62 = vpop.f32.mrf.mxu1  ;;  %v1182_v63 = vadd.f32 %v3561_v34, %v1181_v61 }
 0x241   :  { %v2753_v1 = vpop.eup %2752  ;;  %v1686_v2 = vadd.f32 %v1685_v59, %v1517_v60  ;;  %v1351_v3 = vadd.f32 %v1350_v62, %v1182_v63 }
 0x242   :  { %1833 = vst.msk [vmem:[%s3997_s3 + $0x190] sm:$0xff] %vm1782_vm0, %v2753_v1 }
 0x243   :  { %2754 = vtanh.f32 %v1686_v2 }
 0x246   :  { %v1519_v4 = vpop.f32.mrf.mxu2  ;;  %v1183_v7 = vpop.f32.mrf.mxu0 }
 0x247   :  { %v1688_v5 = vpop.f32.mrf.mxu3  ;;  %v1520_v6 = vadd.f32 %v1519_v4, %v1351_v3  ;;  %v1352_v8 = vpop.f32.mrf.mxu1  ;;  %v1184_v11 = vadd.f32 %v3561_v34, %v1183_v7 }
 0x249   :  { %v2755_v9 = vpop.eup %2754  ;;  %v1689_v10 = vadd.f32 %v1688_v5, %v1520_v6  ;;  %v1353_v12 = vadd.f32 %v1352_v8, %v1184_v11 }
 0x24a   :  { %1834 = vst.msk [vmem:[%s3997_s3 + $0x198] sm:$0xff] %vm1782_vm0, %v2755_v9 }
 0x24b   :  { %2756 = vtanh.f32 %v1689_v10 }
 0x24e   :  { %v1521_v13 = vpop.f32.mrf.mxu2  ;;  %v1186_v16 = vpop.f32.mrf.mxu0 }
 0x24f   :  { %v1690_v14 = vpop.f32.mrf.mxu3  ;;  %v1522_v15 = vadd.f32 %v1521_v13, %v1353_v12  ;;  %v1355_v17 = vpop.f32.mrf.mxu1  ;;  %v1187_v18 = vadd.f32 %v3561_v34, %v1186_v16 }
 0x251   :  { %v2757_v19 = vpop.eup %2756  ;;  %v1691_v20 = vadd.f32 %v1690_v14, %v1522_v15  ;;  %v1356_v21 = vadd.f32 %v1355_v17, %v1187_v18 }
 0x252   :  { %1835 = vst.msk [vmem:[%s3997_s3 + $0x1a0] sm:$0xff] %vm1782_vm0, %v2757_v19 }
 0x253   :  { %2758 = vtanh.f32 %v1691_v20 }
 0x256   :  { %v1524_v22 = vpop.f32.mrf.mxu2  ;;  %v1188_v25 = vpop.f32.mrf.mxu0 }
 0x257   :  { %v1693_v23 = vpop.f32.mrf.mxu3  ;;  %v1525_v24 = vadd.f32 %v1524_v22, %v1356_v21  ;;  %v1357_v26 = vpop.f32.mrf.mxu1  ;;  %v1189_v29 = vadd.f32 %v3561_v34, %v1188_v25 }
 0x259   :  { %v2759_v27 = vpop.eup %2758  ;;  %v1694_v28 = vadd.f32 %v1693_v23, %v1525_v24  ;;  %v1358_v30 = vadd.f32 %v1357_v26, %v1189_v29 }
 0x25a   :  { %1836 = vst.msk [vmem:[%s3997_s3 + $0x1a8] sm:$0xff] %vm1782_vm0, %v2759_v27 }
 0x25b   :  { %2760 = vtanh.f32 %v1694_v28 }
 0x25e   :  { %v1526_v31 = vpop.f32.mrf.mxu2  ;;  %v1191_v0 = vpop.f32.mrf.mxu0 }
 0x25f   :  { %v1695_v32 = vpop.f32.mrf.mxu3  ;;  %v1527_v33 = vadd.f32 %v1526_v31, %v1358_v30  ;;  %v1360_v35 = vpop.f32.mrf.mxu1  ;;  %v1192_v36 = vadd.f32 %v3561_v34, %v1191_v0 }
 0x261   :  { %v2761_v37 = vpop.eup %2760  ;;  %v1696_v38 = vadd.f32 %v1695_v32, %v1527_v33  ;;  %v1361_v39 = vadd.f32 %v1360_v35, %v1192_v36 }
 0x262   :  { %1837 = vst.msk [vmem:[%s3997_s3 + $0x1b0] sm:$0xff] %vm1782_vm0, %v2761_v37 }
 0x263   :  { %2762 = vtanh.f32 %v1696_v38 }
 0x266   :  { %v1529_v40 = vpop.f32.mrf.mxu2  ;;  %v1193_v43 = vpop.f32.mrf.mxu0 }
 0x267   :  { %v1698_v41 = vpop.f32.mrf.mxu3  ;;  %v1530_v42 = vadd.f32 %v1529_v40, %v1361_v39  ;;  %v1362_v44 = vpop.f32.mrf.mxu1  ;;  %v1194_v47 = vadd.f32 %v3561_v34, %v1193_v43 }
 0x269   :  { %v2763_v45 = vpop.eup %2762  ;;  %v1699_v46 = vadd.f32 %v1698_v41, %v1530_v42  ;;  %v1363_v48 = vadd.f32 %v1362_v44, %v1194_v47 }
 0x26a   :  { %1838 = vst.msk [vmem:[%s3997_s3 + $0x1b8] sm:$0xff] %vm1782_vm0, %v2763_v45 }
 0x26b   :  { %2764 = vtanh.f32 %v1699_v46 }
 0x26e   :  { %v1531_v49 = vpop.f32.mrf.mxu2  ;;  %v1196_v52 = vpop.f32.mrf.mxu0 }
 0x26f   :  { %v1700_v50 = vpop.f32.mrf.mxu3  ;;  %v1532_v51 = vadd.f32 %v1531_v49, %v1363_v48  ;;  %v1365_v53 = vpop.f32.mrf.mxu1  ;;  %v1197_v54 = vadd.f32 %v3561_v34, %v1196_v52  ;;  %v2781_v34 = vld [vmem:[%s3995_s2] ss:$0 sm:$0xff] }
 0x271   :  { %v2765_v55 = vpop.eup %2764  ;;  %v1701_v56 = vadd.f32 %v1700_v50, %v1532_v51  ;;  %v1366_v57 = vadd.f32 %v1365_v53, %v1197_v54 }
 0x272   :  { %1839 = vst.msk [vmem:[%s3997_s3 + $0x1c0] sm:$0xff] %vm1782_vm0, %v2765_v55 }
 0x273   :  { %2766 = vtanh.f32 %v1701_v56 }
 0x276   :  { %v1534_v58 = vpop.f32.mrf.mxu2  ;;  %v1198_v61 = vpop.f32.mrf.mxu0 }
 0x277   :  { %v1703_v59 = vpop.f32.mrf.mxu3  ;;  %v1535_v60 = vadd.f32 %v1534_v58, %v1366_v57  ;;  %v1367_v62 = vpop.f32.mrf.mxu1  ;;  %v1199_v2 = vadd.f32 %v2781_v34, %v1198_v61 }
 0x279   :  { %v2767_v63 = vpop.eup %2766  ;;  %v1704_v1 = vadd.f32 %v1703_v59, %v1535_v60  ;;  %v1368_v3 = vadd.f32 %v1367_v62, %v1199_v2 }
 0x27a   :  { %1840 = vst.msk [vmem:[%s3997_s3 + $0x1c8] sm:$0xff] %vm1782_vm0, %v2767_v63 }
 0x27b   :  { %2768 = vtanh.f32 %v1704_v1 }
 0x27e   :  { %v1536_v4 = vpop.f32.mrf.mxu2  ;;  %v1201_v7 = vpop.f32.mrf.mxu0 }
 0x27f   :  { %v1705_v5 = vpop.f32.mrf.mxu3  ;;  %v1537_v6 = vadd.f32 %v1536_v4, %v1368_v3  ;;  %v1370_v8 = vpop.f32.mrf.mxu1  ;;  %v1202_v9 = vadd.f32 %v2781_v34, %v1201_v7 }
 0x281   :  { %v2769_v10 = vpop.eup %2768  ;;  %v1706_v11 = vadd.f32 %v1705_v5, %v1537_v6  ;;  %v1371_v12 = vadd.f32 %v1370_v8, %v1202_v9 }
 0x282   :  { %1841 = vst.msk [vmem:[%s3997_s3 + $0x1d0] sm:$0xff] %vm1782_vm0, %v2769_v10 }
 0x283   :  { %2770 = vtanh.f32 %v1706_v11 }
 0x286   :  { %v1539_v13 = vpop.f32.mrf.mxu2  ;;  %v1203_v16 = vpop.f32.mrf.mxu0 }
 0x287   :  { %v1708_v14 = vpop.f32.mrf.mxu3  ;;  %v1540_v15 = vadd.f32 %v1539_v13, %v1371_v12  ;;  %v1372_v17 = vpop.f32.mrf.mxu1  ;;  %v1204_v20 = vadd.f32 %v2781_v34, %v1203_v16 }
 0x289   :  { %v2771_v18 = vpop.eup %2770  ;;  %v1709_v19 = vadd.f32 %v1708_v14, %v1540_v15  ;;  %v1373_v21 = vadd.f32 %v1372_v17, %v1204_v20 }
 0x28a   :  { %1842 = vst.msk [vmem:[%s3997_s3 + $0x1d8] sm:$0xff] %vm1782_vm0, %v2771_v18 }
 0x28b   :  { %2772 = vtanh.f32 %v1709_v19 }
 0x28e   :  { %v1541_v22 = vpop.f32.mrf.mxu2  ;;  %v1206_v25 = vpop.f32.mrf.mxu0 }
 0x28f   :  { %v1710_v23 = vpop.f32.mrf.mxu3  ;;  %v1542_v24 = vadd.f32 %v1541_v22, %v1373_v21  ;;  %v1207_v26 = vadd.f32 %v2781_v34, %v1206_v25  ;;  %v1375_v29 = vpop.f32.mrf.mxu1 }
 0x291   :  { %v2773_v27 = vpop.eup %2772  ;;  %v1711_v28 = vadd.f32 %v1710_v23, %v1542_v24  ;;  %v1376_v30 = vadd.f32 %v1375_v29, %v1207_v26 }
 0x292   :  { %1843 = vst.msk [vmem:[%s3997_s3 + $0x1e0] sm:$0xff] %vm1782_vm0, %v2773_v27 }
 0x293   :  { %2774 = vtanh.f32 %v1711_v28 }
 0x296   :  { %v1544_v31 = vpop.f32.mrf.mxu2  ;;  %v1208_v0 = vpop.f32.mrf.mxu0 }
 0x297   :  { %v1713_v32 = vpop.f32.mrf.mxu3  ;;  %v1545_v33 = vadd.f32 %v1544_v31, %v1376_v30  ;;  %v1209_v37 = vadd.f32 %v2781_v34, %v1208_v0  ;;  %v1377_v38 = vpop.f32.mrf.mxu1 }
 0x299   :  { %v2775_v35 = vpop.eup %2774  ;;  %v1714_v36 = vadd.f32 %v1713_v32, %v1545_v33  ;;  %v1378_v39 = vadd.f32 %v1377_v38, %v1209_v37 }
 0x29a   :  { %1844 = vst.msk [vmem:[%s3997_s3 + $0x1e8] sm:$0xff] %vm1782_vm0, %v2775_v35 }
 0x29b   :  { %2776 = vtanh.f32 %v1714_v36 }
 0x29e   :  { %v1546_v40 = vpop.f32.mrf.mxu2 }
 0x29f   :  { %v1547_v41 = vadd.f32 %v1546_v40, %v1378_v39  ;;  %v1715_v42 = vpop.f32.mrf.mxu3 }
 0x2a1   :  { %v2777_v43 = vpop.eup %2776  ;;  %v1716_v44 = vadd.f32 %v1715_v42, %v1547_v41 }
 0x2a2   :  { %1845 = vst.msk [vmem:[%s3997_s3 + $0x1f0] sm:$0xff] %vm1782_vm0, %v2777_v43 }
 0x2a3   :  { %2778 = vtanh.f32 %v1716_v44 }
 0x2a9   :  { %v2779_v45 = vpop.eup %2778 }
 0x2aa   :  { %1846 = vst.msk [vmem:[%s3997_s3 + $0x1f8] sm:$0xff] %vm1782_vm0, %v2779_v45 }

// kernel: generator_forward.9
= control target key start
LH: loop header
LB: loop body
LE: loop exit
PB: predicated region body
PF: predicated region fallthrough
CT: control target
= control target key end

     0   :  { %vm514_vm0 = vcmask 1040384   ;;  %vm369_vm1 = vcmask 146432   ;;  %vm767_vm2 = vcmask 7168   ;;  %s1871_s1 = inlined_call_operand.vmem [shape: bf16[18,1], index: 1, kind: input, shape index: {}]   ;;  %s1872_s0 = inlined_call_operand.vmem [shape: bf16[768,18], index: 0, kind: input, shape index: {}]   ;;  %s1873_s2 = inlined_call_operand.<no memory space> [shape: f32[1,1], index: 2, kind: input, shape index: {}]   ;;  %s1874_s3 = inlined_call_operand.vmem [shape: f32[768,1], index: 3, kind: output, shape index: {}]  }
   0x1   :  { %v115_v0 = vld [vmem:[%s1871_s1 + $0x8] sm:$0x1]  ;;  %v1160_v4 = vld [vmem:[%s1871_s1] sm:$0xff]  ;;  %v1114_v13 = vld [vmem:[%s1872_s0 + $0x10] sm:$0xff]  ;;  %v8_v29 = vstv %s1873_s2 }
   0x2   :  { %v365_v1 = vunpack.c.l.b16 %v115_v0  ;;  %v1112_v5 = vld [vmem:[%s1872_s0] sm:$0xff]  ;;  %v1113_v9 = vld [vmem:[%s1872_s0 + $0x8] sm:$0xff]  ;;  %v1126_v14 = vld [vmem:[%s1872_s0 + $0x70] sm:$0xff]  ;;  %9 = vst [vmem:[#allocation2] sm:$0x1] %v8_v29 }
   0x3   :  { %v1124_v6 = vld [vmem:[%s1872_s0 + $0x60] sm:$0xff]  ;;  %v1125_v10 = vld [vmem:[%s1872_s0 + $0x68] sm:$0xff]  ;;  %v1138_v15 = vld [vmem:[%s1872_s0 + $0xd0] sm:$0xff] }
   0x4   :  { %v367_v2 = vpack.c.b16 %v365_v1, %v365_v1  ;;  %v1136_v7 = vld [vmem:[%s1872_s0 + $0xc0] sm:$0xff]  ;;  %v1137_v11 = vld [vmem:[%s1872_s0 + $0xc8] sm:$0xff]  ;;  %v1150_v16 = vld [vmem:[%s1872_s0 + $0x130] sm:$0xff] }
   0x5   :  { %v1148_v8 = vld [vmem:[%s1872_s0 + $0x120] sm:$0xff]  ;;  %v1149_v12 = vld [vmem:[%s1872_s0 + $0x128] sm:$0xff]  ;;  %v1115_v17 = vld [vmem:[%s1872_s0 + $0x18] sm:$0xff] }
   0x6   :  { %v516_v3 = vsel %vm514_vm0, %v367_v2, 0  ;;  %v1127_v18 = vld [vmem:[%s1872_s0 + $0x78] sm:$0xff]  ;;  %v1116_v21 = vld [vmem:[%s1872_s0 + $0x20] sm:$0xff]  ;;  %v1117_v25 = vld [vmem:[%s1872_s0 + $0x28] sm:$0xff] }
   0x7   :  { %524 = vmatpush.bf16.msra.mxu0 %v516_v3  ;;  %1161 = vmatpush.bf16.msra.mxu1 %v516_v3  ;;  %v1139_v19 = vld [vmem:[%s1872_s0 + $0xd8] sm:$0xff]  ;;  %v1128_v22 = vld [vmem:[%s1872_s0 + $0x80] sm:$0xff]  ;;  %v1129_v26 = vld [vmem:[%s1872_s0 + $0x88] sm:$0xff] }
   0x8   :  { %1162 = vmatpush.bf16.msra.mxu2 %v516_v3  ;;  %1163 = vmatpush.bf16.msra.mxu3 %v516_v3  ;;  %v1151_v20 = vld [vmem:[%s1872_s0 + $0x138] sm:$0xff]  ;;  %v1140_v23 = vld [vmem:[%s1872_s0 + $0xe0] sm:$0xff]  ;;  %v1141_v27 = vld [vmem:[%s1872_s0 + $0xe8] sm:$0xff] }
   0x9   :  { %v1152_v24 = vld [vmem:[%s1872_s0 + $0x140] sm:$0xff]  ;;  %v1153_v28 = vld [vmem:[%s1872_s0 + $0x148] sm:$0xff]  ;;  %v1118_v30 = vld [vmem:[%s1872_s0 + $0x30] sm:$0xff] }
   0xa   :  { %v1130_v31 = vld [vmem:[%s1872_s0 + $0x90] sm:$0xff]  ;;  %v1119_v34 = vld [vmem:[%s1872_s0 + $0x38] sm:$0xff]  ;;  %v1325_v38 = vld [vmem:[#allocation2] ss:$0 sm:$0xff] }
   0xb   :  { %525 = vmatpush.bf16.msra.mxu0 %v1160_v4  ;;  %1164 = vmatpush.bf16.msra.mxu1 %v1160_v4  ;;  %v1142_v32 = vld [vmem:[%s1872_s0 + $0xf0] sm:$0xff]  ;;  %v1131_v35 = vld [vmem:[%s1872_s0 + $0x98] sm:$0xff]  ;;  %v1120_v39 = vld [vmem:[%s1872_s0 + $0x40] sm:$0xff] }
   0xc   :  { %1165 = vmatpush.bf16.msra.mxu2 %v1160_v4  ;;  %1166 = vmatpush.bf16.msra.mxu3 %v1160_v4  ;;  %v1154_v33 = vld [vmem:[%s1872_s0 + $0x150] sm:$0xff]  ;;  %v1143_v36 = vld [vmem:[%s1872_s0 + $0xf8] sm:$0xff]  ;;  %v1132_v40 = vld [vmem:[%s1872_s0 + $0xa0] sm:$0xff] }
   0xd   :  { %v1155_v37 = vld [vmem:[%s1872_s0 + $0x158] sm:$0xff]  ;;  %v1144_v43 = vld [vmem:[%s1872_s0 + $0x100] sm:$0xff]  ;;  %v1121_v57 = vld [vmem:[%s1872_s0 + $0x48] sm:$0xff] }
   0xe   :  { %1064 = vmatmul.msk.bf16.vlgmr.msra.gmra.mxu0 %vm369_vm1, %v1112_v5  ;;  %1076 = vmatmul.msk.bf16.vlgmr.msra.gmra.mxu1 %vm369_vm1, %v1124_v6  ;;  %v1156_v44 = vld [vmem:[%s1872_s0 + $0x160] sm:$0xff]  ;;  %v1133_v58 = vld [vmem:[%s1872_s0 + $0xa8] sm:$0xff] }
   0xf   :  { %1088 = vmatmul.msk.bf16.vlgmr.msra.gmra.mxu2 %vm369_vm1, %v1136_v7  ;;  %1100 = vmatmul.msk.bf16.vlgmr.msra.gmra.mxu3 %vm369_vm1, %v1148_v8  ;;  %v1145_v63 = vld [vmem:[%s1872_s0 + $0x108] sm:$0xff] }
  0x10   :  { %v1157_v0 = vld [vmem:[%s1872_s0 + $0x168] sm:$0xff] }
  0x1e   :  { %1065 = vmatmul.msk.bf16.gmra.mxu0 %vm369_vm1, %v1113_v9  ;;  %1077 = vmatmul.msk.bf16.gmra.mxu1 %vm369_vm1, %v1125_v10 }
  0x1f   :  { %1089 = vmatmul.msk.bf16.gmra.mxu2 %vm369_vm1, %v1137_v11  ;;  %1101 = vmatmul.msk.bf16.gmra.mxu3 %vm369_vm1, %v1149_v12 }
  0x2e   :  { %1066 = vmatmul.msk.bf16.gmra.mxu0 %vm369_vm1, %v1114_v13  ;;  %1078 = vmatmul.msk.bf16.gmra.mxu1 %vm369_vm1, %v1126_v14  ;;  %v1122_v13 = vld [vmem:[%s1872_s0 + $0x50] sm:$0xff] }
  0x2f   :  { %1090 = vmatmul.msk.bf16.gmra.mxu2 %vm369_vm1, %v1138_v15  ;;  %1102 = vmatmul.msk.bf16.gmra.mxu3 %vm369_vm1, %v1150_v16  ;;  %v1134_v14 = vld [vmem:[%s1872_s0 + $0xb0] sm:$0xff] }
  0x3e   :  { %1067 = vmatmul.msk.bf16.gmra.mxu0 %vm369_vm1, %v1115_v17  ;;  %1079 = vmatmul.msk.bf16.gmra.mxu1 %vm369_vm1, %v1127_v18 }
  0x3f   :  { %1091 = vmatmul.msk.bf16.gmra.mxu2 %vm369_vm1, %v1139_v19  ;;  %1103 = vmatmul.msk.bf16.gmra.mxu3 %vm369_vm1, %v1151_v20  ;;  %v1146_v19 = vld [vmem:[%s1872_s0 + $0x110] sm:$0xff] }
  0x40   :  { %v1158_v20 = vld [vmem:[%s1872_s0 + $0x170] sm:$0xff] }
  0x4e   :  { %1068 = vmatmul.msk.bf16.gmra.mxu0 %vm369_vm1, %v1116_v21  ;;  %1080 = vmatmul.msk.bf16.gmra.mxu1 %vm369_vm1, %v1128_v22 }
  0x4f   :  { %1092 = vmatmul.msk.bf16.gmra.mxu2 %vm369_vm1, %v1140_v23  ;;  %1104 = vmatmul.msk.bf16.gmra.mxu3 %vm369_vm1, %v1152_v24 }
  0x5e   :  { %1069 = vmatmul.msk.bf16.gmra.mxu0 %vm369_vm1, %v1117_v25  ;;  %1081 = vmatmul.msk.bf16.gmra.mxu1 %vm369_vm1, %v1129_v26 }
  0x5f   :  { %1093 = vmatmul.msk.bf16.gmra.mxu2 %vm369_vm1, %v1141_v27  ;;  %1105 = vmatmul.msk.bf16.gmra.mxu3 %vm369_vm1, %v1153_v28 }
  0x6e   :  { %1070 = vmatmul.msk.bf16.gmra.mxu0 %vm369_vm1, %v1118_v30  ;;  %1082 = vmatmul.msk.bf16.gmra.mxu1 %vm369_vm1, %v1130_v31 }
  0x6f   :  { %1094 = vmatmul.msk.bf16.gmra.mxu2 %vm369_vm1, %v1142_v32  ;;  %1106 = vmatmul.msk.bf16.gmra.mxu3 %vm369_vm1, %v1154_v33  ;;  %v1123_v33 = vld [vmem:[%s1872_s0 + $0x58] sm:$0xff] }
  0x7e   :  { %1071 = vmatmul.msk.bf16.gmra.mxu0 %vm369_vm1, %v1119_v34  ;;  %1083 = vmatmul.msk.bf16.gmra.mxu1 %vm369_vm1, %v1131_v35  ;;  %v1135_v34 = vld [vmem:[%s1872_s0 + $0xb8] sm:$0xff] }
  0x7f   :  { %1095 = vmatmul.msk.bf16.gmra.mxu2 %vm369_vm1, %v1143_v36  ;;  %1107 = vmatmul.msk.bf16.gmra.mxu3 %vm369_vm1, %v1155_v37 }
  0x8b   :  { %v527_v41 = vpop.f32.mrf.mxu0  ;;  %v587_v42 = vpop.f32.mrf.mxu1 }
  0x8c   :  { %v528_v45 = vadd.f32 %v1325_v38, %v527_v41  ;;  %v588_v46 = vadd.f32 %v1325_v38, %v587_v42  ;;  %v1159_v41 = vld [vmem:[%s1872_s0 + $0x178] sm:$0xff] }
  0x8e   :  { %768 = vst.msk [vmem:[%s1874_s3] sm:$0xff] %vm767_vm2, %v528_v45  ;;  %1072 = vmatmul.msk.bf16.gmra.mxu0 %vm369_vm1, %v1120_v39  ;;  %1084 = vmatmul.msk.bf16.gmra.mxu1 %vm369_vm1, %v1132_v40  ;;  %v1147_v40 = vld [vmem:[%s1872_s0 + $0x118] sm:$0xff] }
  0x8f   :  { %792 = vst.msk [vmem:[%s1874_s3 + $0xc0] sm:$0xff] %vm767_vm2, %v588_v46  ;;  %1096 = vmatmul.msk.bf16.gmra.mxu2 %vm369_vm1, %v1144_v43  ;;  %1108 = vmatmul.msk.bf16.gmra.mxu3 %vm369_vm1, %v1156_v44 }
  0x92   :  { %v647_v47 = vpop.f32.mrf.mxu2  ;;  %v707_v48 = vpop.f32.mrf.mxu3 }
  0x93   :  { %v648_v49 = vadd.f32 %v1325_v38, %v647_v47  ;;  %v708_v50 = vadd.f32 %v1325_v38, %v707_v48  ;;  %v529_v51 = vpop.f32.mrf.mxu0  ;;  %v589_v52 = vpop.f32.mrf.mxu1 }
  0x94   :  { %v530_v53 = vadd.f32 %v1325_v38, %v529_v51  ;;  %v590_v54 = vadd.f32 %v1325_v38, %v589_v52 }
  0x95   :  { %816 = vst.msk [vmem:[%s1874_s3 + $0x180] sm:$0xff] %vm767_vm2, %v648_v49 }
  0x96   :  { %840 = vst.msk [vmem:[%s1874_s3 + $0x240] sm:$0xff] %vm767_vm2, %v708_v50 }
  0x97   :  { %769 = vst.msk [vmem:[%s1874_s3 + $0x8] sm:$0xff] %vm767_vm2, %v530_v53 }
  0x98   :  { %793 = vst.msk [vmem:[%s1874_s3 + $0xc8] sm:$0xff] %vm767_vm2, %v590_v54 }
  0x9a   :  { %v649_v55 = vpop.f32.mrf.mxu2  ;;  %v709_v56 = vpop.f32.mrf.mxu3 }
  0x9b   :  { %v650_v59 = vadd.f32 %v1325_v38, %v649_v55  ;;  %v710_v60 = vadd.f32 %v1325_v38, %v709_v56  ;;  %v532_v61 = vpop.f32.mrf.mxu0  ;;  %v592_v62 = vpop.f32.mrf.mxu1 }
  0x9c   :  { %v533_v1 = vadd.f32 %v1325_v38, %v532_v61  ;;  %v593_v2 = vadd.f32 %v1325_v38, %v592_v62 }
  0x9d   :  { %817 = vst.msk [vmem:[%s1874_s3 + $0x188] sm:$0xff] %vm767_vm2, %v650_v59 }
  0x9e   :  { %841 = vst.msk [vmem:[%s1874_s3 + $0x248] sm:$0xff] %vm767_vm2, %v710_v60  ;;  %1073 = vmatmul.msk.bf16.gmra.mxu0 %vm369_vm1, %v1121_v57  ;;  %1085 = vmatmul.msk.bf16.gmra.mxu1 %vm369_vm1, %v1133_v58 }
  0x9f   :  { %770 = vst.msk [vmem:[%s1874_s3 + $0x10] sm:$0xff] %vm767_vm2, %v533_v1  ;;  %1097 = vmatmul.msk.bf16.gmra.mxu2 %vm369_vm1, %v1145_v63  ;;  %1109 = vmatmul.msk.bf16.gmra.mxu3 %vm369_vm1, %v1157_v0 }
  0xa0   :  { %794 = vst.msk [vmem:[%s1874_s3 + $0xd0] sm:$0xff] %vm767_vm2, %v593_v2 }
  0xa2   :  { %v652_v3 = vpop.f32.mrf.mxu2  ;;  %v712_v4 = vpop.f32.mrf.mxu3 }
  0xa3   :  { %v653_v5 = vadd.f32 %v1325_v38, %v652_v3  ;;  %v713_v6 = vadd.f32 %v1325_v38, %v712_v4  ;;  %v534_v7 = vpop.f32.mrf.mxu0  ;;  %v594_v8 = vpop.f32.mrf.mxu1 }
  0xa4   :  { %v535_v9 = vadd.f32 %v1325_v38, %v534_v7  ;;  %v595_v10 = vadd.f32 %v1325_v38, %v594_v8 }
  0xa5   :  { %818 = vst.msk [vmem:[%s1874_s3 + $0x190] sm:$0xff] %vm767_vm2, %v653_v5 }
  0xa6   :  { %842 = vst.msk [vmem:[%s1874_s3 + $0x250] sm:$0xff] %vm767_vm2, %v713_v6 }
  0xa7   :  { %771 = vst.msk [vmem:[%s1874_s3 + $0x18] sm:$0xff] %vm767_vm2, %v535_v9 }
  0xa8   :  { %795 = vst.msk [vmem:[%s1874_s3 + $0xd8] sm:$0xff] %vm767_vm2, %v595_v10 }
  0xaa   :  { %v654_v11 = vpop.f32.mrf.mxu2  ;;  %v714_v12 = vpop.f32.mrf.mxu3 }
  0xab   :  { %v655_v15 = vadd.f32 %v1325_v38, %v654_v11  ;;  %v715_v16 = vadd.f32 %v1325_v38, %v714_v12  ;;  %v537_v17 = vpop.f32.mrf.mxu0  ;;  %v597_v18 = vpop.f32.mrf.mxu1 }
  0xac   :  { %v538_v21 = vadd.f32 %v1325_v38, %v537_v17  ;;  %v598_v22 = vadd.f32 %v1325_v38, %v597_v18 }
  0xad   :  { %819 = vst.msk [vmem:[%s1874_s3 + $0x198] sm:$0xff] %vm767_vm2, %v655_v15 }
  0xae   :  { %843 = vst.msk [vmem:[%s1874_s3 + $0x258] sm:$0xff] %vm767_vm2, %v715_v16  ;;  %1074 = vmatmul.msk.bf16.gmra.mxu0 %vm369_vm1, %v1122_v13  ;;  %1086 = vmatmul.msk.bf16.gmra.mxu1 %vm369_vm1, %v1134_v14 }
  0xaf   :  { %772 = vst.msk [vmem:[%s1874_s3 + $0x20] sm:$0xff] %vm767_vm2, %v538_v21  ;;  %1098 = vmatmul.msk.bf16.gmra.mxu2 %vm369_vm1, %v1146_v19  ;;  %1110 = vmatmul.msk.bf16.gmra.mxu3 %vm369_vm1, %v1158_v20 }
  0xb0   :  { %796 = vst.msk [vmem:[%s1874_s3 + $0xe0] sm:$0xff] %vm767_vm2, %v598_v22 }
  0xb2   :  { %v657_v23 = vpop.f32.mrf.mxu2  ;;  %v717_v24 = vpop.f32.mrf.mxu3 }
  0xb3   :  { %v658_v25 = vadd.f32 %v1325_v38, %v657_v23  ;;  %v718_v26 = vadd.f32 %v1325_v38, %v717_v24  ;;  %v539_v27 = vpop.f32.mrf.mxu0  ;;  %v599_v28 = vpop.f32.mrf.mxu1 }
  0xb4   :  { %v540_v29 = vadd.f32 %v1325_v38, %v539_v27  ;;  %v600_v30 = vadd.f32 %v1325_v38, %v599_v28 }
  0xb5   :  { %820 = vst.msk [vmem:[%s1874_s3 + $0x1a0] sm:$0xff] %vm767_vm2, %v658_v25 }
  0xb6   :  { %844 = vst.msk [vmem:[%s1874_s3 + $0x260] sm:$0xff] %vm767_vm2, %v718_v26 }
  0xb7   :  { %773 = vst.msk [vmem:[%s1874_s3 + $0x28] sm:$0xff] %vm767_vm2, %v540_v29 }
  0xb8   :  { %797 = vst.msk [vmem:[%s1874_s3 + $0xe8] sm:$0xff] %vm767_vm2, %v600_v30 }
  0xba   :  { %v659_v31 = vpop.f32.mrf.mxu2  ;;  %v719_v32 = vpop.f32.mrf.mxu3 }
  0xbb   :  { %v660_v35 = vadd.f32 %v1325_v38, %v659_v31  ;;  %v720_v36 = vadd.f32 %v1325_v38, %v719_v32  ;;  %v542_v37 = vpop.f32.mrf.mxu0  ;;  %v602_v39 = vpop.f32.mrf.mxu1 }
  0xbc   :  { %v543_v42 = vadd.f32 %v1325_v38, %v542_v37  ;;  %v603_v43 = vadd.f32 %v1325_v38, %v602_v39 }
  0xbd   :  { %821 = vst.msk [vmem:[%s1874_s3 + $0x1a8] sm:$0xff] %vm767_vm2, %v660_v35 }
  0xbe   :  { %845 = vst.msk [vmem:[%s1874_s3 + $0x268] sm:$0xff] %vm767_vm2, %v720_v36  ;;  %1075 = vmatmul.msk.bf16.gmra.mxu0 %vm369_vm1, %v1123_v33  ;;  %1087 = vmatmul.msk.bf16.gmra.mxu1 %vm369_vm1, %v1135_v34 }
  0xbf   :  { %774 = vst.msk [vmem:[%s1874_s3 + $0x30] sm:$0xff] %vm767_vm2, %v543_v42  ;;  %1099 = vmatmul.msk.bf16.gmra.mxu2 %vm369_vm1, %v1147_v40  ;;  %1111 = vmatmul.msk.bf16.gmra.mxu3 %vm369_vm1, %v1159_v41 }
  0xc0   :  { %798 = vst.msk [vmem:[%s1874_s3 + $0xf0] sm:$0xff] %vm767_vm2, %v603_v43 }
  0xc2   :  { %v662_v44 = vpop.f32.mrf.mxu2  ;;  %v722_v45 = vpop.f32.mrf.mxu3 }
  0xc3   :  { %v663_v46 = vadd.f32 %v1325_v38, %v662_v44  ;;  %v723_v47 = vadd.f32 %v1325_v38, %v722_v45  ;;  %v544_v48 = vpop.f32.mrf.mxu0  ;;  %v604_v49 = vpop.f32.mrf.mxu1 }
  0xc4   :  { %v545_v50 = vadd.f32 %v1325_v38, %v544_v48  ;;  %v605_v51 = vadd.f32 %v1325_v38, %v604_v49 }
  0xc5   :  { %822 = vst.msk [vmem:[%s1874_s3 + $0x1b0] sm:$0xff] %vm767_vm2, %v663_v46 }
  0xc6   :  { %846 = vst.msk [vmem:[%s1874_s3 + $0x270] sm:$0xff] %vm767_vm2, %v723_v47 }
  0xc7   :  { %775 = vst.msk [vmem:[%s1874_s3 + $0x38] sm:$0xff] %vm767_vm2, %v545_v50 }
  0xc8   :  { %799 = vst.msk [vmem:[%s1874_s3 + $0xf8] sm:$0xff] %vm767_vm2, %v605_v51 }
  0xca   :  { %v664_v52 = vpop.f32.mrf.mxu2  ;;  %v724_v53 = vpop.f32.mrf.mxu3 }
  0xcb   :  { %v665_v54 = vadd.f32 %v1325_v38, %v664_v52  ;;  %v725_v55 = vadd.f32 %v1325_v38, %v724_v53  ;;  %v547_v56 = vpop.f32.mrf.mxu0  ;;  %v607_v57 = vpop.f32.mrf.mxu1 }
  0xcc   :  { %v548_v58 = vadd.f32 %v1325_v38, %v547_v56  ;;  %v608_v59 = vadd.f32 %v1325_v38, %v607_v57 }
  0xcd   :  { %823 = vst.msk [vmem:[%s1874_s3 + $0x1b8] sm:$0xff] %vm767_vm2, %v665_v54 }
  0xce   :  { %847 = vst.msk [vmem:[%s1874_s3 + $0x278] sm:$0xff] %vm767_vm2, %v725_v55 }
  0xcf   :  { %776 = vst.msk [vmem:[%s1874_s3 + $0x40] sm:$0xff] %vm767_vm2, %v548_v58 }
  0xd0   :  { %800 = vst.msk [vmem:[%s1874_s3 + $0x100] sm:$0xff] %vm767_vm2, %v608_v59 }
  0xd2   :  { %v667_v60 = vpop.f32.mrf.mxu2  ;;  %v727_v61 = vpop.f32.mrf.mxu3 }
  0xd3   :  { %v668_v62 = vadd.f32 %v1325_v38, %v667_v60  ;;  %v728_v63 = vadd.f32 %v1325_v38, %v727_v61  ;;  %v549_v0 = vpop.f32.mrf.mxu0  ;;  %v609_v1 = vpop.f32.mrf.mxu1 }
  0xd4   :  { %v550_v2 = vadd.f32 %v1325_v38, %v549_v0  ;;  %v610_v3 = vadd.f32 %v1325_v38, %v609_v1 }
  0xd5   :  { %824 = vst.msk [vmem:[%s1874_s3 + $0x1c0] sm:$0xff] %vm767_vm2, %v668_v62 }
  0xd6   :  { %848 = vst.msk [vmem:[%s1874_s3 + $0x280] sm:$0xff] %vm767_vm2, %v728_v63 }
  0xd7   :  { %777 = vst.msk [vmem:[%s1874_s3 + $0x48] sm:$0xff] %vm767_vm2, %v550_v2 }
  0xd8   :  { %801 = vst.msk [vmem:[%s1874_s3 + $0x108] sm:$0xff] %vm767_vm2, %v610_v3 }
  0xda   :  { %v669_v4 = vpop.f32.mrf.mxu2  ;;  %v729_v5 = vpop.f32.mrf.mxu3 }
  0xdb   :  { %v670_v6 = vadd.f32 %v1325_v38, %v669_v4  ;;  %v730_v7 = vadd.f32 %v1325_v38, %v729_v5  ;;  %v552_v8 = vpop.f32.mrf.mxu0  ;;  %v612_v9 = vpop.f32.mrf.mxu1 }
  0xdc   :  { %v553_v10 = vadd.f32 %v1325_v38, %v552_v8  ;;  %v613_v11 = vadd.f32 %v1325_v38, %v612_v9 }
  0xdd   :  { %825 = vst.msk [vmem:[%s1874_s3 + $0x1c8] sm:$0xff] %vm767_vm2, %v670_v6 }
  0xde   :  { %849 = vst.msk [vmem:[%s1874_s3 + $0x288] sm:$0xff] %vm767_vm2, %v730_v7 }
  0xdf   :  { %778 = vst.msk [vmem:[%s1874_s3 + $0x50] sm:$0xff] %vm767_vm2, %v553_v10 }
  0xe0   :  { %802 = vst.msk [vmem:[%s1874_s3 + $0x110] sm:$0xff] %vm767_vm2, %v613_v11 }
  0xe2   :  { %v672_v12 = vpop.f32.mrf.mxu2  ;;  %v732_v13 = vpop.f32.mrf.mxu3 }
  0xe3   :  { %v673_v14 = vadd.f32 %v1325_v38, %v672_v12  ;;  %v733_v15 = vadd.f32 %v1325_v38, %v732_v13  ;;  %v554_v16 = vpop.f32.mrf.mxu0  ;;  %v614_v17 = vpop.f32.mrf.mxu1 }
  0xe4   :  { %v555_v18 = vadd.f32 %v1325_v38, %v554_v16  ;;  %v615_v19 = vadd.f32 %v1325_v38, %v614_v17 }
  0xe5   :  { %826 = vst.msk [vmem:[%s1874_s3 + $0x1d0] sm:$0xff] %vm767_vm2, %v673_v14 }
  0xe6   :  { %850 = vst.msk [vmem:[%s1874_s3 + $0x290] sm:$0xff] %vm767_vm2, %v733_v15 }
  0xe7   :  { %779 = vst.msk [vmem:[%s1874_s3 + $0x58] sm:$0xff] %vm767_vm2, %v555_v18 }
  0xe8   :  { %803 = vst.msk [vmem:[%s1874_s3 + $0x118] sm:$0xff] %vm767_vm2, %v615_v19 }
  0xea   :  { %v674_v20 = vpop.f32.mrf.mxu2  ;;  %v734_v21 = vpop.f32.mrf.mxu3 }
  0xeb   :  { %v675_v22 = vadd.f32 %v1325_v38, %v674_v20  ;;  %v735_v23 = vadd.f32 %v1325_v38, %v734_v21  ;;  %v557_v24 = vpop.f32.mrf.mxu0  ;;  %v617_v25 = vpop.f32.mrf.mxu1 }
  0xec   :  { %v558_v26 = vadd.f32 %v1325_v38, %v557_v24  ;;  %v618_v27 = vadd.f32 %v1325_v38, %v617_v25 }
  0xed   :  { %827 = vst.msk [vmem:[%s1874_s3 + $0x1d8] sm:$0xff] %vm767_vm2, %v675_v22 }
  0xee   :  { %851 = vst.msk [vmem:[%s1874_s3 + $0x298] sm:$0xff] %vm767_vm2, %v735_v23 }
  0xef   :  { %780 = vst.msk [vmem:[%s1874_s3 + $0x60] sm:$0xff] %vm767_vm2, %v558_v26 }
  0xf0   :  { %804 = vst.msk [vmem:[%s1874_s3 + $0x120] sm:$0xff] %vm767_vm2, %v618_v27 }
  0xf2   :  { %v677_v28 = vpop.f32.mrf.mxu2  ;;  %v737_v29 = vpop.f32.mrf.mxu3 }
  0xf3   :  { %v678_v30 = vadd.f32 %v1325_v38, %v677_v28  ;;  %v738_v31 = vadd.f32 %v1325_v38, %v737_v29  ;;  %v559_v32 = vpop.f32.mrf.mxu0  ;;  %v619_v33 = vpop.f32.mrf.mxu1 }
  0xf4   :  { %v560_v34 = vadd.f32 %v1325_v38, %v559_v32  ;;  %v620_v35 = vadd.f32 %v1325_v38, %v619_v33 }
  0xf5   :  { %828 = vst.msk [vmem:[%s1874_s3 + $0x1e0] sm:$0xff] %vm767_vm2, %v678_v30 }
  0xf6   :  { %852 = vst.msk [vmem:[%s1874_s3 + $0x2a0] sm:$0xff] %vm767_vm2, %v738_v31 }
  0xf7   :  { %781 = vst.msk [vmem:[%s1874_s3 + $0x68] sm:$0xff] %vm767_vm2, %v560_v34 }
  0xf8   :  { %805 = vst.msk [vmem:[%s1874_s3 + $0x128] sm:$0xff] %vm767_vm2, %v620_v35 }
  0xfa   :  { %v679_v36 = vpop.f32.mrf.mxu2  ;;  %v739_v37 = vpop.f32.mrf.mxu3 }
  0xfb   :  { %v680_v39 = vadd.f32 %v1325_v38, %v679_v36  ;;  %v740_v40 = vadd.f32 %v1325_v38, %v739_v37  ;;  %v562_v41 = vpop.f32.mrf.mxu0  ;;  %v622_v42 = vpop.f32.mrf.mxu1 }
  0xfc   :  { %v563_v43 = vadd.f32 %v1325_v38, %v562_v41  ;;  %v623_v44 = vadd.f32 %v1325_v38, %v622_v42 }
  0xfd   :  { %829 = vst.msk [vmem:[%s1874_s3 + $0x1e8] sm:$0xff] %vm767_vm2, %v680_v39 }
  0xfe   :  { %853 = vst.msk [vmem:[%s1874_s3 + $0x2a8] sm:$0xff] %vm767_vm2, %v740_v40 }
  0xff   :  { %782 = vst.msk [vmem:[%s1874_s3 + $0x70] sm:$0xff] %vm767_vm2, %v563_v43 }
 0x100   :  { %806 = vst.msk [vmem:[%s1874_s3 + $0x130] sm:$0xff] %vm767_vm2, %v623_v44 }
 0x102   :  { %v682_v45 = vpop.f32.mrf.mxu2  ;;  %v742_v46 = vpop.f32.mrf.mxu3 }
 0x103   :  { %v683_v47 = vadd.f32 %v1325_v38, %v682_v45  ;;  %v743_v48 = vadd.f32 %v1325_v38, %v742_v46  ;;  %v564_v49 = vpop.f32.mrf.mxu0  ;;  %v624_v50 = vpop.f32.mrf.mxu1 }
 0x104   :  { %v565_v51 = vadd.f32 %v1325_v38, %v564_v49  ;;  %v625_v52 = vadd.f32 %v1325_v38, %v624_v50 }
 0x105   :  { %830 = vst.msk [vmem:[%s1874_s3 + $0x1f0] sm:$0xff] %vm767_vm2, %v683_v47 }
 0x106   :  { %854 = vst.msk [vmem:[%s1874_s3 + $0x2b0] sm:$0xff] %vm767_vm2, %v743_v48 }
 0x107   :  { %783 = vst.msk [vmem:[%s1874_s3 + $0x78] sm:$0xff] %vm767_vm2, %v565_v51 }
 0x108   :  { %807 = vst.msk [vmem:[%s1874_s3 + $0x138] sm:$0xff] %vm767_vm2, %v625_v52 }
 0x10a   :  { %v684_v53 = vpop.f32.mrf.mxu2  ;;  %v744_v54 = vpop.f32.mrf.mxu3 }
 0x10b   :  { %v685_v55 = vadd.f32 %v1325_v38, %v684_v53  ;;  %v745_v56 = vadd.f32 %v1325_v38, %v744_v54  ;;  %v567_v57 = vpop.f32.mrf.mxu0  ;;  %v627_v58 = vpop.f32.mrf.mxu1 }
 0x10c   :  { %v568_v59 = vadd.f32 %v1325_v38, %v567_v57  ;;  %v628_v60 = vadd.f32 %v1325_v38, %v627_v58 }
 0x10d   :  { %831 = vst.msk [vmem:[%s1874_s3 + $0x1f8] sm:$0xff] %vm767_vm2, %v685_v55 }
 0x10e   :  { %855 = vst.msk [vmem:[%s1874_s3 + $0x2b8] sm:$0xff] %vm767_vm2, %v745_v56 }
 0x10f   :  { %784 = vst.msk [vmem:[%s1874_s3 + $0x80] sm:$0xff] %vm767_vm2, %v568_v59 }
 0x110   :  { %808 = vst.msk [vmem:[%s1874_s3 + $0x140] sm:$0xff] %vm767_vm2, %v628_v60 }
 0x112   :  { %v687_v61 = vpop.f32.mrf.mxu2  ;;  %v747_v62 = vpop.f32.mrf.mxu3 }
 0x113   :  { %v688_v63 = vadd.f32 %v1325_v38, %v687_v61  ;;  %v748_v0 = vadd.f32 %v1325_v38, %v747_v62  ;;  %v569_v1 = vpop.f32.mrf.mxu0  ;;  %v629_v2 = vpop.f32.mrf.mxu1 }
 0x114   :  { %v570_v3 = vadd.f32 %v1325_v38, %v569_v1  ;;  %v630_v4 = vadd.f32 %v1325_v38, %v629_v2 }
 0x115   :  { %832 = vst.msk [vmem:[%s1874_s3 + $0x200] sm:$0xff] %vm767_vm2, %v688_v63 }
 0x116   :  { %856 = vst.msk [vmem:[%s1874_s3 + $0x2c0] sm:$0xff] %vm767_vm2, %v748_v0 }
 0x117   :  { %785 = vst.msk [vmem:[%s1874_s3 + $0x88] sm:$0xff] %vm767_vm2, %v570_v3 }
 0x118   :  { %809 = vst.msk [vmem:[%s1874_s3 + $0x148] sm:$0xff] %vm767_vm2, %v630_v4 }
 0x11a   :  { %v689_v5 = vpop.f32.mrf.mxu2  ;;  %v749_v6 = vpop.f32.mrf.mxu3 }
 0x11b   :  { %v690_v7 = vadd.f32 %v1325_v38, %v689_v5  ;;  %v750_v8 = vadd.f32 %v1325_v38, %v749_v6  ;;  %v572_v9 = vpop.f32.mrf.mxu0  ;;  %v632_v10 = vpop.f32.mrf.mxu1 }
 0x11c   :  { %v573_v11 = vadd.f32 %v1325_v38, %v572_v9  ;;  %v633_v12 = vadd.f32 %v1325_v38, %v632_v10 }
 0x11d   :  { %833 = vst.msk [vmem:[%s1874_s3 + $0x208] sm:$0xff] %vm767_vm2, %v690_v7 }
 0x11e   :  { %857 = vst.msk [vmem:[%s1874_s3 + $0x2c8] sm:$0xff] %vm767_vm2, %v750_v8 }
 0x11f   :  { %786 = vst.msk [vmem:[%s1874_s3 + $0x90] sm:$0xff] %vm767_vm2, %v573_v11 }
 0x120   :  { %810 = vst.msk [vmem:[%s1874_s3 + $0x150] sm:$0xff] %vm767_vm2, %v633_v12 }
 0x122   :  { %v692_v13 = vpop.f32.mrf.mxu2  ;;  %v752_v14 = vpop.f32.mrf.mxu3 }
 0x123   :  { %v693_v15 = vadd.f32 %v1325_v38, %v692_v13  ;;  %v753_v16 = vadd.f32 %v1325_v38, %v752_v14  ;;  %v574_v17 = vpop.f32.mrf.mxu0  ;;  %v634_v18 = vpop.f32.mrf.mxu1 }
 0x124   :  { %v575_v19 = vadd.f32 %v1325_v38, %v574_v17  ;;  %v635_v20 = vadd.f32 %v1325_v38, %v634_v18 }
 0x125   :  { %834 = vst.msk [vmem:[%s1874_s3 + $0x210] sm:$0xff] %vm767_vm2, %v693_v15 }
 0x126   :  { %858 = vst.msk [vmem:[%s1874_s3 + $0x2d0] sm:$0xff] %vm767_vm2, %v753_v16 }
 0x127   :  { %787 = vst.msk [vmem:[%s1874_s3 + $0x98] sm:$0xff] %vm767_vm2, %v575_v19 }
 0x128   :  { %811 = vst.msk [vmem:[%s1874_s3 + $0x158] sm:$0xff] %vm767_vm2, %v635_v20 }
 0x12a   :  { %v694_v21 = vpop.f32.mrf.mxu2  ;;  %v754_v22 = vpop.f32.mrf.mxu3 }
 0x12b   :  { %v695_v23 = vadd.f32 %v1325_v38, %v694_v21  ;;  %v755_v24 = vadd.f32 %v1325_v38, %v754_v22  ;;  %v577_v25 = vpop.f32.mrf.mxu0  ;;  %v637_v26 = vpop.f32.mrf.mxu1 }
 0x12c   :  { %v578_v27 = vadd.f32 %v1325_v38, %v577_v25  ;;  %v638_v28 = vadd.f32 %v1325_v38, %v637_v26 }
 0x12d   :  { %835 = vst.msk [vmem:[%s1874_s3 + $0x218] sm:$0xff] %vm767_vm2, %v695_v23 }
 0x12e   :  { %859 = vst.msk [vmem:[%s1874_s3 + $0x2d8] sm:$0xff] %vm767_vm2, %v755_v24 }
 0x12f   :  { %788 = vst.msk [vmem:[%s1874_s3 + $0xa0] sm:$0xff] %vm767_vm2, %v578_v27 }
 0x130   :  { %812 = vst.msk [vmem:[%s1874_s3 + $0x160] sm:$0xff] %vm767_vm2, %v638_v28 }
 0x132   :  { %v697_v29 = vpop.f32.mrf.mxu2  ;;  %v757_v30 = vpop.f32.mrf.mxu3 }
 0x133   :  { %v698_v31 = vadd.f32 %v1325_v38, %v697_v29  ;;  %v758_v32 = vadd.f32 %v1325_v38, %v757_v30  ;;  %v579_v33 = vpop.f32.mrf.mxu0  ;;  %v639_v34 = vpop.f32.mrf.mxu1 }
 0x134   :  { %v580_v35 = vadd.f32 %v1325_v38, %v579_v33  ;;  %v640_v36 = vadd.f32 %v1325_v38, %v639_v34 }
 0x135   :  { %836 = vst.msk [vmem:[%s1874_s3 + $0x220] sm:$0xff] %vm767_vm2, %v698_v31 }
 0x136   :  { %860 = vst.msk [vmem:[%s1874_s3 + $0x2e0] sm:$0xff] %vm767_vm2, %v758_v32 }
 0x137   :  { %789 = vst.msk [vmem:[%s1874_s3 + $0xa8] sm:$0xff] %vm767_vm2, %v580_v35 }
 0x138   :  { %813 = vst.msk [vmem:[%s1874_s3 + $0x168] sm:$0xff] %vm767_vm2, %v640_v36 }
 0x13a   :  { %v699_v37 = vpop.f32.mrf.mxu2  ;;  %v759_v39 = vpop.f32.mrf.mxu3 }
 0x13b   :  { %v700_v40 = vadd.f32 %v1325_v38, %v699_v37  ;;  %v760_v41 = vadd.f32 %v1325_v38, %v759_v39  ;;  %v582_v42 = vpop.f32.mrf.mxu0  ;;  %v642_v43 = vpop.f32.mrf.mxu1 }
 0x13c   :  { %v583_v44 = vadd.f32 %v1325_v38, %v582_v42  ;;  %v643_v45 = vadd.f32 %v1325_v38, %v642_v43 }
 0x13d   :  { %837 = vst.msk [vmem:[%s1874_s3 + $0x228] sm:$0xff] %vm767_vm2, %v700_v40 }
 0x13e   :  { %861 = vst.msk [vmem:[%s1874_s3 + $0x2e8] sm:$0xff] %vm767_vm2, %v760_v41 }
 0x13f   :  { %790 = vst.msk [vmem:[%s1874_s3 + $0xb0] sm:$0xff] %vm767_vm2, %v583_v44 }
 0x140   :  { %814 = vst.msk [vmem:[%s1874_s3 + $0x170] sm:$0xff] %vm767_vm2, %v643_v45 }
 0x142   :  { %v702_v46 = vpop.f32.mrf.mxu2  ;;  %v762_v47 = vpop.f32.mrf.mxu3 }
 0x143   :  { %v703_v48 = vadd.f32 %v1325_v38, %v702_v46  ;;  %v763_v49 = vadd.f32 %v1325_v38, %v762_v47  ;;  %v584_v50 = vpop.f32.mrf.mxu0  ;;  %v644_v51 = vpop.f32.mrf.mxu1 }
 0x144   :  { %v585_v52 = vadd.f32 %v1325_v38, %v584_v50  ;;  %v645_v53 = vadd.f32 %v1325_v38, %v644_v51 }
 0x145   :  { %838 = vst.msk [vmem:[%s1874_s3 + $0x230] sm:$0xff] %vm767_vm2, %v703_v48 }
 0x146   :  { %862 = vst.msk [vmem:[%s1874_s3 + $0x2f0] sm:$0xff] %vm767_vm2, %v763_v49 }
 0x147   :  { %791 = vst.msk [vmem:[%s1874_s3 + $0xb8] sm:$0xff] %vm767_vm2, %v585_v52 }
 0x148   :  { %815 = vst.msk [vmem:[%s1874_s3 + $0x178] sm:$0xff] %vm767_vm2, %v645_v53 }
 0x14a   :  { %v704_v54 = vpop.f32.mrf.mxu2  ;;  %v764_v55 = vpop.f32.mrf.mxu3 }
 0x14b   :  { %v705_v56 = vadd.f32 %v1325_v38, %v704_v54  ;;  %v765_v57 = vadd.f32 %v1325_v38, %v764_v55 }
 0x14d   :  { %839 = vst.msk [vmem:[%s1874_s3 + $0x238] sm:$0xff] %vm767_vm2, %v705_v56 }
 0x14e   :  { %863 = vst.msk [vmem:[%s1874_s3 + $0x2f8] sm:$0xff] %vm767_vm2, %v765_v57 }

</bundles_post_ra>
